<compile_context>
chip_gen: v7x
topology: tpu7x:2x2x1
jax: 0.10.0
libtpu: 0.0.40
codegen_flags: <defaults>
</compile_context>

<pallas_src>
import functools
import math

import jax
import jax.numpy as jnp
from jax.experimental import pallas as pl
from jax.experimental.pallas import tpu as pltpu


# ----------------------------------------------------------------------------
# Fused Pallas kernel: 6x (GraphConv + activation) + pairwise-distance adjacency
# ----------------------------------------------------------------------------
def _fused_netgcn2_kernel(t, a_ref, x_ref,
                          w1_ref, w2_ref, w3_ref, w4_ref, w5_ref, w6_ref,
                          out_ref, adj_ref):
    A = a_ref[...]

    def lrelu(y):
        # max(y, 0.01*y) == LeakyReLU(0.01)
        return jnp.maximum(y, 0.01 * y)

    def graph_conv(h, w_ref):
        w = w_ref[...]
        fin, fout = w_ref.shape
        if fout >= fin:
            # propagate first: intermediate (N, Fin) is the smaller one
            return jnp.dot(jnp.dot(A, h, preferred_element_type=jnp.float32), w,
                           preferred_element_type=jnp.float32)
        else:
            # transform first: intermediate (N, Fout) is the smaller one
            return jnp.dot(A, jnp.dot(h, w, preferred_element_type=jnp.float32),
                           preferred_element_type=jnp.float32)

    h = lrelu(graph_conv(x_ref[...], w1_ref))   # graph1 + lrelu
    h = lrelu(graph_conv(h, w2_ref))            # graph2 + lrelu
    h = lrelu(graph_conv(h, w3_ref))            # graph3 + lrelu

    # Adjacency on the graph3 features:  a[i,j] = exp(-||h_i - h_j|| / t)
    # Explicit pairwise differences (no Gram trick -> no cancellation, exact 0 on
    # the diagonal, matching the reference semantics).
    diff = h[:, None, :] - h[None, :, :]                       # (N, N, F3)
    dist = jnp.sqrt(jnp.sum(diff * diff, axis=-1))             # (N, N)
    adj_ref[...] = jnp.exp(-dist / t)

    h = lrelu(graph_conv(h, w4_ref))            # graph4 + lrelu
    h = lrelu(graph_conv(h, w5_ref))            # graph5 + lrelu
    out_ref[...] = jnp.maximum(graph_conv(h, w6_ref), 0.0)   # graph6 + relu


def netgcn2_forward(A, X, params, *, t=0.01):
    """Fused forward of _netGCN2: returns (output, a)."""
    N = A.shape[0]
    Fout = params[-1].shape[1]

    # Single-block (no grid) fused path: everything must fit comfortably in VMEM.
    total_bytes = 4 * (A.size + X.size + sum(int(p.size) for p in params)
                       + N * Fout + N * N)
    assert total_bytes < 24 * 1024 * 1024, (
        "fused single-block kernel exceeds VMEM budget; needs the tiled path")
    # TODO(synk): tiled grid over node blocks for large N (v7x has only 64 MiB VMEM).

    vmem = pl.BlockSpec(memory_space=pltpu.MemorySpace.VMEM)
    kernel = functools.partial(_fused_netgcn2_kernel, t)
    out, adj = pl.pallas_call(
        kernel,
        out_shape=(jax.ShapeDtypeStruct((N, Fout), jnp.float32),
                   jax.ShapeDtypeStruct((N, N), jnp.float32)),
        in_specs=[vmem] * 8,
        out_specs=(vmem, vmem),
        compiler_params=pltpu.CompilerParams(vmem_limit_bytes=32 * 1024 * 1024),
    )(A, X, *params)
    return out, adj


# ----------------------------------------------------------------------------
# Parameters (kaiming_uniform(a=sqrt(5)) on torch.Tensor(in, out) -> bound=1/sqrt(out))
# ----------------------------------------------------------------------------
def init_params(key, in_features, out_features):
    dims = [in_features, 1024, 512, 256, 512, 1024, out_features]
    params = []
    for i in range(6):
        fin, fout = dims[i], dims[i + 1]
        key, sub = jax.random.split(key)
        bound = 1.0 / math.sqrt(fout)  # fan_in of torch.Tensor(fin, fout) is fout
        params.append(jax.random.uniform(sub, (fin, fout), jnp.float32, -bound, bound))
    return params


# ----------------------------------------------------------------------------
# Pure-JAX reference (matches the PyTorch module semantics)
# ----------------------------------------------------------------------------
def _ref_forward(A, X, params, *, t=0.01):
    hi = jax.lax.Precision.HIGHEST

    def lrelu(x):
        return jnp.where(x >= 0, x, 0.01 * x)

    def gc(a, h, w):
        return jnp.dot(jnp.dot(a, h, precision=hi), w, precision=hi)

    w1, w2, w3, w4, w5, w6 = params
    o = lrelu(gc(A, X, w1))
    o = lrelu(gc(A, o, w2))
    o = lrelu(gc(A, o, w3))
    diff = o[:, None, :] - o[None, :, :]
    dist = jnp.sqrt(jnp.sum(diff * diff, axis=-1))
    a = jnp.exp(-dist / t)
    o = lrelu(gc(A, o, w4))
    o = lrelu(gc(A, o, w5))
    o = jnp.maximum(gc(A, o, w6), 0.0)
    return o, a


if __name__ == "__main__":
    key = jax.random.PRNGKey(0)
    N = 8               # number of graph nodes
    in_features = 64
    out_features = 64

    k_a, k_x, k_p = jax.random.split(key, 3)
    A = jax.random.uniform(k_a, (N, N), jnp.float32)
    X = jax.random.normal(k_x, (N, in_features), jnp.float32)
    params = init_params(k_p, in_features, out_features)

    fwd = jax.jit(netgcn2_forward)
    out, a = fwd(A, X, params)
    out = jax.block_until_ready(out)
    a = jax.block_until_ready(a)

    ref_out, ref_a = _ref_forward(A, X, params)
    assert out.shape == (N, out_features) and a.shape == (N, N)
    assert jnp.allclose(out, ref_out, rtol=1e-3, atol=1e-3)
    assert jnp.allclose(a, ref_a, rtol=1e-3, atol=1e-3)

    print("KERNEL_OK")
</pallas_src>

<mosaic_0001>
module attributes {stable_mosaic.version = 11 : i64} {
  func.func @_fused_netgcn2_kernel(%arg0: memref<8x8xf32, #tpu.memory_space<vmem>>, %arg1: memref<8x64xf32, #tpu.memory_space<vmem>>, %arg2: memref<64x1024xf32, #tpu.memory_space<vmem>>, %arg3: memref<1024x512xf32, #tpu.memory_space<vmem>>, %arg4: memref<512x256xf32, #tpu.memory_space<vmem>>, %arg5: memref<256x512xf32, #tpu.memory_space<vmem>>, %arg6: memref<512x1024xf32, #tpu.memory_space<vmem>>, %arg7: memref<1024x64xf32, #tpu.memory_space<vmem>>, %arg8: memref<8x64xf32, #tpu.memory_space<vmem>>, %arg9: memref<8x8xf32, #tpu.memory_space<vmem>>) attributes {dimension_semantics = [], scalar_prefetch = 0 : i64, scratch_operands = 0 : i64, tpu.core_type = #tpu.core_type<tc>} {
    %c0 = arith.constant 0 : index
    %c0_0 = arith.constant 0 : index
    %0 = vector.load %arg0[%c0, %c0_0] : memref<8x8xf32, #tpu.memory_space<vmem>>, vector<8x8xf32>
    %c0_1 = arith.constant 0 : index
    %c0_2 = arith.constant 0 : index
    %1 = vector.load %arg1[%c0_1, %c0_2] : memref<8x64xf32, #tpu.memory_space<vmem>>, vector<8x64xf32>
    %c0_3 = arith.constant 0 : index
    %c0_4 = arith.constant 0 : index
    %2 = vector.load %arg2[%c0_3, %c0_4] : memref<64x1024xf32, #tpu.memory_space<vmem>>, vector<64x1024xf32>
    %cst = arith.constant dense<0.000000e+00> : vector<8x64xf32>
    %3 = tpu.matmul %0, %1, %cst {dimension_numbers = #tpu.dot_dimension_numbers<[1], [0], [0], [1], [0, 0, 1, 1], [], []>} : vector<8x8xf32>, vector<8x64xf32>, vector<8x64xf32> -> vector<8x64xf32>
    %cst_5 = arith.constant dense<0.000000e+00> : vector<8x1024xf32>
    %4 = tpu.matmul %3, %2, %cst_5 {dimension_numbers = #tpu.dot_dimension_numbers<[1], [0], [0], [1], [0, 0, 1, 1], [], []>} : vector<8x64xf32>, vector<64x1024xf32>, vector<8x1024xf32> -> vector<8x1024xf32>
    %cst_6 = arith.constant 0.00999999977 : f32
    %5 = vector.broadcast %cst_6 : f32 to vector<8x1024xf32>
    %6 = arith.mulf %5, %4 : vector<8x1024xf32>
    %7 = arith.maximumf %4, %6 : vector<8x1024xf32>
    %c0_7 = arith.constant 0 : index
    %c0_8 = arith.constant 0 : index
    %8 = vector.load %arg3[%c0_7, %c0_8] : memref<1024x512xf32, #tpu.memory_space<vmem>>, vector<1024x512xf32>
    %cst_9 = arith.constant dense<0.000000e+00> : vector<8x512xf32>
    %9 = tpu.matmul %7, %8, %cst_9 {dimension_numbers = #tpu.dot_dimension_numbers<[1], [0], [0], [1], [0, 0, 1, 1], [], []>} : vector<8x1024xf32>, vector<1024x512xf32>, vector<8x512xf32> -> vector<8x512xf32>
    %cst_10 = arith.constant dense<0.000000e+00> : vector<8x512xf32>
    %10 = tpu.matmul %0, %9, %cst_10 {dimension_numbers = #tpu.dot_dimension_numbers<[1], [0], [0], [1], [0, 0, 1, 1], [], []>} : vector<8x8xf32>, vector<8x512xf32>, vector<8x512xf32> -> vector<8x512xf32>
    %cst_11 = arith.constant 0.00999999977 : f32
    %11 = vector.broadcast %cst_11 : f32 to vector<8x512xf32>
    %12 = arith.mulf %11, %10 : vector<8x512xf32>
    %13 = arith.maximumf %10, %12 : vector<8x512xf32>
    %c0_12 = arith.constant 0 : index
    %c0_13 = arith.constant 0 : index
    %14 = vector.load %arg4[%c0_12, %c0_13] : memref<512x256xf32, #tpu.memory_space<vmem>>, vector<512x256xf32>
    %cst_14 = arith.constant dense<0.000000e+00> : vector<8x256xf32>
    %15 = tpu.matmul %13, %14, %cst_14 {dimension_numbers = #tpu.dot_dimension_numbers<[1], [0], [0], [1], [0, 0, 1, 1], [], []>} : vector<8x512xf32>, vector<512x256xf32>, vector<8x256xf32> -> vector<8x256xf32>
    %cst_15 = arith.constant dense<0.000000e+00> : vector<8x256xf32>
    %16 = tpu.matmul %0, %15, %cst_15 {dimension_numbers = #tpu.dot_dimension_numbers<[1], [0], [0], [1], [0, 0, 1, 1], [], []>} : vector<8x8xf32>, vector<8x256xf32>, vector<8x256xf32> -> vector<8x256xf32>
    %cst_16 = arith.constant 0.00999999977 : f32
    %17 = vector.broadcast %cst_16 : f32 to vector<8x256xf32>
    %18 = arith.mulf %17, %16 : vector<8x256xf32>
    %19 = arith.maximumf %16, %18 : vector<8x256xf32>
    %20 = vector.shape_cast %19 : vector<8x256xf32> to vector<8x1x256xf32>
    %21 = vector.shape_cast %19 : vector<8x256xf32> to vector<1x8x256xf32>
    %22 = vector.broadcast %20 : vector<8x1x256xf32> to vector<8x8x256xf32>
    %23 = vector.broadcast %21 : vector<1x8x256xf32> to vector<8x8x256xf32>
    %24 = arith.subf %22, %23 : vector<8x8x256xf32>
    %25 = arith.mulf %24, %24 : vector<8x8x256xf32>
    %cst_17 = arith.constant dense<0.000000e+00> : vector<8x8xf32>
    %26 = vector.multi_reduction <add>, %25, %cst_17 [2] : vector<8x8x256xf32> to vector<8x8xf32>
    %27 = math.sqrt %26 : vector<8x8xf32>
    %cst_18 = arith.constant 0.000000e+00 : f32
    %28 = vector.broadcast %cst_18 : f32 to vector<8x8xf32>
    %29 = arith.subf %28, %27 : vector<8x8xf32>
    %cst_19 = arith.constant 0.00999999977 : f32
    %30 = vector.broadcast %cst_19 : f32 to vector<8x8xf32>
    %31 = arith.divf %29, %30 : vector<8x8xf32>
    %32 = math.exp %31 : vector<8x8xf32>
    %c0_20 = arith.constant 0 : index
    %c0_21 = arith.constant 0 : index
    %33 = vector.load %arg9[%c0_20, %c0_21] : memref<8x8xf32, #tpu.memory_space<vmem>>, vector<8x8xf32>
    tpu.vector_store %arg9[%c0_20, %c0_21], %32 {strides = array<i32>} : memref<8x8xf32, #tpu.memory_space<vmem>>, vector<8x8xf32>,
    %c0_22 = arith.constant 0 : index
    %c0_23 = arith.constant 0 : index
    %34 = vector.load %arg5[%c0_22, %c0_23] : memref<256x512xf32, #tpu.memory_space<vmem>>, vector<256x512xf32>
    %cst_24 = arith.constant dense<0.000000e+00> : vector<8x256xf32>
    %35 = tpu.matmul %0, %19, %cst_24 {dimension_numbers = #tpu.dot_dimension_numbers<[1], [0], [0], [1], [0, 0, 1, 1], [], []>} : vector<8x8xf32>, vector<8x256xf32>, vector<8x256xf32> -> vector<8x256xf32>
    %cst_25 = arith.constant dense<0.000000e+00> : vector<8x512xf32>
    %36 = tpu.matmul %35, %34, %cst_25 {dimension_numbers = #tpu.dot_dimension_numbers<[1], [0], [0], [1], [0, 0, 1, 1], [], []>} : vector<8x256xf32>, vector<256x512xf32>, vector<8x512xf32> -> vector<8x512xf32>
    %cst_26 = arith.constant 0.00999999977 : f32
    %37 = vector.broadcast %cst_26 : f32 to vector<8x512xf32>
    %38 = arith.mulf %37, %36 : vector<8x512xf32>
    %39 = arith.maximumf %36, %38 : vector<8x512xf32>
    %c0_27 = arith.constant 0 : index
    %c0_28 = arith.constant 0 : index
    %40 = vector.load %arg6[%c0_27, %c0_28] : memref<512x1024xf32, #tpu.memory_space<vmem>>, vector<512x1024xf32>
    %cst_29 = arith.constant dense<0.000000e+00> : vector<8x512xf32>
    %41 = tpu.matmul %0, %39, %cst_29 {dimension_numbers = #tpu.dot_dimension_numbers<[1], [0], [0], [1], [0, 0, 1, 1], [], []>} : vector<8x8xf32>, vector<8x512xf32>, vector<8x512xf32> -> vector<8x512xf32>
    %cst_30 = arith.constant dense<0.000000e+00> : vector<8x1024xf32>
    %42 = tpu.matmul %41, %40, %cst_30 {dimension_numbers = #tpu.dot_dimension_numbers<[1], [0], [0], [1], [0, 0, 1, 1], [], []>} : vector<8x512xf32>, vector<512x1024xf32>, vector<8x1024xf32> -> vector<8x1024xf32>
    %cst_31 = arith.constant 0.00999999977 : f32
    %43 = vector.broadcast %cst_31 : f32 to vector<8x1024xf32>
    %44 = arith.mulf %43, %42 : vector<8x1024xf32>
    %45 = arith.maximumf %42, %44 : vector<8x1024xf32>
    %c0_32 = arith.constant 0 : index
    %c0_33 = arith.constant 0 : index
    %46 = vector.load %arg7[%c0_32, %c0_33] : memref<1024x64xf32, #tpu.memory_space<vmem>>, vector<1024x64xf32>
    %cst_34 = arith.constant dense<0.000000e+00> : vector<8x64xf32>
    %47 = tpu.matmul %45, %46, %cst_34 {dimension_numbers = #tpu.dot_dimension_numbers<[1], [0], [0], [1], [0, 0, 1, 1], [], []>} : vector<8x1024xf32>, vector<1024x64xf32>, vector<8x64xf32> -> vector<8x64xf32>
    %cst_35 = arith.constant dense<0.000000e+00> : vector<8x64xf32>
    %48 = tpu.matmul %0, %47, %cst_35 {dimension_numbers = #tpu.dot_dimension_numbers<[1], [0], [0], [1], [0, 0, 1, 1], [], []>} : vector<8x8xf32>, vector<8x64xf32>, vector<8x64xf32> -> vector<8x64xf32>
    %cst_36 = arith.constant 0.000000e+00 : f32
    %49 = vector.broadcast %cst_36 : f32 to vector<8x64xf32>
    %50 = arith.maximumf %48, %49 : vector<8x64xf32>
    %c0_37 = arith.constant 0 : index
    %c0_38 = arith.constant 0 : index
    %51 = vector.load %arg8[%c0_37, %c0_38] : memref<8x64xf32, #tpu.memory_space<vmem>>, vector<8x64xf32>
    tpu.vector_store %arg8[%c0_37, %c0_38], %50 {strides = array<i32>} : memref<8x64xf32, #tpu.memory_space<vmem>>, vector<8x64xf32>,
    return
  }
}

</mosaic_0001>

<bundles_post_ra>
// kernel: netgcn2_forward.1
= control target key start
LH: loop header
LB: loop body
LE: loop exit
PB: predicated region body
PF: predicated region fallthrough
CT: control target
= control target key end

     0   :  { %15 = vsyncpa [#allocation3], 0  ;;  %s7272_s0 = inlined_call_operand.hbm [shape: f32[8,8], index: 0, kind: input, shape index: {}]   ;;  %s7273_s1 = inlined_call_operand.hbm [shape: f32[8,64], index: 1, kind: input, shape index: {}]   ;;  %s7274_s2 = inlined_call_operand.hbm [shape: f32[64,1024], index: 2, kind: input, shape index: {}]   ;;  %s7275_s3 = inlined_call_operand.hbm [shape: f32[1024,512], index: 3, kind: input, shape index: {}]   ;;  %s7276_s4 = inlined_call_operand.hbm [shape: f32[512,256], index: 4, kind: input, shape index: {}]   ;;  %s7277_s5 = inlined_call_operand.hbm [shape: f32[256,512], index: 5, kind: input, shape index: {}]   ;;  %s7278_s6 = inlined_call_operand.hbm [shape: f32[512,1024], index: 6, kind: input, shape index: {}]   ;;  %s7279_s7 = inlined_call_operand.vmem [shape: f32[1024,64], index: 7, kind: input, shape index: {}]   ;;  %s7280_s8 = inlined_call_operand.hbm [shape: f32[8,64], index: 8, kind: output, shape index: {0}]   ;;  %s7281_s9 = inlined_call_operand.hbm [shape: f32[8,8], index: 9, kind: output, shape index: {1}]  }
   0x1   :  { %16 = vsyncpa [#allocation6], 0 }
   0x2   :  { %17 = vsyncpa [#allocation9], 0 }
   0x3   :  { %18 = vsyncpa [#allocation12], 0 }
   0x4   :  { %19 = vsyncpa [#allocation4], 0 }
   0x5   :  { %20 = vsyncpa [#allocation16], 0  ;;  %s6500_s30 = smov [#allocation5]   ;;  %s6501_s11 = smov [#allocation8]  }
   0x6   :  { %s37_s10 = sshll.u32 %s6500_s30, 4  ;;  %s58_s12 = sshll.u32 %s6501_s11, 4  ;;  %s38_s10 = int_to_ptr.vmem [resolvable:$true] %s37_s10  ;;  %s6568_s12 = int_to_ptr.vmem [resolvable:$true] %s58_s12 }
   0x7   :  { %s6290_s15 = scalar_lea.hbm %s7273_s1, 128 }
   0x8   :  { %p6291_p0 = scmp.ne.s32.totalorder %s7273_s1, %s6290_s15  ;;  %p6294_p1 = scmp.lt.u32.totalorder %s6290_s15, %s7273_s1 }
   0xa   :  { %p6296_p2 = pnand %p6294_p1, %p6291_p0 }
   0xc   :  { %6299 = shalt.err (!%p6296_p2)
}
   0xd   :  { %s6300_s20 = scalar_lea.vmem %s38_s10, 128  ;;  %p6305_p4 = scmp.lt.s32.totalorder %s38_s10, %s38_s10 }
   0xe   :  { %p6301_p3 = scmp.ne.s32.totalorder %s38_s10, %s6300_s20  ;;  %p6306_p5 = scmp.lt.s32.totalorder %s6300_s20, %s6300_s20 }
  0x10   :  { %p6307_p6 = por %p6306_p5, %p6305_p4 }
  0x12   :  { %p6308_p7 = pnand %p6307_p6, %p6301_p3 }
  0x14   :  { %6311 = shalt.err (!%p6308_p7)
}
  0x15   :  { %40 = dma.hbm_to_vmem [thread:$0]  %s7273_s1, 128, %s38_s10, [#allocation6]  }
  0x16   :  { %s6312_s25 = scalar_lea.hbm %s7275_s3, 65536 }
  0x17   :  { %p6313_p8 = scmp.ne.s32.totalorder %s7275_s3, %s6312_s25  ;;  %p6316_p9 = scmp.lt.u32.totalorder %s6312_s25, %s7275_s3 }
  0x19   :  { %p6318_p10 = pnand %p6316_p9, %p6313_p8 }
  0x1b   :  { %6321 = shalt.err (!%p6318_p10)
}
  0x1c   :  { %s6322_s30 = scalar_lea.vmem %s6568_s12, 65536  ;;  %p6327_p12 = scmp.lt.s32.totalorder %s6568_s12, %s6568_s12 }
  0x1d   :  { %p6323_p11 = scmp.ne.s32.totalorder %s6568_s12, %s6322_s30  ;;  %p6328_p13 = scmp.lt.s32.totalorder %s6322_s30, %s6322_s30 }
  0x1f   :  { %p6329_p0 = por %p6328_p13, %p6327_p12 }
  0x21   :  { %p6330_p1 = pnand %p6329_p0, %p6323_p11 }
  0x23   :  { %6333 = shalt.err (!%p6330_p1)
}
  0x24   :  { %s6502_s1 = smov 512   ;;  %s6503_s10 = smov 32  }
  0x25   :  { %64 = dma.hbm_to_vmem [thread:$0]  %s7275_s3, 65536, %s6568_s12, [#allocation9], %s6502_s1, %s6502_s1, %s6503_s10  }
  0x26   :  { %s6504_s14 = smov [#allocation11]   ;;  %s6505_s16 = smov [#allocation2]  }
  0x27   :  { %s82_s15 = sshll.u32 %s6504_s14, 4  ;;  %s27_s17 = sshll.u32 %s6505_s16, 4  ;;  %s83_s15 = int_to_ptr.vmem [resolvable:$true] %s82_s15  ;;  %s28_s17 = int_to_ptr.vmem [resolvable:$true] %s27_s17 }
  0x28   :  { %s6334_s20 = scalar_lea.hbm %s7277_s5, 16384 }
  0x29   :  { %p6335_p2 = scmp.ne.s32.totalorder %s7277_s5, %s6334_s20  ;;  %p6338_p3 = scmp.lt.u32.totalorder %s6334_s20, %s7277_s5 }
  0x2b   :  { %p6340_p4 = pnand %p6338_p3, %p6335_p2 }
  0x2d   :  { %6343 = shalt.err (!%p6340_p4)
}
  0x2e   :  { %s6344_s3 = scalar_lea.vmem %s83_s15, 16384  ;;  %p6349_p6 = scmp.lt.s32.totalorder %s83_s15, %s83_s15 }
  0x2f   :  { %p6345_p5 = scmp.ne.s32.totalorder %s83_s15, %s6344_s3  ;;  %p6350_p7 = scmp.lt.s32.totalorder %s6344_s3, %s6344_s3 }
  0x31   :  { %p6351_p8 = por %p6350_p7, %p6349_p6 }
  0x33   :  { %p6352_p9 = pnand %p6351_p8, %p6345_p5 }
  0x35   :  { %6355 = shalt.err (!%p6352_p9)
}
  0x36   :  { %88 = dma.hbm_to_vmem [thread:$0]  %s7277_s5, 16384, %s83_s15, [#allocation12], %s6502_s1, %s6502_s1, %s6503_s10  }
  0x37   :  { %s6356_s28 = scalar_lea.hbm %s7272_s0, 128 }
  0x38   :  { %p6357_p10 = scmp.ne.s32.totalorder %s7272_s0, %s6356_s28  ;;  %p6360_p11 = scmp.lt.u32.totalorder %s6356_s28, %s7272_s0 }
  0x3a   :  { %p6362_p12 = pnand %p6360_p11, %p6357_p10 }
  0x3c   :  { %6365 = shalt.err (!%p6362_p12)
}
  0x3d   :  { %s6366_s14 = scalar_lea.vmem %s28_s17, 128  ;;  %p6371_p0 = scmp.lt.s32.totalorder %s28_s17, %s28_s17 }
  0x3e   :  { %p6367_p13 = scmp.ne.s32.totalorder %s28_s17, %s6366_s14  ;;  %p6372_p1 = scmp.lt.s32.totalorder %s6366_s14, %s6366_s14 }
  0x40   :  { %p6373_p2 = por %p6372_p1, %p6371_p0 }
  0x42   :  { %p6374_p3 = pnand %p6373_p2, %p6367_p13 }
  0x44   :  { %6377 = shalt.err (!%p6374_p3)
}
  0x45   :  { %30 = dma.hbm_to_vmem [thread:$0]  %s7272_s0, 128, %s28_s17, [#allocation3]  }
  0x46   :  { %s6506_s10 = smov [#allocation7]   ;;  %s6378_s19 = scalar_lea.hbm %s7274_s2, 8192 }
  0x47   :  { %s46_s15 = sshll.u32 %s6506_s10, 4  ;;  %p6379_p4 = scmp.ne.s32.totalorder %s7274_s2, %s6378_s19  ;;  %s47_s15 = int_to_ptr.vmem [resolvable:$true] %s46_s15 }
  0x48   :  { %p6382_p5 = scmp.lt.u32.totalorder %s6378_s19, %s7274_s2 }
  0x4a   :  { %p6384_p6 = pnand %p6382_p5, %p6379_p4 }
  0x4c   :  { %6387 = shalt.err (!%p6384_p6)
}
  0x4d   :  { %s6388_s24 = scalar_lea.vmem %s47_s15, 8192  ;;  %p6393_p8 = scmp.lt.s32.totalorder %s47_s15, %s47_s15 }
  0x4e   :  { %p6389_p7 = scmp.ne.s32.totalorder %s47_s15, %s6388_s24  ;;  %p6394_p9 = scmp.lt.s32.totalorder %s6388_s24, %s6388_s24 }
  0x50   :  { %p6395_p10 = por %p6394_p9, %p6393_p8 }
  0x52   :  { %p6396_p11 = pnand %p6395_p10, %p6389_p7 }
  0x54   :  { %6399 = shalt.err (!%p6396_p11)
}
  0x55   :  { %s6507_s0 = smov 1024   ;;  %s6508_s17 = smov 64  }
  0x56   :  { %52 = dma.hbm_to_vmem [thread:$0]  %s7274_s2, 8192, %s47_s15, [#allocation6], %s6507_s0, %s6507_s0, %s6508_s17  }
  0x57   :  { %s6509_s25 = smov [#allocation10]   ;;  %s6400_s29 = scalar_lea.hbm %s7276_s4, 16384 }
  0x58   :  { %s70_s26 = sshll.u32 %s6509_s25, 4  ;;  %p6401_p12 = scmp.ne.s32.totalorder %s7276_s4, %s6400_s29  ;;  %s71_s26 = int_to_ptr.vmem [resolvable:$true] %s70_s26 }
  0x59   :  { %p6404_p13 = scmp.lt.u32.totalorder %s6400_s29, %s7276_s4 }
  0x5b   :  { %p6406_p0 = pnand %p6404_p13, %p6401_p12 }
  0x5d   :  { %6409 = shalt.err (!%p6406_p0)
}
  0x5e   :  { %s6410_s5 = scalar_lea.vmem %s71_s26, 16384  ;;  %p6415_p2 = scmp.lt.s32.totalorder %s71_s26, %s71_s26 }
  0x5f   :  { %p6411_p1 = scmp.ne.s32.totalorder %s71_s26, %s6410_s5  ;;  %p6416_p3 = scmp.lt.s32.totalorder %s6410_s5, %s6410_s5 }
  0x61   :  { %p6417_p4 = por %p6416_p3, %p6415_p2 }
  0x63   :  { %p6418_p5 = pnand %p6417_p4, %p6411_p1 }
  0x65   :  { %6421 = shalt.err (!%p6418_p5)
}
  0x66   :  { %s6510_s2 = smov 256   ;;  %s6511_s1 = smov 16  }
  0x67   :  { %76 = dma.hbm_to_vmem [thread:$0]  %s7276_s4, 16384, %s71_s26, [#allocation9], %s6510_s2, %s6510_s2, %s6511_s1  }
  0x68   :  { %s6512_s16 = smov [#allocation13]   ;;  %s6422_s21 = scalar_lea.hbm %s7278_s6, 65536 }
  0x69   :  { %s94_s18 = sshll.u32 %s6512_s16, 4  ;;  %p6423_p6 = scmp.ne.s32.totalorder %s7278_s6, %s6422_s21  ;;  %s95_s18 = int_to_ptr.vmem [resolvable:$true] %s94_s18 }
  0x6a   :  { %p6426_p7 = scmp.lt.u32.totalorder %s6422_s21, %s7278_s6 }
  0x6c   :  { %p6428_p8 = pnand %p6426_p7, %p6423_p6 }
  0x6e   :  { %6431 = shalt.err (!%p6428_p8)
}
  0x6f   :  { %s6432_s12 = scalar_lea.vmem %s95_s18, 65536  ;;  %p6437_p10 = scmp.lt.s32.totalorder %s95_s18, %s95_s18 }
  0x70   :  { %p6433_p9 = scmp.ne.s32.totalorder %s95_s18, %s6432_s12  ;;  %p6438_p11 = scmp.lt.s32.totalorder %s6432_s12, %s6432_s12 }
  0x72   :  { %p6439_p12 = por %p6438_p11, %p6437_p10 }
  0x74   :  { %p6440_p13 = pnand %p6439_p12, %p6433_p9 }
  0x76   :  { %6443 = shalt.err (!%p6440_p13)
}
  0x77   :  { %100 = dma.hbm_to_vmem [thread:$0]  %s7278_s6, 65536, %s95_s18, [#allocation12], %s6507_s0, %s6507_s0, %s6508_s17  }
  0x78   :  { %6488 = dma.done.wait [#allocation3], 128  }
  0x79   :  { %6489 = vsyncadd [#allocation3], 4294967168 }
  0x7a   :  { %6490 = dma.done.wait [#allocation6], 8320  }
  0x7b   :  { %6491 = vsyncadd [#allocation6], 4294958976 }
  0x7c   :  { %6492 = dma.done.wait [#allocation9], 81920  }
  0x7d   :  { %6493 = vsyncadd [#allocation9], 4294885376 }
  0x7e   :  { %6494 = dma.done.wait [#allocation12], 81920  }
  0x7f   :  { %6495 = vsyncadd [#allocation12], 4294885376  ;;  %v6513_v0 = vmov 0.0   ;;  %vm6514_vm0 = vmmov 0   ;;  %vm190_vm1 = vcmask 64512   ;;  %v125_v1 = vld [vmem:[#allocation5] sm:$0xff] }
  0x80   :  { %4733 = vmatprep.subr.mxu0 %v6513_v0  ;;  %4735 = vmatprep.mubr.msk.f32.mxu0 %vm6514_vm0, %v6513_v0  ;;  %v124_v2 = vld [vmem:[#allocation2] sm:$0xff]  ;;  %v127_v3 = vld [vmem:[#allocation7 + $0x8] sm:$0xff]  ;;  %v129_v5 = vld [vmem:[#allocation7 + $0x18] sm:$0xff]  ;;  %vm264_vm2 = vcmask 523264  }
  0x81   :  { %332 = vmatprep.mubr.f32.mxu1 %v6513_v0  ;;  %4734 = vmatpush3.msra.mxu0 %v125_v1  ;;  %v135_v4 = vld [vmem:[#allocation7 + $0x48] sm:$0xff]  ;;  %v137_v6 = vld [vmem:[#allocation7 + $0x58] sm:$0xff]  ;;  %v126_v9 = vld [vmem:[#allocation7] sm:$0xff] }
  0x82   :  { %4736 = vmatmul.mubr.msk.f32.vlgmr.msra.gmra.mrb[0].mxu0 %vm190_vm1, %v124_v2  ;;  %v4743_v7 = vpack.c.bf16 %v135_v4, %v127_v3  ;;  %v4759_v8 = vpack.c.bf16 %v137_v6, %v129_v5  ;;  %v134_v10 = vld [vmem:[#allocation7 + $0x40] sm:$0xff]  ;;  %v128_v11 = vld [vmem:[#allocation7 + $0x10] sm:$0xff]  ;;  %v143_v14 = vld [vmem:[#allocation7 + $0x88] sm:$0xff] }
  0x83   :  { %v4745_v12 = vpack.c.bf16 %v134_v10, %v126_v9  ;;  %v136_v13 = vld [vmem:[#allocation7 + $0x50] sm:$0xff]  ;;  %v151_v15 = vld [vmem:[#allocation7 + $0xc8] sm:$0xff]  ;;  %403 = vmatprep.mubr.f32.mxu0 %v6513_v0  ;;  %v145_v18 = vld [vmem:[#allocation7 + $0x98] sm:$0xff] }
  0x84   :  { %4744 = vmatprep.subr.bf16.mxu1 %v4743_v7  ;;  %4760 = vmatprep.subr.bf16.mxu0 %v4759_v8  ;;  %v4761_v16 = vpack.c.bf16 %v136_v13, %v128_v11  ;;  %v4747_v17 = vpack.c.bf16 %v151_v15, %v143_v14  ;;  %v153_v19 = vld [vmem:[#allocation7 + $0xd8] sm:$0xff]  ;;  %v142_v20 = vld [vmem:[#allocation7 + $0x80] sm:$0xff]  ;;  %v144_v23 = vld [vmem:[#allocation7 + $0x90] sm:$0xff] }
  0x85   :  { %4746 = vmatpush1.bf16.msra.mxu1 %v4745_v12  ;;  %v4763_v21 = vpack.c.bf16 %v153_v19, %v145_v18  ;;  %v150_v22 = vld [vmem:[#allocation7 + $0xc0] sm:$0xff]  ;;  %v152_v24 = vld [vmem:[#allocation7 + $0xd0] sm:$0xff]  ;;  %v159_v27 = vld [vmem:[#allocation7 + $0x108] sm:$0xff] }
  0x86   :  { %4762 = vmatpush1.bf16.msra.mxu0 %v4761_v16  ;;  %4748 = vmatprep.subr.bf16.mxu1 %v4747_v17  ;;  %v4749_v25 = vpack.c.bf16 %v150_v22, %v142_v20  ;;  %v4765_v26 = vpack.c.bf16 %v152_v24, %v144_v23  ;;  %v167_v28 = vld [vmem:[#allocation7 + $0x148] sm:$0xff]  ;;  %v161_v29 = vld [vmem:[#allocation7 + $0x118] sm:$0xff]  ;;  %v158_v32 = vld [vmem:[#allocation7 + $0x100] sm:$0xff] }
  0x87   :  { %4764 = vmatprep.subr.bf16.mxu0 %v4763_v21  ;;  %v4751_v30 = vpack.c.bf16 %v167_v28, %v159_v27  ;;  %v169_v31 = vld [vmem:[#allocation7 + $0x158] sm:$0xff]  ;;  %v166_v33 = vld [vmem:[#allocation7 + $0x140] sm:$0xff]  ;;  %v160_v35 = vld [vmem:[#allocation7 + $0x110] sm:$0xff] }
  0x88   :  { %v4767_v34 = vpack.c.bf16 %v169_v31, %v161_v29  ;;  %v168_v36 = vld [vmem:[#allocation7 + $0x150] sm:$0xff]  ;;  %v175_v37 = vld [vmem:[#allocation7 + $0x188] sm:$0xff]  ;;  %v4753_v38 = vpack.c.bf16 %v166_v33, %v158_v32  ;;  %v177_v40 = vld [vmem:[#allocation7 + $0x198] sm:$0xff] }
  0x89   :  { %4750 = vmatpush1.bf16.msra.mxu1 %v4749_v25  ;;  %v183_v39 = vld [vmem:[#allocation7 + $0x1c8] sm:$0xff]  ;;  %v185_v41 = vld [vmem:[#allocation7 + $0x1d8] sm:$0xff]  ;;  %v4769_v42 = vpack.c.bf16 %v168_v36, %v160_v35  ;;  %v174_v44 = vld [vmem:[#allocation7 + $0x180] sm:$0xff] }
  0x8a   :  { %4766 = vmatpush1.bf16.msra.mxu0 %v4765_v26  ;;  %4752 = vmatprep.subr.bf16.mxu1 %v4751_v30  ;;  %v4755_v43 = vpack.c.bf16 %v183_v39, %v175_v37  ;;  %v182_v45 = vld [vmem:[#allocation7 + $0x1c0] sm:$0xff]  ;;  %v4771_v46 = vpack.c.bf16 %v185_v41, %v177_v40  ;;  %v176_v47 = vld [vmem:[#allocation7 + $0x190] sm:$0xff]  ;;  %v131_v51 = vld [vmem:[#allocation7 + $0x28] sm:$0xff] }
  0x8b   :  { %4768 = vmatprep.subr.bf16.mxu0 %v4767_v34  ;;  %v184_v48 = vld [vmem:[#allocation7 + $0x1d0] sm:$0xff]  ;;  %v4757_v49 = vpack.c.bf16 %v182_v45, %v174_v44  ;;  %v139_v52 = vld [vmem:[#allocation7 + $0x68] sm:$0xff]  ;;  %v133_v53 = vld [vmem:[#allocation7 + $0x38] sm:$0xff] }
  0x8c   :  { %v4773_v50 = vpack.c.bf16 %v184_v48, %v176_v47  ;;  %v4775_v54 = vpack.c.bf16 %v139_v52, %v131_v51  ;;  %v141_v55 = vld [vmem:[#allocation7 + $0x78] sm:$0xff]  ;;  %v130_v57 = vld [vmem:[#allocation7 + $0x20] sm:$0xff]  ;;  %v132_v59 = vld [vmem:[#allocation7 + $0x30] sm:$0xff] }
  0x8d   :  { %4754 = vmatpush1.bf16.msra.mxu1 %v4753_v38  ;;  %v4791_v56 = vpack.c.bf16 %v141_v55, %v133_v53  ;;  %v138_v58 = vld [vmem:[#allocation7 + $0x60] sm:$0xff]  ;;  %v140_v60 = vld [vmem:[#allocation7 + $0x70] sm:$0xff]  ;;  %v147_v61 = vld [vmem:[#allocation7 + $0xa8] sm:$0xff] }
  0x8e   :  { %4770 = vmatpush1.bf16.msra.mxu0 %v4769_v42  ;;  %4756 = vmatprep.subr.bf16.mxu1 %v4755_v43  ;;  %v155_v62 = vld [vmem:[#allocation7 + $0xe8] sm:$0xff]  ;;  %v149_v63 = vld [vmem:[#allocation7 + $0xb8] sm:$0xff]  ;;  %v4777_v2 = vpack.c.bf16 %v138_v58, %v130_v57  ;;  %v4793_v3 = vpack.c.bf16 %v140_v60, %v132_v59  ;;  %v146_v4 = vld [vmem:[#allocation7 + $0xa0] sm:$0xff] }
  0x8f   :  { %4772 = vmatprep.subr.bf16.mxu0 %v4771_v46  ;;  %v157_v1 = vld [vmem:[#allocation7 + $0xf8] sm:$0xff]  ;;  %v154_v5 = vld [vmem:[#allocation7 + $0xe0] sm:$0xff]  ;;  %v4779_v6 = vpack.c.bf16 %v155_v62, %v147_v61  ;;  %v148_v8 = vld [vmem:[#allocation7 + $0xb0] sm:$0xff] }
  0x90   :  { %v4795_v7 = vpack.c.bf16 %v157_v1, %v149_v63  ;;  %v156_v9 = vld [vmem:[#allocation7 + $0xf0] sm:$0xff]  ;;  %v163_v10 = vld [vmem:[#allocation7 + $0x128] sm:$0xff]  ;;  %v165_v13 = vld [vmem:[#allocation7 + $0x138] sm:$0xff]  ;;  %v4781_v16 = vpack.c.bf16 %v154_v5, %v146_v4 }
  0x91   :  { %4758 = vmatpush1.bf16.msra.mxu1 %v4757_v49  ;;  %v171_v12 = vld [vmem:[#allocation7 + $0x168] sm:$0xff]  ;;  %v173_v14 = vld [vmem:[#allocation7 + $0x178] sm:$0xff]  ;;  %v4797_v17 = vpack.c.bf16 %v156_v9, %v148_v8  ;;  %v162_v18 = vld [vmem:[#allocation7 + $0x120] sm:$0xff] }
  0x92   :  { %4774 = vmatpush1.bf16.msra.mxu0 %v4773_v50  ;;  %4776 = vmatprep.subr.bf16.mxu1 %v4775_v54  ;;  %v170_v19 = vld [vmem:[#allocation7 + $0x160] sm:$0xff]  ;;  %v4783_v20 = vpack.c.bf16 %v171_v12, %v163_v10  ;;  %v4799_v21 = vpack.c.bf16 %v173_v14, %v165_v13  ;;  %v164_v22 = vld [vmem:[#allocation7 + $0x130] sm:$0xff]  ;;  %v179_v24 = vld [vmem:[#allocation7 + $0x1a8] sm:$0xff] }
  0x93   :  { %4792 = vmatprep.subr.bf16.mxu0 %v4791_v56  ;;  %v172_v23 = vld [vmem:[#allocation7 + $0x170] sm:$0xff]  ;;  %v187_v25 = vld [vmem:[#allocation7 + $0x1e8] sm:$0xff]  ;;  %v181_v26 = vld [vmem:[#allocation7 + $0x1b8] sm:$0xff]  ;;  %v4785_v28 = vpack.c.bf16 %v170_v19, %v162_v18 }
  0x94   :  { %v189_v27 = vld [vmem:[#allocation7 + $0x1f8] sm:$0xff]  ;;  %v4801_v29 = vpack.c.bf16 %v172_v23, %v164_v22  ;;  %v178_v30 = vld [vmem:[#allocation7 + $0x1a0] sm:$0xff]  ;;  %v4787_v32 = vpack.c.bf16 %v187_v25, %v179_v24  ;;  %v180_v34 = vld [vmem:[#allocation7 + $0x1b0] sm:$0xff] }
  0x95   :  { %v186_v31 = vld [vmem:[#allocation7 + $0x1e0] sm:$0xff]  ;;  %v4803_v33 = vpack.c.bf16 %v189_v27, %v181_v26  ;;  %v188_v35 = vld [vmem:[#allocation7 + $0x1f0] sm:$0xff]  ;;  %v569_v36 = vld [vmem:[#allocation8 + $0x8] sm:$0xff] }
  0x96   :  { %v573_v37 = vld [vmem:[#allocation8 + $0x28] sm:$0xff]  ;;  %v571_v38 = vld [vmem:[#allocation8 + $0x18] sm:$0xff]  ;;  %v4789_v40 = vpack.c.bf16 %v186_v31, %v178_v30  ;;  %v4805_v41 = vpack.c.bf16 %v188_v35, %v180_v34  ;;  %v568_v42 = vld [vmem:[#allocation8] sm:$0xff] }
  0x97   :  { %v575_v39 = vld [vmem:[#allocation8 + $0x38] sm:$0xff]  ;;  %v572_v43 = vld [vmem:[#allocation8 + $0x20] sm:$0xff]  ;;  %v4807_v44 = vpack.c.bf16 %v573_v37, %v569_v36  ;;  %v570_v46 = vld [vmem:[#allocation8 + $0x10] sm:$0xff] }
  0x98   :  { %v5063_v45 = vpack.c.bf16 %v575_v39, %v571_v38  ;;  %v574_v47 = vld [vmem:[#allocation8 + $0x30] sm:$0xff]  ;;  %v577_v48 = vld [vmem:[#allocation8 + $0x48] sm:$0xff]  ;;  %v579_v50 = vld [vmem:[#allocation8 + $0x58] sm:$0xff]  ;;  %v4809_v52 = vpack.c.bf16 %v572_v43, %v568_v42 }
  0x99   :  { %v581_v49 = vld [vmem:[#allocation8 + $0x68] sm:$0xff]  ;;  %v583_v51 = vld [vmem:[#allocation8 + $0x78] sm:$0xff]  ;;  %v5065_v53 = vpack.c.bf16 %v574_v47, %v570_v46  ;;  %v576_v54 = vld [vmem:[#allocation8 + $0x40] sm:$0xff] }
  0x9a   :  { %v580_v55 = vld [vmem:[#allocation8 + $0x60] sm:$0xff]  ;;  %v4811_v56 = vpack.c.bf16 %v581_v49, %v577_v48  ;;  %v5067_v57 = vpack.c.bf16 %v583_v51, %v579_v50  ;;  %v578_v58 = vld [vmem:[#allocation8 + $0x50] sm:$0xff]  ;;  %v585_v60 = vld [vmem:[#allocation8 + $0x88] sm:$0xff] }
  0x9b   :  { %v582_v59 = vld [vmem:[#allocation8 + $0x70] sm:$0xff]  ;;  %v589_v61 = vld [vmem:[#allocation8 + $0xa8] sm:$0xff]  ;;  %v587_v62 = vld [vmem:[#allocation8 + $0x98] sm:$0xff]  ;;  %v4813_v1 = vpack.c.bf16 %v580_v55, %v576_v54 }
  0x9c   :  { %v591_v63 = vld [vmem:[#allocation8 + $0xb8] sm:$0xff]  ;;  %v588_v4 = vld [vmem:[#allocation8 + $0xa0] sm:$0xff]  ;;  %v4815_v5 = vpack.c.bf16 %v589_v61, %v585_v60  ;;  %v590_v8 = vld [vmem:[#allocation8 + $0xb0] sm:$0xff] }
  0x9d   :  { %v593_v9 = vld [vmem:[#allocation8 + $0xc8] sm:$0xff]  ;;  %v595_v12 = vld [vmem:[#allocation8 + $0xd8] sm:$0xff]  ;;  %v594_v19 = vld [vmem:[#allocation8 + $0xd0] sm:$0xff] }
  0x9e   :  { %v597_v10 = vld [vmem:[#allocation8 + $0xe8] sm:$0xff]  ;;  %v599_v13 = vld [vmem:[#allocation8 + $0xf8] sm:$0xff]  ;;  %v600_v27 = vld [vmem:[#allocation8 + $0x100] sm:$0xff] }
  0x9f   :  { %v5075_v18 = vpack.c.bf16 %v599_v13, %v595_v12  ;;  %v605_v22 = vld [vmem:[#allocation8 + $0x128] sm:$0xff]  ;;  %v603_v23 = vld [vmem:[#allocation8 + $0x118] sm:$0xff]  ;;  %v602_v31 = vld [vmem:[#allocation8 + $0x110] sm:$0xff] }
  0xa0   :  { %v607_v24 = vld [vmem:[#allocation8 + $0x138] sm:$0xff]  ;;  %v613_v34 = vld [vmem:[#allocation8 + $0x168] sm:$0xff]  ;;  %v608_v39 = vld [vmem:[#allocation8 + $0x140] sm:$0xff] }
  0xa1   :  { %v5079_v30 = vpack.c.bf16 %v607_v24, %v603_v23  ;;  %v611_v35 = vld [vmem:[#allocation8 + $0x158] sm:$0xff]  ;;  %v610_v43 = vld [vmem:[#allocation8 + $0x150] sm:$0xff]  ;;  %v621_v46 = vld [vmem:[#allocation8 + $0x1a8] sm:$0xff] }
  0xa2   :  { %v615_v36 = vld [vmem:[#allocation8 + $0x178] sm:$0xff]  ;;  %v616_v51 = vld [vmem:[#allocation8 + $0x180] sm:$0xff]  ;;  %v618_v55 = vld [vmem:[#allocation8 + $0x190] sm:$0xff] }
  0xa3   :  { %v5083_v42 = vpack.c.bf16 %v615_v36, %v611_v35  ;;  %v619_v47 = vld [vmem:[#allocation8 + $0x198] sm:$0xff]  ;;  %v632_v13 = vld [vmem:[#allocation8 + $0x200] sm:$0xff] }
  0xa4   :  { %v623_v48 = vld [vmem:[#allocation8 + $0x1b8] sm:$0xff]  ;;  %v640_v24 = vld [vmem:[#allocation8 + $0x240] sm:$0xff] }
  0xa5   :  { %v5087_v54 = vpack.c.bf16 %v623_v48, %v619_v47  ;;  %v631_v60 = vld [vmem:[#allocation8 + $0x1f8] sm:$0xff]  ;;  %v648_v36 = vld [vmem:[#allocation8 + $0x280] sm:$0xff] }
  0xa6   :  { %v656_v48 = vld [vmem:[#allocation8 + $0x2c0] sm:$0xff] }
 0x155   :  { %v6671_v11 = vpop.f32.mrb[0].mxu0 }
 0x156   :  { %v4737_v15 = vpop.f32.mrb[1].mxu0  ;;  %4578 = vmatmul.mubr.msk.f32.vlgmr.msra.gmra.mrb[0].mxu1 %vm264_vm2, %v6671_v11  ;;  %4579 = vmatmul.mubr.msk.f32.vlgmr.msra.gmra.mrb[2].mxu0 %vm264_vm2, %v6671_v11 }
 0x157   :  { %4778 = vmatpush1.bf16.msra.mxu1 %v4777_v2  ;;  %4794 = vmatpush1.bf16.msra.mxu0 %v4793_v3  ;;  %v5069_v2 = vpack.c.bf16 %v582_v59, %v578_v58  ;;  %v584_v3 = vld [vmem:[#allocation8 + $0x80] sm:$0xff]  ;;  %v629_v58 = vld [vmem:[#allocation8 + $0x1e8] sm:$0xff]  ;;  %v627_v59 = vld [vmem:[#allocation8 + $0x1d8] sm:$0xff] }
 0x158   :  { %4780 = vmatprep.subr.bf16.mxu1 %v4779_v6  ;;  %4796 = vmatprep.subr.bf16.mxu0 %v4795_v7  ;;  %v5071_v6 = vpack.c.bf16 %v591_v63, %v587_v62  ;;  %v586_v7 = vld [vmem:[#allocation8 + $0x90] sm:$0xff]  ;;  %v4817_v14 = vpack.c.bf16 %v588_v4, %v584_v3  ;;  %v592_v15 = vld [vmem:[#allocation8 + $0xc0] sm:$0xff]  ;;  %v5091_v3 = vpack.c.bf16 %v631_v60, %v627_v59 }
 0x159   :  { %474 = vmatprep.mubr.f32.mxu1 %v6513_v0  ;;  %545 = vmatprep.mubr.f32.mxu0 %v6513_v0  ;;  %v624_v63 = vld [vmem:[#allocation8 + $0x1c0] sm:$0xff]  ;;  %v626_v4 = vld [vmem:[#allocation8 + $0x1d0] sm:$0xff] }
 0x15a   :  { %v664_v60 = vld [vmem:[#allocation8 + $0x300] sm:$0xff] }
 0x15b   :  { %4782 = vmatpush1.bf16.msra.mxu1 %v4781_v16  ;;  %4798 = vmatpush1.bf16.msra.mxu0 %v4797_v17  ;;  %v596_v16 = vld [vmem:[#allocation8 + $0xe0] sm:$0xff]  ;;  %v4819_v17 = vpack.c.bf16 %v597_v10, %v593_v9  ;;  %v639_v9 = vld [vmem:[#allocation8 + $0x238] sm:$0xff] }
 0x15c   :  { %4784 = vmatprep.subr.bf16.mxu1 %v4783_v20  ;;  %4800 = vmatprep.subr.bf16.mxu0 %v4799_v21  ;;  %v598_v20 = vld [vmem:[#allocation8 + $0xf0] sm:$0xff]  ;;  %v601_v21 = vld [vmem:[#allocation8 + $0x108] sm:$0xff]  ;;  %v4821_v25 = vpack.c.bf16 %v596_v16, %v592_v15 }
 0x15d   :  { %v5077_v26 = vpack.c.bf16 %v598_v20, %v594_v19  ;;  %v634_v16 = vld [vmem:[#allocation8 + $0x210] sm:$0xff]  ;;  %v645_v19 = vld [vmem:[#allocation8 + $0x268] sm:$0xff]  ;;  %v643_v20 = vld [vmem:[#allocation8 + $0x258] sm:$0xff] }
 0x15f   :  { %4786 = vmatpush1.bf16.msra.mxu1 %v4785_v28  ;;  %4802 = vmatpush1.bf16.msra.mxu0 %v4801_v29  ;;  %v604_v28 = vld [vmem:[#allocation8 + $0x120] sm:$0xff]  ;;  %v4823_v29 = vpack.c.bf16 %v605_v22, %v601_v21  ;;  %v647_v21 = vld [vmem:[#allocation8 + $0x278] sm:$0xff] }
 0x160   :  { %4788 = vmatprep.subr.bf16.mxu1 %v4787_v32  ;;  %4804 = vmatprep.subr.bf16.mxu0 %v4803_v33  ;;  %v606_v32 = vld [vmem:[#allocation8 + $0x130] sm:$0xff]  ;;  %v609_v33 = vld [vmem:[#allocation8 + $0x148] sm:$0xff]  ;;  %v4825_v37 = vpack.c.bf16 %v604_v28, %v600_v27  ;;  %v5099_v27 = vpack.c.bf16 %v647_v21, %v643_v20  ;;  %v680_v21 = vld [vmem:[#allocation8 + $0x380] sm:$0xff] }
 0x161   :  { %v5081_v38 = vpack.c.bf16 %v606_v32, %v602_v31  ;;  %v642_v28 = vld [vmem:[#allocation8 + $0x250] sm:$0xff]  ;;  %v653_v31 = vld [vmem:[#allocation8 + $0x2a8] sm:$0xff]  ;;  %v651_v32 = vld [vmem:[#allocation8 + $0x298] sm:$0xff] }
 0x163   :  { %4790 = vmatpush1.bf16.msra.mxu1 %v4789_v40  ;;  %4806 = vmatpush1.bf16.msra.mxu0 %v4805_v41  ;;  %v612_v40 = vld [vmem:[#allocation8 + $0x160] sm:$0xff]  ;;  %v4827_v41 = vpack.c.bf16 %v613_v34, %v609_v33  ;;  %v655_v33 = vld [vmem:[#allocation8 + $0x2b8] sm:$0xff] }
 0x164   :  { %4808 = vmatprep.subr.bf16.mxu1 %v4807_v44  ;;  %5064 = vmatprep.subr.bf16.mxu0 %v5063_v45  ;;  %v614_v44 = vld [vmem:[#allocation8 + $0x170] sm:$0xff]  ;;  %v617_v45 = vld [vmem:[#allocation8 + $0x188] sm:$0xff]  ;;  %v4829_v49 = vpack.c.bf16 %v612_v40, %v608_v39  ;;  %v5103_v39 = vpack.c.bf16 %v655_v33, %v651_v32  ;;  %v695_v33 = vld [vmem:[#allocation8 + $0x3f8] sm:$0xff] }
 0x165   :  { %v5085_v50 = vpack.c.bf16 %v614_v44, %v610_v43  ;;  %v650_v40 = vld [vmem:[#allocation8 + $0x290] sm:$0xff]  ;;  %v661_v43 = vld [vmem:[#allocation8 + $0x2e8] sm:$0xff]  ;;  %v659_v44 = vld [vmem:[#allocation8 + $0x2d8] sm:$0xff] }
 0x166   :  { %4580 = vmatmul.mubr.msk.f32.vlgmr.msra.gmra.mrb[2].mxu1 %vm264_vm2, %v6671_v11  ;;  %4581 = vmatmul.mubr.msk.f32.vlgmr.msra.gmra.mrb[4].mxu0 %vm264_vm2, %v6671_v11  ;;  %v5073_v11 = vpack.c.bf16 %v590_v8, %v586_v7  ;;  %v637_v7 = vld [vmem:[#allocation8 + $0x228] sm:$0xff]  ;;  %v635_v8 = vld [vmem:[#allocation8 + $0x218] sm:$0xff] }
 0x167   :  { %4810 = vmatpush1.bf16.msra.mxu1 %v4809_v52  ;;  %5066 = vmatpush1.bf16.msra.mxu0 %v5065_v53  ;;  %v620_v52 = vld [vmem:[#allocation8 + $0x1a0] sm:$0xff]  ;;  %v4831_v53 = vpack.c.bf16 %v621_v46, %v617_v45  ;;  %v5095_v15 = vpack.c.bf16 %v639_v9, %v635_v8  ;;  %v663_v45 = vld [vmem:[#allocation8 + $0x2f8] sm:$0xff] }
 0x168   :  { %4812 = vmatprep.subr.bf16.mxu1 %v4811_v56  ;;  %5068 = vmatprep.subr.bf16.mxu0 %v5067_v57  ;;  %v622_v56 = vld [vmem:[#allocation8 + $0x1b0] sm:$0xff]  ;;  %v625_v57 = vld [vmem:[#allocation8 + $0x1c8] sm:$0xff]  ;;  %v4833_v61 = vpack.c.bf16 %v620_v52, %v616_v51  ;;  %v5107_v51 = vpack.c.bf16 %v663_v45, %v659_v44  ;;  %v672_v9 = vld [vmem:[#allocation8 + $0x340] sm:$0xff] }
 0x169   :  { %v5089_v62 = vpack.c.bf16 %v622_v56, %v618_v55  ;;  %v658_v52 = vld [vmem:[#allocation8 + $0x2d0] sm:$0xff]  ;;  %v669_v55 = vld [vmem:[#allocation8 + $0x328] sm:$0xff]  ;;  %v667_v56 = vld [vmem:[#allocation8 + $0x318] sm:$0xff] }
 0x16a   :  { %v703_v45 = vld [vmem:[#allocation8 + $0x438] sm:$0xff] }
 0x16b   :  { %4814 = vmatpush1.bf16.msra.mxu1 %v4813_v1  ;;  %5070 = vmatpush1.bf16.msra.mxu0 %v5069_v2  ;;  %v628_v1 = vld [vmem:[#allocation8 + $0x1e0] sm:$0xff]  ;;  %v4835_v2 = vpack.c.bf16 %v629_v58, %v625_v57  ;;  %v671_v57 = vld [vmem:[#allocation8 + $0x338] sm:$0xff] }
 0x16c   :  { %4816 = vmatprep.subr.bf16.mxu1 %v4815_v5  ;;  %5072 = vmatprep.subr.bf16.mxu0 %v5071_v6  ;;  %v630_v5 = vld [vmem:[#allocation8 + $0x1f0] sm:$0xff]  ;;  %v633_v6 = vld [vmem:[#allocation8 + $0x208] sm:$0xff]  ;;  %v4837_v10 = vpack.c.bf16 %v628_v1, %v624_v63  ;;  %v5111_v63 = vpack.c.bf16 %v671_v57, %v667_v56 }
 0x16d   :  { %v5093_v12 = vpack.c.bf16 %v630_v5, %v626_v4  ;;  %v666_v1 = vld [vmem:[#allocation8 + $0x310] sm:$0xff]  ;;  %v677_v4 = vld [vmem:[#allocation8 + $0x368] sm:$0xff]  ;;  %v675_v5 = vld [vmem:[#allocation8 + $0x358] sm:$0xff] }
 0x16e   :  { %v705_v57 = vld [vmem:[#allocation8 + $0x448] sm:$0xff] }
 0x16f   :  { %4818 = vmatpush1.bf16.msra.mxu1 %v4817_v14  ;;  %5074 = vmatpush1.bf16.msra.mxu0 %v5073_v11  ;;  %v636_v14 = vld [vmem:[#allocation8 + $0x220] sm:$0xff]  ;;  %v4839_v11 = vpack.c.bf16 %v637_v7, %v633_v6  ;;  %v679_v6 = vld [vmem:[#allocation8 + $0x378] sm:$0xff] }
 0x170   :  { %4820 = vmatprep.subr.bf16.mxu1 %v4819_v17  ;;  %5076 = vmatprep.subr.bf16.mxu0 %v5075_v18  ;;  %v638_v17 = vld [vmem:[#allocation8 + $0x230] sm:$0xff]  ;;  %v641_v18 = vld [vmem:[#allocation8 + $0x248] sm:$0xff]  ;;  %v4841_v22 = vpack.c.bf16 %v636_v14, %v632_v13  ;;  %v5115_v13 = vpack.c.bf16 %v679_v6, %v675_v5 }
 0x171   :  { %v5097_v23 = vpack.c.bf16 %v638_v17, %v634_v16  ;;  %v674_v14 = vld [vmem:[#allocation8 + $0x350] sm:$0xff]  ;;  %v685_v16 = vld [vmem:[#allocation8 + $0x3a8] sm:$0xff]  ;;  %v683_v17 = vld [vmem:[#allocation8 + $0x398] sm:$0xff] }
 0x172   :  { %v706_v5 = vld [vmem:[#allocation8 + $0x450] sm:$0xff] }
 0x173   :  { %4822 = vmatpush1.bf16.msra.mxu1 %v4821_v25  ;;  %5078 = vmatpush1.bf16.msra.mxu0 %v5077_v26  ;;  %v644_v25 = vld [vmem:[#allocation8 + $0x260] sm:$0xff]  ;;  %v4843_v26 = vpack.c.bf16 %v645_v19, %v641_v18  ;;  %v687_v18 = vld [vmem:[#allocation8 + $0x3b8] sm:$0xff]  ;;  %v710_v6 = vld [vmem:[#allocation8 + $0x470] sm:$0xff] }
 0x174   :  { %4824 = vmatprep.subr.bf16.mxu1 %v4823_v29  ;;  %5080 = vmatprep.subr.bf16.mxu0 %v5079_v30  ;;  %v646_v29 = vld [vmem:[#allocation8 + $0x270] sm:$0xff]  ;;  %v649_v30 = vld [vmem:[#allocation8 + $0x288] sm:$0xff]  ;;  %v4845_v34 = vpack.c.bf16 %v644_v25, %v640_v24  ;;  %v684_v24 = vld [vmem:[#allocation8 + $0x3a0] sm:$0xff] }
 0x175   :  { %v5101_v35 = vpack.c.bf16 %v646_v29, %v642_v28  ;;  %v682_v25 = vld [vmem:[#allocation8 + $0x390] sm:$0xff]  ;;  %v689_v29 = vld [vmem:[#allocation8 + $0x3c8] sm:$0xff] }
 0x177   :  { %4826 = vmatpush1.bf16.msra.mxu1 %v4825_v37  ;;  %5082 = vmatpush1.bf16.msra.mxu0 %v5081_v38  ;;  %v652_v37 = vld [vmem:[#allocation8 + $0x2a0] sm:$0xff]  ;;  %v4847_v38 = vpack.c.bf16 %v653_v31, %v649_v30  ;;  %v693_v30 = vld [vmem:[#allocation8 + $0x3e8] sm:$0xff]  ;;  %v691_v31 = vld [vmem:[#allocation8 + $0x3d8] sm:$0xff] }
 0x178   :  { %4828 = vmatprep.subr.bf16.mxu1 %v4827_v41  ;;  %5084 = vmatprep.subr.bf16.mxu0 %v5083_v42  ;;  %v654_v41 = vld [vmem:[#allocation8 + $0x2b0] sm:$0xff]  ;;  %v657_v42 = vld [vmem:[#allocation8 + $0x2c8] sm:$0xff]  ;;  %v4849_v46 = vpack.c.bf16 %v652_v37, %v648_v36  ;;  %v4867_v32 = vpack.c.bf16 %v693_v30, %v689_v29  ;;  %v5123_v36 = vpack.c.bf16 %v695_v33, %v691_v31  ;;  %v724_v29 = vld [vmem:[#allocation8 + $0x4e0] sm:$0xff] }
 0x179   :  { %v5105_v47 = vpack.c.bf16 %v654_v41, %v650_v40  ;;  %v697_v41 = vld [vmem:[#allocation8 + $0x408] sm:$0xff]  ;;  %v726_v33 = vld [vmem:[#allocation8 + $0x4f0] sm:$0xff] }
 0x17b   :  { %4830 = vmatpush1.bf16.msra.mxu1 %v4829_v49  ;;  %5086 = vmatpush1.bf16.msra.mxu0 %v5085_v50  ;;  %v660_v49 = vld [vmem:[#allocation8 + $0x2e0] sm:$0xff]  ;;  %v4851_v50 = vpack.c.bf16 %v661_v43, %v657_v42  ;;  %v701_v42 = vld [vmem:[#allocation8 + $0x428] sm:$0xff]  ;;  %v699_v43 = vld [vmem:[#allocation8 + $0x418] sm:$0xff] }
 0x17c   :  { %4832 = vmatprep.subr.bf16.mxu1 %v4831_v53  ;;  %5088 = vmatprep.subr.bf16.mxu0 %v5087_v54  ;;  %v662_v53 = vld [vmem:[#allocation8 + $0x2f0] sm:$0xff]  ;;  %v665_v54 = vld [vmem:[#allocation8 + $0x308] sm:$0xff]  ;;  %v4853_v58 = vpack.c.bf16 %v660_v49, %v656_v48  ;;  %v4871_v44 = vpack.c.bf16 %v701_v42, %v697_v41  ;;  %v696_v49 = vld [vmem:[#allocation8 + $0x400] sm:$0xff] }
 0x17d   :  { %v5109_v59 = vpack.c.bf16 %v662_v53, %v658_v52  ;;  %v728_v42 = vld [vmem:[#allocation8 + $0x500] sm:$0xff] }
 0x17f   :  { %4834 = vmatpush1.bf16.msra.mxu1 %v4833_v61  ;;  %5090 = vmatpush1.bf16.msra.mxu0 %v5089_v62  ;;  %v668_v61 = vld [vmem:[#allocation8 + $0x320] sm:$0xff]  ;;  %v4855_v62 = vpack.c.bf16 %v669_v55, %v665_v54  ;;  %v698_v54 = vld [vmem:[#allocation8 + $0x410] sm:$0xff] }
 0x180   :  { %4836 = vmatprep.subr.bf16.mxu1 %v4835_v2  ;;  %5092 = vmatprep.subr.bf16.mxu0 %v5091_v3  ;;  %v670_v2 = vld [vmem:[#allocation8 + $0x330] sm:$0xff]  ;;  %v673_v3 = vld [vmem:[#allocation8 + $0x348] sm:$0xff]  ;;  %v4857_v7 = vpack.c.bf16 %v668_v61, %v664_v60  ;;  %v707_v60 = vld [vmem:[#allocation8 + $0x458] sm:$0xff] }
 0x181   :  { %v5113_v8 = vpack.c.bf16 %v670_v2, %v666_v1  ;;  %v702_v55 = vld [vmem:[#allocation8 + $0x430] sm:$0xff]  ;;  %v711_v61 = vld [vmem:[#allocation8 + $0x478] sm:$0xff]  ;;  %v704_v2 = vld [vmem:[#allocation8 + $0x440] sm:$0xff] }
 0x182   :  { %v5129_v1 = vpack.c.bf16 %v702_v55, %v698_v54  ;;  %v743_v54 = vld [vmem:[#allocation8 + $0x578] sm:$0xff] }
 0x183   :  { %4838 = vmatpush1.bf16.msra.mxu1 %v4837_v10  ;;  %5094 = vmatpush1.bf16.msra.mxu0 %v5093_v12  ;;  %v676_v10 = vld [vmem:[#allocation8 + $0x360] sm:$0xff]  ;;  %v4859_v12 = vpack.c.bf16 %v677_v4, %v673_v3 }
 0x184   :  { %4840 = vmatprep.subr.bf16.mxu1 %v4839_v11  ;;  %5096 = vmatprep.subr.bf16.mxu0 %v5095_v15  ;;  %v678_v11 = vld [vmem:[#allocation8 + $0x370] sm:$0xff]  ;;  %v681_v15 = vld [vmem:[#allocation8 + $0x388] sm:$0xff]  ;;  %v4861_v19 = vpack.c.bf16 %v676_v10, %v672_v9  ;;  %v708_v3 = vld [vmem:[#allocation8 + $0x460] sm:$0xff]  ;;  %v5131_v9 = vpack.c.bf16 %v711_v61, %v707_v60 }
 0x185   :  { %v5117_v20 = vpack.c.bf16 %v678_v11, %v674_v14  ;;  %v717_v10 = vld [vmem:[#allocation8 + $0x4a8] sm:$0xff]  ;;  %v4877_v11 = vpack.c.bf16 %v708_v3, %v704_v2  ;;  %v738_v61 = vld [vmem:[#allocation8 + $0x550] sm:$0xff]  ;;  %v747_v2 = vld [vmem:[#allocation8 + $0x598] sm:$0xff] }
 0x186   :  { %v751_v3 = vld [vmem:[#allocation8 + $0x5b8] sm:$0xff] }
 0x187   :  { %4842 = vmatpush1.bf16.msra.mxu1 %v4841_v22  ;;  %5098 = vmatpush1.bf16.msra.mxu0 %v5097_v23  ;;  %v4863_v22 = vpack.c.bf16 %v685_v16, %v681_v15  ;;  %v5119_v23 = vpack.c.bf16 %v687_v18, %v683_v17  ;;  %v5133_v15 = vpack.c.bf16 %v710_v6, %v706_v5  ;;  %v712_v16 = vld [vmem:[#allocation8 + $0x480] sm:$0xff] }
 0x188   :  { %4844 = vmatprep.subr.bf16.mxu1 %v4843_v26  ;;  %5100 = vmatprep.subr.bf16.mxu0 %v5099_v27  ;;  %v686_v26 = vld [vmem:[#allocation8 + $0x3b0] sm:$0xff]  ;;  %v4865_v27 = vpack.c.bf16 %v684_v24, %v680_v21  ;;  %v716_v17 = vld [vmem:[#allocation8 + $0x4a0] sm:$0xff]  ;;  %v723_v24 = vld [vmem:[#allocation8 + $0x4d8] sm:$0xff] }
 0x189   :  { %v5121_v28 = vpack.c.bf16 %v686_v26, %v682_v25  ;;  %v718_v21 = vld [vmem:[#allocation8 + $0x4b0] sm:$0xff]  ;;  %v727_v25 = vld [vmem:[#allocation8 + $0x4f8] sm:$0xff]  ;;  %v4881_v26 = vpack.c.bf16 %v716_v17, %v712_v16  ;;  %v744_v6 = vld [vmem:[#allocation8 + $0x580] sm:$0xff] }
 0x18a   :  { %v5139_v31 = vpack.c.bf16 %v727_v25, %v723_v24  ;;  %v761_v24 = vld [vmem:[#allocation8 + $0x608] sm:$0xff] }
 0x18b   :  { %4846 = vmatpush1.bf16.msra.mxu1 %v4845_v34  ;;  %5102 = vmatpush1.bf16.msra.mxu0 %v5101_v35  ;;  %v688_v34 = vld [vmem:[#allocation8 + $0x3c0] sm:$0xff]  ;;  %v765_v25 = vld [vmem:[#allocation8 + $0x628] sm:$0xff] }
 0x18c   :  { %4848 = vmatprep.subr.bf16.mxu1 %v4847_v38  ;;  %5104 = vmatprep.subr.bf16.mxu0 %v5103_v39  ;;  %v692_v35 = vld [vmem:[#allocation8 + $0x3e0] sm:$0xff]  ;;  %v690_v38 = vld [vmem:[#allocation8 + $0x3d0] sm:$0xff] }
 0x18d   :  { %v4869_v37 = vpack.c.bf16 %v692_v35, %v688_v34  ;;  %v694_v39 = vld [vmem:[#allocation8 + $0x3f0] sm:$0xff]  ;;  %v729_v34 = vld [vmem:[#allocation8 + $0x508] sm:$0xff] }
 0x18e   :  { %v5125_v40 = vpack.c.bf16 %v694_v39, %v690_v38  ;;  %v733_v35 = vld [vmem:[#allocation8 + $0x528] sm:$0xff] }
 0x18f   :  { %4850 = vmatpush1.bf16.msra.mxu1 %v4849_v46  ;;  %5106 = vmatpush1.bf16.msra.mxu0 %v5105_v47  ;;  %v5127_v46 = vpack.c.bf16 %v703_v45, %v699_v43  ;;  %v732_v43 = vld [vmem:[#allocation8 + $0x520] sm:$0xff] }
 0x190   :  { %4852 = vmatprep.subr.bf16.mxu1 %v4851_v50  ;;  %5108 = vmatprep.subr.bf16.mxu0 %v5107_v51  ;;  %v700_v50 = vld [vmem:[#allocation8 + $0x420] sm:$0xff]  ;;  %v4889_v55 = vpack.c.bf16 %v732_v43, %v728_v42 }
 0x193   :  { %4854 = vmatpush1.bf16.msra.mxu1 %v4853_v58  ;;  %5110 = vmatpush1.bf16.msra.mxu0 %v5109_v59  ;;  %v709_v59 = vld [vmem:[#allocation8 + $0x468] sm:$0xff] }
 0x194   :  { %4856 = vmatprep.subr.bf16.mxu1 %v4855_v62  ;;  %5112 = vmatprep.subr.bf16.mxu0 %v5111_v63  ;;  %v4873_v63 = vpack.c.bf16 %v700_v50, %v696_v49  ;;  %v730_v49 = vld [vmem:[#allocation8 + $0x510] sm:$0xff] }
 0x195   :  { %v734_v50 = vld [vmem:[#allocation8 + $0x530] sm:$0xff] }
 0x197   :  { %4858 = vmatpush1.bf16.msra.mxu1 %v4857_v7  ;;  %5114 = vmatpush1.bf16.msra.mxu0 %v5113_v8  ;;  %v713_v7 = vld [vmem:[#allocation8 + $0x488] sm:$0xff]  ;;  %v4875_v8 = vpack.c.bf16 %v709_v59, %v705_v57  ;;  %v736_v57 = vld [vmem:[#allocation8 + $0x540] sm:$0xff] }
 0x198   :  { %4860 = vmatprep.subr.bf16.mxu1 %v4859_v12  ;;  %5116 = vmatprep.subr.bf16.mxu0 %v5115_v13  ;;  %v715_v12 = vld [vmem:[#allocation8 + $0x498] sm:$0xff]  ;;  %v4879_v18 = vpack.c.bf16 %v717_v10, %v713_v7  ;;  %v748_v7 = vld [vmem:[#allocation8 + $0x5a0] sm:$0xff]  ;;  %v746_v10 = vld [vmem:[#allocation8 + $0x590] sm:$0xff] }
 0x199   :  { %v719_v13 = vld [vmem:[#allocation8 + $0x4b8] sm:$0xff]  ;;  %v4897_v16 = vpack.c.bf16 %v748_v7, %v744_v6 }
 0x19b   :  { %4862 = vmatpush1.bf16.msra.mxu1 %v4861_v19  ;;  %5118 = vmatpush1.bf16.msra.mxu0 %v5117_v20  ;;  %v5135_v19 = vpack.c.bf16 %v719_v13, %v715_v12  ;;  %v714_v20 = vld [vmem:[#allocation8 + $0x490] sm:$0xff]  ;;  %v753_v13 = vld [vmem:[#allocation8 + $0x5c8] sm:$0xff] }
 0x19c   :  { %4864 = vmatprep.subr.bf16.mxu1 %v4863_v22  ;;  %5120 = vmatprep.subr.bf16.mxu0 %v5119_v23  ;;  %v721_v22 = vld [vmem:[#allocation8 + $0x4c8] sm:$0xff]  ;;  %v750_v12 = vld [vmem:[#allocation8 + $0x5b0] sm:$0xff] }
 0x19d   :  { %v725_v23 = vld [vmem:[#allocation8 + $0x4e8] sm:$0xff]  ;;  %v5153_v17 = vpack.c.bf16 %v750_v12, %v746_v10 }
 0x19e   :  { %v4883_v30 = vpack.c.bf16 %v725_v23, %v721_v22  ;;  %v754_v22 = vld [vmem:[#allocation8 + $0x5d0] sm:$0xff] }
 0x19f   :  { %4866 = vmatpush1.bf16.msra.mxu1 %v4865_v27  ;;  %5122 = vmatpush1.bf16.msra.mxu0 %v5121_v28  ;;  %v5137_v27 = vpack.c.bf16 %v718_v21, %v714_v20  ;;  %v720_v28 = vld [vmem:[#allocation8 + $0x4c0] sm:$0xff]  ;;  %v758_v23 = vld [vmem:[#allocation8 + $0x5f0] sm:$0xff] }
 0x1a0   :  { %4868 = vmatprep.subr.bf16.mxu1 %v4867_v32  ;;  %5124 = vmatprep.subr.bf16.mxu0 %v5123_v36  ;;  %v722_v32 = vld [vmem:[#allocation8 + $0x4d0] sm:$0xff]  ;;  %v731_v36 = vld [vmem:[#allocation8 + $0x518] sm:$0xff] }
 0x1a1   :  { %v5141_v41 = vpack.c.bf16 %v726_v33, %v722_v32  ;;  %v4903_v32 = vpack.c.bf16 %v765_v25, %v761_v24  ;;  %v794_v24 = vld [vmem:[#allocation8 + $0x710] sm:$0xff] }
 0x1a2   :  { %v798_v25 = vld [vmem:[#allocation8 + $0x730] sm:$0xff] }
 0x1a3   :  { %4870 = vmatpush1.bf16.msra.mxu1 %v4869_v37  ;;  %5126 = vmatpush1.bf16.msra.mxu0 %v5125_v40  ;;  %v735_v37 = vld [vmem:[#allocation8 + $0x538] sm:$0xff]  ;;  %v4885_v40 = vpack.c.bf16 %v724_v29, %v720_v28  ;;  %v5157_v29 = vpack.c.bf16 %v758_v23, %v754_v22 }
 0x1a4   :  { %4872 = vmatprep.subr.bf16.mxu1 %v4871_v44  ;;  %5128 = vmatprep.subr.bf16.mxu0 %v5127_v46  ;;  %v4887_v46 = vpack.c.bf16 %v733_v35, %v729_v34  ;;  %v762_v34 = vld [vmem:[#allocation8 + $0x610] sm:$0xff] }
 0x1a5   :  { %v766_v35 = vld [vmem:[#allocation8 + $0x630] sm:$0xff] }
 0x1a6   :  { %v5161_v43 = vpack.c.bf16 %v766_v35, %v762_v34 }
 0x229   :  { %v334_v47 = vpop.f32.mrb[0].mxu1  ;;  %v6683_v48 = vpop.f32.mrb[2].mxu0 }
 0x22a   :  { %v552_v51 = vmul.f32 0.01, %v334_v47  ;;  %v336_v52 = vpop.f32.mrb[1].mxu1  ;;  %v407_v53 = vpop.f32.mrb[3].mxu0 }
 0x22b   :  { %v553_v56 = vmul.f32 0.01, %v336_v52  ;;  %v555_v58 = vmul.f32 0.01, %v407_v53 }
 0x22c   :  { %v560_v4 = vmax.f32 %v334_v47, %v552_v51  ;;  %v5143_v47 = vpack.c.bf16 %v735_v37, %v731_v36  ;;  %v737_v51 = vld [vmem:[#allocation8 + $0x548] sm:$0xff] }
 0x22d   :  { %v561_v62 = vmax.f32 %v336_v52, %v553_v56  ;;  %v563_v14 = vmax.f32 %v407_v53, %v555_v58  ;;  %v741_v52 = vld [vmem:[#allocation8 + $0x568] sm:$0xff]  ;;  %v739_v53 = vld [vmem:[#allocation8 + $0x558] sm:$0xff]  ;;  %v5145_v56 = vpack.c.bf16 %v734_v50, %v730_v49  ;;  %v740_v58 = vld [vmem:[#allocation8 + $0x560] sm:$0xff] }
 0x22e   :  { %v4891_v59 = vpack.c.bf16 %v741_v52, %v737_v51  ;;  %v5147_v60 = vpack.c.bf16 %v743_v54, %v739_v53  ;;  %v769_v36 = vld [vmem:[#allocation8 + $0x648] sm:$0xff]  ;;  %v770_v51 = vld [vmem:[#allocation8 + $0x650] sm:$0xff] }
 0x22f   :  { %1144 = vmatprep.mubr.f32.mxu1 %v561_v62  ;;  %1428 = vmatprep.mubr.f32.mxu0 %v561_v62  ;;  %v742_v62 = vld [vmem:[#allocation8 + $0x570] sm:$0xff]  ;;  %v773_v37 = vld [vmem:[#allocation8 + $0x668] sm:$0xff] }
 0x230   :  { %1145 = vmatmul.mubr.f32.vlgmr.msra.gmra.mrb[4].mxu1 %v560_v4  ;;  %1429 = vmatmul.mubr.f32.vlgmr.msra.gmra.mrb[6].mxu0 %v560_v4  ;;  %v4893_v4 = vpack.c.bf16 %v740_v58, %v736_v57  ;;  %v5149_v5 = vpack.c.bf16 %v742_v62, %v738_v61  ;;  %v4907_v49 = vpack.c.bf16 %v773_v37, %v769_v36  ;;  %v774_v52 = vld [vmem:[#allocation8 + $0x670] sm:$0xff]  ;;  %v777_v53 = vld [vmem:[#allocation8 + $0x688] sm:$0xff] }
 0x231   :  { %4874 = vmatpush1.bf16.msra.mxu1 %v4873_v63  ;;  %5130 = vmatpush1.bf16.msra.mxu0 %v5129_v1  ;;  %v745_v63 = vld [vmem:[#allocation8 + $0x588] sm:$0xff]  ;;  %v5165_v58 = vpack.c.bf16 %v774_v52, %v770_v51  ;;  %v802_v36 = vld [vmem:[#allocation8 + $0x750] sm:$0xff] }
 0x232   :  { %1215 = vmatprep.mubr.f32.mxu1 %v563_v14  ;;  %1499 = vmatprep.mubr.f32.mxu0 %v563_v14  ;;  %v749_v1 = vld [vmem:[#allocation8 + $0x5a8] sm:$0xff]  ;;  %v806_v37 = vld [vmem:[#allocation8 + $0x770] sm:$0xff] }
 0x233   :  { %4876 = vmatprep.subr.bf16.mxu1 %v4875_v8  ;;  %5132 = vmatprep.subr.bf16.mxu0 %v5131_v9  ;;  %v4895_v8 = vpack.c.bf16 %v749_v1, %v745_v63  ;;  %v5151_v9 = vpack.c.bf16 %v751_v3, %v747_v2  ;;  %v757_v14 = vld [vmem:[#allocation8 + $0x5e8] sm:$0xff]  ;;  %v778_v63 = vld [vmem:[#allocation8 + $0x690] sm:$0xff] }
 0x234   :  { %v4899_v20 = vpack.c.bf16 %v757_v14, %v753_v13  ;;  %v781_v54 = vld [vmem:[#allocation8 + $0x6a8] sm:$0xff]  ;;  %v782_v1 = vld [vmem:[#allocation8 + $0x6b0] sm:$0xff] }
 0x235   :  { %4878 = vmatpush1.bf16.msra.mxu1 %v4877_v11  ;;  %5134 = vmatpush1.bf16.msra.mxu0 %v5133_v15  ;;  %v755_v11 = vld [vmem:[#allocation8 + $0x5d8] sm:$0xff]  ;;  %v4911_v61 = vpack.c.bf16 %v781_v54, %v777_v53  ;;  %v785_v2 = vld [vmem:[#allocation8 + $0x6c8] sm:$0xff]  ;;  %v5169_v7 = vpack.c.bf16 %v782_v1, %v778_v63  ;;  %v786_v13 = vld [vmem:[#allocation8 + $0x6d0] sm:$0xff] }
 0x236   :  { %4880 = vmatprep.subr.bf16.mxu1 %v4879_v18  ;;  %5136 = vmatprep.subr.bf16.mxu0 %v5135_v19  ;;  %v759_v15 = vld [vmem:[#allocation8 + $0x5f8] sm:$0xff]  ;;  %v752_v18 = vld [vmem:[#allocation8 + $0x5c0] sm:$0xff]  ;;  %v789_v3 = vld [vmem:[#allocation8 + $0x6e8] sm:$0xff] }
 0x237   :  { %v756_v19 = vld [vmem:[#allocation8 + $0x5e0] sm:$0xff]  ;;  %v5155_v21 = vpack.c.bf16 %v759_v15, %v755_v11  ;;  %v4915_v10 = vpack.c.bf16 %v789_v3, %v785_v2  ;;  %v790_v14 = vld [vmem:[#allocation8 + $0x6f0] sm:$0xff]  ;;  %v793_v11 = vld [vmem:[#allocation8 + $0x708] sm:$0xff] }
 0x238   :  { %v4901_v28 = vpack.c.bf16 %v756_v19, %v752_v18  ;;  %v797_v15 = vld [vmem:[#allocation8 + $0x728] sm:$0xff]  ;;  %v5173_v19 = vpack.c.bf16 %v790_v14, %v786_v13  ;;  %v810_v53 = vld [vmem:[#allocation8 + $0x790] sm:$0xff]  ;;  %v824_v14 = vld [vmem:[#allocation8 + $0x800] sm:$0xff] }
 0x239   :  { %v6685_v38 = vpop.f32.mrb[2].mxu1  ;;  %v6687_v39 = vpop.f32.mrb[4].mxu0  ;;  %4882 = vmatpush1.bf16.msra.mxu1 %v4881_v26  ;;  %5138 = vmatpush1.bf16.msra.mxu0 %v5137_v27  ;;  %v763_v26 = vld [vmem:[#allocation8 + $0x618] sm:$0xff]  ;;  %v4919_v22 = vpack.c.bf16 %v797_v15, %v793_v11  ;;  %v814_v54 = vld [vmem:[#allocation8 + $0x7b0] sm:$0xff]  ;;  %v828_v11 = vld [vmem:[#allocation8 + $0x820] sm:$0xff] }
 0x23a   :  { %v6689_v44 = vpop.f32.mrb[3].mxu1  ;;  %v6691_v45 = vpop.f32.mrb[5].mxu0  ;;  %4884 = vmatprep.subr.bf16.mxu1 %v4883_v30  ;;  %5140 = vmatprep.subr.bf16.mxu0 %v5139_v31  ;;  %v767_v27 = vld [vmem:[#allocation8 + $0x638] sm:$0xff]  ;;  %v760_v30 = vld [vmem:[#allocation8 + $0x600] sm:$0xff]  ;;  %v818_v2 = vld [vmem:[#allocation8 + $0x7d0] sm:$0xff] }
 0x23b   :  { %v764_v31 = vld [vmem:[#allocation8 + $0x620] sm:$0xff]  ;;  %v5159_v33 = vpack.c.bf16 %v767_v27, %v763_v26  ;;  %v801_v26 = vld [vmem:[#allocation8 + $0x748] sm:$0xff]  ;;  %v822_v3 = vld [vmem:[#allocation8 + $0x7f0] sm:$0xff]  ;;  %v557_v15 = vmul.f32 0.01, %v6689_v44 }
 0x23c   :  { %v4905_v42 = vpack.c.bf16 %v764_v31, %v760_v30  ;;  %v805_v27 = vld [vmem:[#allocation8 + $0x768] sm:$0xff]  ;;  %v5177_v31 = vpack.c.bf16 %v798_v25, %v794_v24  ;;  %v832_v25 = vld [vmem:[#allocation8 + $0x840] sm:$0xff] }
 0x23d   :  { %4886 = vmatpush1.bf16.msra.mxu1 %v4885_v40  ;;  %5142 = vmatpush1.bf16.msra.mxu0 %v5141_v41  ;;  %v771_v40 = vld [vmem:[#allocation8 + $0x658] sm:$0xff]  ;;  %v4923_v34 = vpack.c.bf16 %v805_v27, %v801_v26  ;;  %v836_v26 = vld [vmem:[#allocation8 + $0x860] sm:$0xff]  ;;  %v834_v27 = vld [vmem:[#allocation8 + $0x850] sm:$0xff] }
 0x23e   :  { %4888 = vmatprep.subr.bf16.mxu1 %v4887_v46  ;;  %5144 = vmatprep.subr.bf16.mxu0 %v5143_v47  ;;  %v775_v41 = vld [vmem:[#allocation8 + $0x678] sm:$0xff]  ;;  %v768_v46 = vld [vmem:[#allocation8 + $0x640] sm:$0xff] }
 0x23f   :  { %v772_v47 = vld [vmem:[#allocation8 + $0x660] sm:$0xff]  ;;  %v5163_v50 = vpack.c.bf16 %v775_v41, %v771_v40  ;;  %v809_v40 = vld [vmem:[#allocation8 + $0x788] sm:$0xff] }
 0x240   :  { %v4909_v57 = vpack.c.bf16 %v772_v47, %v768_v46  ;;  %v813_v41 = vld [vmem:[#allocation8 + $0x7a8] sm:$0xff]  ;;  %v5181_v47 = vpack.c.bf16 %v806_v37, %v802_v36 }
 0x241   :  { %4890 = vmatpush1.bf16.msra.mxu1 %v4889_v55  ;;  %5146 = vmatpush1.bf16.msra.mxu0 %v5145_v56  ;;  %v779_v55 = vld [vmem:[#allocation8 + $0x698] sm:$0xff]  ;;  %v4927_v51 = vpack.c.bf16 %v813_v41, %v809_v40  ;;  %v840_v40 = vld [vmem:[#allocation8 + $0x880] sm:$0xff] }
 0x242   :  { %4892 = vmatprep.subr.bf16.mxu1 %v4891_v59  ;;  %5148 = vmatprep.subr.bf16.mxu0 %v5147_v60  ;;  %v783_v56 = vld [vmem:[#allocation8 + $0x6b8] sm:$0xff]  ;;  %v776_v59 = vld [vmem:[#allocation8 + $0x680] sm:$0xff] }
 0x243   :  { %v780_v60 = vld [vmem:[#allocation8 + $0x6a0] sm:$0xff]  ;;  %v5167_v62 = vpack.c.bf16 %v783_v56, %v779_v55  ;;  %v817_v55 = vld [vmem:[#allocation8 + $0x7c8] sm:$0xff] }
 0x244   :  { %v4913_v6 = vpack.c.bf16 %v780_v60, %v776_v59  ;;  %v821_v56 = vld [vmem:[#allocation8 + $0x7e8] sm:$0xff]  ;;  %v5185_v60 = vpack.c.bf16 %v814_v54, %v810_v53  ;;  %v844_v41 = vld [vmem:[#allocation8 + $0x8a0] sm:$0xff] }
 0x245   :  { %4894 = vmatpush1.bf16.msra.mxu1 %v4893_v4  ;;  %5150 = vmatpush1.bf16.msra.mxu0 %v5149_v5  ;;  %v787_v4 = vld [vmem:[#allocation8 + $0x6d8] sm:$0xff]  ;;  %v4931_v63 = vpack.c.bf16 %v821_v56, %v817_v55  ;;  %v848_v54 = vld [vmem:[#allocation8 + $0x8c0] sm:$0xff]  ;;  %v850_v56 = vld [vmem:[#allocation8 + $0x8d0] sm:$0xff] }
 0x246   :  { %4896 = vmatprep.subr.bf16.mxu1 %v4895_v8  ;;  %5152 = vmatprep.subr.bf16.mxu0 %v5151_v9  ;;  %v791_v5 = vld [vmem:[#allocation8 + $0x6f8] sm:$0xff]  ;;  %v784_v8 = vld [vmem:[#allocation8 + $0x6c0] sm:$0xff] }
 0x247   :  { %v788_v9 = vld [vmem:[#allocation8 + $0x6e0] sm:$0xff]  ;;  %v5171_v12 = vpack.c.bf16 %v791_v5, %v787_v4  ;;  %v825_v4 = vld [vmem:[#allocation8 + $0x808] sm:$0xff] }
 0x248   :  { %v4917_v18 = vpack.c.bf16 %v788_v9, %v784_v8  ;;  %v829_v5 = vld [vmem:[#allocation8 + $0x828] sm:$0xff]  ;;  %v5189_v9 = vpack.c.bf16 %v822_v3, %v818_v2  ;;  %v852_v55 = vld [vmem:[#allocation8 + $0x8e0] sm:$0xff] }
 0x249   :  { %4898 = vmatpush1.bf16.msra.mxu1 %v4897_v16  ;;  %5154 = vmatpush1.bf16.msra.mxu0 %v5153_v17  ;;  %v795_v16 = vld [vmem:[#allocation8 + $0x718] sm:$0xff]  ;;  %v856_v3 = vld [vmem:[#allocation8 + $0x900] sm:$0xff] }
 0x24a   :  { %4900 = vmatprep.subr.bf16.mxu1 %v4899_v20  ;;  %5156 = vmatprep.subr.bf16.mxu0 %v5155_v21  ;;  %v799_v17 = vld [vmem:[#allocation8 + $0x738] sm:$0xff]  ;;  %v792_v20 = vld [vmem:[#allocation8 + $0x700] sm:$0xff] }
 0x24b   :  { %v796_v21 = vld [vmem:[#allocation8 + $0x720] sm:$0xff]  ;;  %v5175_v23 = vpack.c.bf16 %v799_v17, %v795_v16  ;;  %v826_v16 = vld [vmem:[#allocation8 + $0x810] sm:$0xff] }
 0x24c   :  { %v4921_v30 = vpack.c.bf16 %v796_v21, %v792_v20  ;;  %v830_v17 = vld [vmem:[#allocation8 + $0x830] sm:$0xff]  ;;  %v835_v20 = vld [vmem:[#allocation8 + $0x858] sm:$0xff] }
 0x24d   :  { %4902 = vmatpush1.bf16.msra.mxu1 %v4901_v28  ;;  %5158 = vmatpush1.bf16.msra.mxu0 %v5157_v29  ;;  %v803_v28 = vld [vmem:[#allocation8 + $0x758] sm:$0xff]  ;;  %v5193_v24 = vpack.c.bf16 %v830_v17, %v826_v16  ;;  %v868_v16 = vld [vmem:[#allocation8 + $0x960] sm:$0xff]  ;;  %v866_v17 = vld [vmem:[#allocation8 + $0x950] sm:$0xff] }
 0x24e   :  { %4904 = vmatprep.subr.bf16.mxu1 %v4903_v32  ;;  %5160 = vmatprep.subr.bf16.mxu0 %v5159_v33  ;;  %v807_v29 = vld [vmem:[#allocation8 + $0x778] sm:$0xff]  ;;  %v800_v32 = vld [vmem:[#allocation8 + $0x740] sm:$0xff] }
 0x24f   :  { %v804_v33 = vld [vmem:[#allocation8 + $0x760] sm:$0xff]  ;;  %v5179_v35 = vpack.c.bf16 %v807_v29, %v803_v28  ;;  %v839_v21 = vld [vmem:[#allocation8 + $0x878] sm:$0xff]  ;;  %v565_v28 = vmax.f32 %v6689_v44, %v557_v15 }
 0x250   :  { %v4925_v46 = vpack.c.bf16 %v804_v33, %v800_v32  ;;  %v841_v32 = vld [vmem:[#allocation8 + $0x888] sm:$0xff]  ;;  %v864_v15 = vld [vmem:[#allocation8 + $0x940] sm:$0xff] }
 0x251   :  { %4906 = vmatpush1.bf16.msra.mxu1 %v4905_v42  ;;  %5162 = vmatpush1.bf16.msra.mxu0 %v5161_v43  ;;  %v811_v42 = vld [vmem:[#allocation8 + $0x798] sm:$0xff]  ;;  %v845_v33 = vld [vmem:[#allocation8 + $0x8a8] sm:$0xff] }
 0x252   :  { %4908 = vmatprep.subr.bf16.mxu1 %v4907_v49  ;;  %5164 = vmatprep.subr.bf16.mxu0 %v5163_v50  ;;  %v815_v43 = vld [vmem:[#allocation8 + $0x7b8] sm:$0xff]  ;;  %v808_v49 = vld [vmem:[#allocation8 + $0x780] sm:$0xff]  ;;  %v4943_v37 = vpack.c.bf16 %v845_v33, %v841_v32  ;;  %v881_v32 = vld [vmem:[#allocation8 + $0x9c8] sm:$0xff] }
 0x253   :  { %v812_v50 = vld [vmem:[#allocation8 + $0x7a0] sm:$0xff]  ;;  %v5183_v52 = vpack.c.bf16 %v815_v43, %v811_v42  ;;  %v842_v42 = vld [vmem:[#allocation8 + $0x890] sm:$0xff]  ;;  %v885_v33 = vld [vmem:[#allocation8 + $0x9e8] sm:$0xff] }
 0x254   :  { %v4929_v59 = vpack.c.bf16 %v812_v50, %v808_v49  ;;  %v846_v43 = vld [vmem:[#allocation8 + $0x8b0] sm:$0xff]  ;;  %v851_v49 = vld [vmem:[#allocation8 + $0x8d8] sm:$0xff] }
 0x255   :  { %4910 = vmatpush1.bf16.msra.mxu1 %v4909_v57  ;;  %5166 = vmatpush1.bf16.msra.mxu0 %v5165_v58  ;;  %v819_v57 = vld [vmem:[#allocation8 + $0x7d8] sm:$0xff] }
 0x256   :  { %4912 = vmatprep.subr.bf16.mxu1 %v4911_v61  ;;  %5168 = vmatprep.subr.bf16.mxu0 %v5167_v62  ;;  %v823_v58 = vld [vmem:[#allocation8 + $0x7f8] sm:$0xff]  ;;  %v816_v61 = vld [vmem:[#allocation8 + $0x7c0] sm:$0xff] }
 0x257   :  { %v820_v62 = vld [vmem:[#allocation8 + $0x7e0] sm:$0xff]  ;;  %v5187_v1 = vpack.c.bf16 %v823_v58, %v819_v57  ;;  %v855_v50 = vld [vmem:[#allocation8 + $0x8f8] sm:$0xff]  ;;  %v854_v58 = vld [vmem:[#allocation8 + $0x8f0] sm:$0xff] }
 0x258   :  { %v4933_v8 = vpack.c.bf16 %v820_v62, %v816_v61  ;;  %v5203_v57 = vpack.c.bf16 %v855_v50, %v851_v49  ;;  %v859_v61 = vld [vmem:[#allocation8 + $0x918] sm:$0xff] }
 0x259   :  { %4914 = vmatpush1.bf16.msra.mxu1 %v4913_v6  ;;  %5170 = vmatpush1.bf16.msra.mxu0 %v5169_v7  ;;  %v827_v6 = vld [vmem:[#allocation8 + $0x818] sm:$0xff] }
 0x25a   :  { %4916 = vmatprep.subr.bf16.mxu1 %v4915_v10  ;;  %5172 = vmatprep.subr.bf16.mxu0 %v5171_v12  ;;  %v831_v7 = vld [vmem:[#allocation8 + $0x838] sm:$0xff]  ;;  %v554_v10 = vmul.f32 0.01, %v6683_v48  ;;  %v4935_v12 = vpack.c.bf16 %v829_v5, %v825_v4  ;;  %v860_v4 = vld [vmem:[#allocation8 + $0x920] sm:$0xff]  ;;  %v858_v5 = vld [vmem:[#allocation8 + $0x910] sm:$0xff] }
 0x25b   :  { %v5191_v13 = vpack.c.bf16 %v831_v7, %v827_v6  ;;  %v863_v62 = vld [vmem:[#allocation8 + $0x938] sm:$0xff]  ;;  %v862_v7 = vld [vmem:[#allocation8 + $0x930] sm:$0xff] }
 0x25c   :  { %v5207_v6 = vpack.c.bf16 %v863_v62, %v859_v61  ;;  %v891_v49 = vld [vmem:[#allocation8 + $0xa18] sm:$0xff] }
 0x25d   :  { %4918 = vmatpush1.bf16.msra.mxu1 %v4917_v18  ;;  %5174 = vmatpush1.bf16.msra.mxu0 %v5173_v19  ;;  %v833_v18 = vld [vmem:[#allocation8 + $0x848] sm:$0xff]  ;;  %v895_v50 = vld [vmem:[#allocation8 + $0xa38] sm:$0xff] }
 0x25e   :  { %4920 = vmatprep.subr.bf16.mxu1 %v4919_v22  ;;  %5176 = vmatprep.subr.bf16.mxu0 %v5175_v23  ;;  %v837_v19 = vld [vmem:[#allocation8 + $0x868] sm:$0xff]  ;;  %v4937_v22 = vpack.c.bf16 %v828_v11, %v824_v14  ;;  %v562_v23 = vmax.f32 %v6683_v48, %v554_v10  ;;  %v4941_v48 = vpack.c.bf16 %v836_v26, %v832_v25  ;;  %v867_v10 = vld [vmem:[#allocation8 + $0x958] sm:$0xff] }
 0x25f   :  { %v4939_v29 = vpack.c.bf16 %v837_v19, %v833_v18  ;;  %v5209_v14 = vpack.c.bf16 %v862_v7, %v858_v5  ;;  %v870_v19 = vld [vmem:[#allocation8 + $0x970] sm:$0xff]  ;;  %v899_v61 = vld [vmem:[#allocation8 + $0xa58] sm:$0xff] }
 0x260   :  { %v5213_v25 = vpack.c.bf16 %v870_v19, %v866_v17  ;;  %v903_v62 = vld [vmem:[#allocation8 + $0xa78] sm:$0xff]  ;;  %v898_v5 = vld [vmem:[#allocation8 + $0xa50] sm:$0xff] }
 0x261   :  { %4922 = vmatpush1.bf16.msra.mxu1 %v4921_v30  ;;  %5178 = vmatpush1.bf16.msra.mxu0 %v5177_v31  ;;  %v5195_v30 = vpack.c.bf16 %v839_v21, %v835_v20  ;;  %v838_v31 = vld [vmem:[#allocation8 + $0x870] sm:$0xff]  ;;  %v873_v20 = vld [vmem:[#allocation8 + $0x988] sm:$0xff] }
 0x262   :  { %4924 = vmatprep.subr.bf16.mxu1 %v4923_v34  ;;  %5180 = vmatprep.subr.bf16.mxu0 %v5179_v35  ;;  %v843_v34 = vld [vmem:[#allocation8 + $0x898] sm:$0xff]  ;;  %v5197_v36 = vpack.c.bf16 %v838_v31, %v834_v27  ;;  %v877_v21 = vld [vmem:[#allocation8 + $0x9a8] sm:$0xff]  ;;  %v872_v27 = vld [vmem:[#allocation8 + $0x980] sm:$0xff] }
 0x263   :  { %v847_v35 = vld [vmem:[#allocation8 + $0x8b8] sm:$0xff]  ;;  %v4959_v26 = vpack.c.bf16 %v877_v21, %v873_v20  ;;  %v878_v31 = vld [vmem:[#allocation8 + $0x9b0] sm:$0xff]  ;;  %v913_v20 = vld [vmem:[#allocation8 + $0xac8] sm:$0xff] }
 0x264   :  { %v5199_v44 = vpack.c.bf16 %v847_v35, %v843_v34  ;;  %v883_v34 = vld [vmem:[#allocation8 + $0x9d8] sm:$0xff]  ;;  %v902_v7 = vld [vmem:[#allocation8 + $0xa70] sm:$0xff]  ;;  %v917_v21 = vld [vmem:[#allocation8 + $0xae8] sm:$0xff] }
 0x265   :  { %4926 = vmatpush1.bf16.msra.mxu1 %v4925_v46  ;;  %5182 = vmatpush1.bf16.msra.mxu0 %v5181_v47  ;;  %v849_v46 = vld [vmem:[#allocation8 + $0x8c8] sm:$0xff]  ;;  %v887_v35 = vld [vmem:[#allocation8 + $0x9f8] sm:$0xff]  ;;  %v906_v17 = vld [vmem:[#allocation8 + $0xa90] sm:$0xff] }
 0x266   :  { %4928 = vmatprep.subr.bf16.mxu1 %v4927_v51  ;;  %5184 = vmatprep.subr.bf16.mxu0 %v5183_v52  ;;  %v853_v47 = vld [vmem:[#allocation8 + $0x8e8] sm:$0xff]  ;;  %v4945_v51 = vpack.c.bf16 %v844_v41, %v840_v40  ;;  %v5201_v52 = vpack.c.bf16 %v846_v43, %v842_v42  ;;  %v880_v40 = vld [vmem:[#allocation8 + $0x9c0] sm:$0xff]  ;;  %v882_v42 = vld [vmem:[#allocation8 + $0x9d0] sm:$0xff] }
 0x267   :  { %v4947_v53 = vpack.c.bf16 %v853_v47, %v849_v46  ;;  %v884_v41 = vld [vmem:[#allocation8 + $0x9e0] sm:$0xff]  ;;  %v886_v43 = vld [vmem:[#allocation8 + $0x9f0] sm:$0xff]  ;;  %v889_v46 = vld [vmem:[#allocation8 + $0xa08] sm:$0xff] }
 0x268   :  { %v893_v47 = vld [vmem:[#allocation8 + $0xa28] sm:$0xff]  ;;  %v910_v19 = vld [vmem:[#allocation8 + $0xab0] sm:$0xff] }
 0x269   :  { %4930 = vmatpush1.bf16.msra.mxu1 %v4929_v59  ;;  %5186 = vmatpush1.bf16.msra.mxu0 %v5185_v60  ;;  %v857_v59 = vld [vmem:[#allocation8 + $0x908] sm:$0xff] }
 0x26a   :  { %4932 = vmatprep.subr.bf16.mxu1 %v4931_v63  ;;  %5188 = vmatprep.subr.bf16.mxu0 %v5187_v1  ;;  %v861_v60 = vld [vmem:[#allocation8 + $0x928] sm:$0xff]  ;;  %v4949_v63 = vpack.c.bf16 %v852_v55, %v848_v54  ;;  %v5205_v1 = vpack.c.bf16 %v854_v58, %v850_v56  ;;  %v888_v54 = vld [vmem:[#allocation8 + $0xa00] sm:$0xff]  ;;  %v890_v56 = vld [vmem:[#allocation8 + $0xa10] sm:$0xff] }
 0x26b   :  { %v4951_v2 = vpack.c.bf16 %v861_v60, %v857_v59  ;;  %v892_v55 = vld [vmem:[#allocation8 + $0xa20] sm:$0xff]  ;;  %v894_v58 = vld [vmem:[#allocation8 + $0xa30] sm:$0xff]  ;;  %v897_v59 = vld [vmem:[#allocation8 + $0xa48] sm:$0xff] }
 0x26c   :  { %v901_v60 = vld [vmem:[#allocation8 + $0xa68] sm:$0xff] }
 0x26d   :  { %4934 = vmatpush1.bf16.msra.mxu1 %v4933_v8  ;;  %5190 = vmatpush1.bf16.msra.mxu0 %v5189_v9  ;;  %v865_v8 = vld [vmem:[#allocation8 + $0x948] sm:$0xff] }
 0x26e   :  { %4936 = vmatprep.subr.bf16.mxu1 %v4935_v12  ;;  %5192 = vmatprep.subr.bf16.mxu0 %v5191_v13  ;;  %v869_v9 = vld [vmem:[#allocation8 + $0x968] sm:$0xff]  ;;  %v871_v12 = vld [vmem:[#allocation8 + $0x978] sm:$0xff]  ;;  %v4953_v13 = vpack.c.bf16 %v860_v4, %v856_v3  ;;  %v896_v3 = vld [vmem:[#allocation8 + $0xa40] sm:$0xff] }
 0x26f   :  { %v4955_v11 = vpack.c.bf16 %v869_v9, %v865_v8  ;;  %v5211_v18 = vpack.c.bf16 %v871_v12, %v867_v10  ;;  %v900_v4 = vld [vmem:[#allocation8 + $0xa60] sm:$0xff]  ;;  %v905_v8 = vld [vmem:[#allocation8 + $0xa88] sm:$0xff]  ;;  %v907_v10 = vld [vmem:[#allocation8 + $0xa98] sm:$0xff] }
 0x270   :  { %1216 = vmatmul.mubr.f32.vlgmr.msra.gmra.mrb[4].mxu1 %v562_v23  ;;  %1500 = vmatmul.mubr.f32.vlgmr.msra.gmra.mrb[6].mxu0 %v562_v23  ;;  %v879_v23 = vld [vmem:[#allocation8 + $0x9b8] sm:$0xff]  ;;  %v909_v9 = vld [vmem:[#allocation8 + $0xaa8] sm:$0xff] }
 0x271   :  { %4938 = vmatpush1.bf16.msra.mxu1 %v4937_v22  ;;  %1286 = vmatprep.mubr.f32.mxu1 %v565_v28  ;;  %v875_v22 = vld [vmem:[#allocation8 + $0x998] sm:$0xff] }
 0x272   :  { %5194 = vmatpush1.bf16.msra.mxu0 %v5193_v24  ;;  %1570 = vmatprep.mubr.f32.mxu0 %v565_v28  ;;  %v4957_v24 = vpack.c.bf16 %v868_v16, %v864_v15  ;;  %v876_v28 = vld [vmem:[#allocation8 + $0x9a0] sm:$0xff]  ;;  %v911_v12 = vld [vmem:[#allocation8 + $0xab8] sm:$0xff] }
 0x273   :  { %4940 = vmatprep.subr.bf16.mxu1 %v4939_v29  ;;  %5196 = vmatprep.subr.bf16.mxu0 %v5195_v30  ;;  %v874_v29 = vld [vmem:[#allocation8 + $0x990] sm:$0xff]  ;;  %v5215_v30 = vpack.c.bf16 %v879_v23, %v875_v22  ;;  %v904_v15 = vld [vmem:[#allocation8 + $0xa80] sm:$0xff]  ;;  %v915_v22 = vld [vmem:[#allocation8 + $0xad8] sm:$0xff] }
 0x274   :  { %v908_v16 = vld [vmem:[#allocation8 + $0xaa0] sm:$0xff]  ;;  %v919_v23 = vld [vmem:[#allocation8 + $0xaf8] sm:$0xff] }
 0x275   :  { %4942 = vmatpush1.bf16.msra.mxu1 %v4941_v48  ;;  %v4961_v48 = vpack.c.bf16 %v876_v28, %v872_v27  ;;  %v912_v27 = vld [vmem:[#allocation8 + $0xac0] sm:$0xff] }
 0x276   :  { %5198 = vmatpush1.bf16.msra.mxu0 %v5197_v36  ;;  %4944 = vmatprep.subr.bf16.mxu1 %v4943_v37  ;;  %v5217_v36 = vpack.c.bf16 %v878_v31, %v874_v29  ;;  %v4963_v37 = vpack.c.bf16 %v885_v33, %v881_v32  ;;  %v916_v28 = vld [vmem:[#allocation8 + $0xae0] sm:$0xff]  ;;  %v914_v29 = vld [vmem:[#allocation8 + $0xad0] sm:$0xff]  ;;  %v921_v32 = vld [vmem:[#allocation8 + $0xb08] sm:$0xff] }
 0x277   :  { %5200 = vmatprep.subr.bf16.mxu0 %v5199_v44  ;;  %v5219_v44 = vpack.c.bf16 %v887_v35, %v883_v34  ;;  %v918_v31 = vld [vmem:[#allocation8 + $0xaf0] sm:$0xff]  ;;  %v925_v33 = vld [vmem:[#allocation8 + $0xb28] sm:$0xff]  ;;  %v923_v34 = vld [vmem:[#allocation8 + $0xb18] sm:$0xff] }
 0x278   :  { %v927_v35 = vld [vmem:[#allocation8 + $0xb38] sm:$0xff] }
 0x279   :  { %4946 = vmatpush1.bf16.msra.mxu1 %v4945_v51  ;;  %v4965_v51 = vpack.c.bf16 %v884_v41, %v880_v40  ;;  %v920_v40 = vld [vmem:[#allocation8 + $0xb00] sm:$0xff] }
 0x27a   :  { %5202 = vmatpush1.bf16.msra.mxu0 %v5201_v52  ;;  %4948 = vmatprep.subr.bf16.mxu1 %v4947_v53  ;;  %v5221_v52 = vpack.c.bf16 %v886_v43, %v882_v42  ;;  %v4967_v53 = vpack.c.bf16 %v893_v47, %v889_v46  ;;  %v924_v41 = vld [vmem:[#allocation8 + $0xb20] sm:$0xff]  ;;  %v922_v42 = vld [vmem:[#allocation8 + $0xb10] sm:$0xff]  ;;  %v929_v46 = vld [vmem:[#allocation8 + $0xb48] sm:$0xff] }
 0x27b   :  { %5204 = vmatprep.subr.bf16.mxu0 %v5203_v57  ;;  %v5223_v57 = vpack.c.bf16 %v895_v50, %v891_v49  ;;  %v926_v43 = vld [vmem:[#allocation8 + $0xb30] sm:$0xff]  ;;  %v933_v47 = vld [vmem:[#allocation8 + $0xb68] sm:$0xff]  ;;  %v931_v49 = vld [vmem:[#allocation8 + $0xb58] sm:$0xff] }
 0x27c   :  { %v935_v50 = vld [vmem:[#allocation8 + $0xb78] sm:$0xff] }
 0x27d   :  { %4950 = vmatpush1.bf16.msra.mxu1 %v4949_v63  ;;  %v4969_v63 = vpack.c.bf16 %v892_v55, %v888_v54  ;;  %v928_v54 = vld [vmem:[#allocation8 + $0xb40] sm:$0xff] }
 0x27e   :  { %5206 = vmatpush1.bf16.msra.mxu0 %v5205_v1  ;;  %4952 = vmatprep.subr.bf16.mxu1 %v4951_v2  ;;  %v5225_v1 = vpack.c.bf16 %v894_v58, %v890_v56  ;;  %v4971_v2 = vpack.c.bf16 %v901_v60, %v897_v59  ;;  %v932_v55 = vld [vmem:[#allocation8 + $0xb60] sm:$0xff]  ;;  %v930_v56 = vld [vmem:[#allocation8 + $0xb50] sm:$0xff]  ;;  %v937_v59 = vld [vmem:[#allocation8 + $0xb88] sm:$0xff] }
 0x27f   :  { %5208 = vmatprep.subr.bf16.mxu0 %v5207_v6  ;;  %v5227_v6 = vpack.c.bf16 %v903_v62, %v899_v61  ;;  %v934_v58 = vld [vmem:[#allocation8 + $0xb70] sm:$0xff]  ;;  %v941_v60 = vld [vmem:[#allocation8 + $0xba8] sm:$0xff]  ;;  %v939_v61 = vld [vmem:[#allocation8 + $0xb98] sm:$0xff] }
 0x280   :  { %v943_v62 = vld [vmem:[#allocation8 + $0xbb8] sm:$0xff] }
 0x281   :  { %4954 = vmatpush1.bf16.msra.mxu1 %v4953_v13  ;;  %v4973_v13 = vpack.c.bf16 %v900_v4, %v896_v3  ;;  %v936_v3 = vld [vmem:[#allocation8 + $0xb80] sm:$0xff] }
 0x282   :  { %5210 = vmatpush1.bf16.msra.mxu0 %v5209_v14  ;;  %4956 = vmatprep.subr.bf16.mxu1 %v4955_v11  ;;  %v5229_v14 = vpack.c.bf16 %v902_v7, %v898_v5  ;;  %v4975_v11 = vpack.c.bf16 %v909_v9, %v905_v8  ;;  %v940_v4 = vld [vmem:[#allocation8 + $0xba0] sm:$0xff]  ;;  %v938_v5 = vld [vmem:[#allocation8 + $0xb90] sm:$0xff]  ;;  %v945_v8 = vld [vmem:[#allocation8 + $0xbc8] sm:$0xff] }
 0x283   :  { %5212 = vmatprep.subr.bf16.mxu0 %v5211_v18  ;;  %v5231_v18 = vpack.c.bf16 %v911_v12, %v907_v10  ;;  %v942_v7 = vld [vmem:[#allocation8 + $0xbb0] sm:$0xff]  ;;  %v949_v9 = vld [vmem:[#allocation8 + $0xbe8] sm:$0xff]  ;;  %v947_v10 = vld [vmem:[#allocation8 + $0xbd8] sm:$0xff] }
 0x284   :  { %v951_v12 = vld [vmem:[#allocation8 + $0xbf8] sm:$0xff] }
 0x285   :  { %4958 = vmatpush1.bf16.msra.mxu1 %v4957_v24  ;;  %v4977_v24 = vpack.c.bf16 %v908_v16, %v904_v15  ;;  %v944_v15 = vld [vmem:[#allocation8 + $0xbc0] sm:$0xff] }
 0x286   :  { %5214 = vmatpush1.bf16.msra.mxu0 %v5213_v25  ;;  %4960 = vmatprep.subr.bf16.mxu1 %v4959_v26  ;;  %v5233_v25 = vpack.c.bf16 %v910_v19, %v906_v17  ;;  %v4979_v26 = vpack.c.bf16 %v917_v21, %v913_v20  ;;  %v948_v16 = vld [vmem:[#allocation8 + $0xbe0] sm:$0xff]  ;;  %v946_v17 = vld [vmem:[#allocation8 + $0xbd0] sm:$0xff]  ;;  %v953_v20 = vld [vmem:[#allocation8 + $0xc08] sm:$0xff] }
 0x287   :  { %5216 = vmatprep.subr.bf16.mxu0 %v5215_v30  ;;  %v5235_v30 = vpack.c.bf16 %v919_v23, %v915_v22  ;;  %v950_v19 = vld [vmem:[#allocation8 + $0xbf0] sm:$0xff]  ;;  %v957_v21 = vld [vmem:[#allocation8 + $0xc28] sm:$0xff]  ;;  %v955_v22 = vld [vmem:[#allocation8 + $0xc18] sm:$0xff] }
 0x288   :  { %v959_v23 = vld [vmem:[#allocation8 + $0xc38] sm:$0xff] }
 0x289   :  { %4962 = vmatpush1.bf16.msra.mxu1 %v4961_v48  ;;  %v4981_v48 = vpack.c.bf16 %v916_v28, %v912_v27  ;;  %v4999_v27 = vpack.c.bf16 %v957_v21, %v953_v20  ;;  %v952_v28 = vld [vmem:[#allocation8 + $0xc00] sm:$0xff]  ;;  %v990_v21 = vld [vmem:[#allocation8 + $0xd30] sm:$0xff] }
 0x28a   :  { %5218 = vmatpush1.bf16.msra.mxu0 %v5217_v36  ;;  %4964 = vmatprep.subr.bf16.mxu1 %v4963_v37  ;;  %v5237_v36 = vpack.c.bf16 %v918_v31, %v914_v29  ;;  %v4983_v37 = vpack.c.bf16 %v925_v33, %v921_v32  ;;  %v956_v29 = vld [vmem:[#allocation8 + $0xc20] sm:$0xff]  ;;  %v954_v31 = vld [vmem:[#allocation8 + $0xc10] sm:$0xff]  ;;  %v559_v33 = vmul.f32 0.01, %v6691_v45 }
 0x28b   :  { %5220 = vmatprep.subr.bf16.mxu0 %v5219_v44  ;;  %v5239_v44 = vpack.c.bf16 %v927_v35, %v923_v34  ;;  %v958_v32 = vld [vmem:[#allocation8 + $0xc30] sm:$0xff]  ;;  %v961_v34 = vld [vmem:[#allocation8 + $0xc48] sm:$0xff] }
 0x28c   :  { %v965_v35 = vld [vmem:[#allocation8 + $0xc68] sm:$0xff] }
 0x28d   :  { %4966 = vmatpush1.bf16.msra.mxu1 %v4965_v51  ;;  %v4985_v51 = vpack.c.bf16 %v924_v41, %v920_v40  ;;  %v5257_v41 = vpack.c.bf16 %v958_v32, %v954_v31  ;;  %v994_v31 = vld [vmem:[#allocation8 + $0xd50] sm:$0xff] }
 0x28e   :  { %5222 = vmatpush1.bf16.msra.mxu0 %v5221_v52  ;;  %4968 = vmatprep.subr.bf16.mxu1 %v4967_v53  ;;  %v5241_v52 = vpack.c.bf16 %v926_v43, %v922_v42  ;;  %v4987_v53 = vpack.c.bf16 %v933_v47, %v929_v46  ;;  %v960_v42 = vld [vmem:[#allocation8 + $0xc40] sm:$0xff]  ;;  %v962_v43 = vld [vmem:[#allocation8 + $0xc50] sm:$0xff]  ;;  %v5003_v46 = vpack.c.bf16 %v965_v35, %v961_v34  ;;  %v1001_v34 = vld [vmem:[#allocation8 + $0xd88] sm:$0xff] }
 0x28f   :  { %5224 = vmatprep.subr.bf16.mxu0 %v5223_v57  ;;  %v5243_v57 = vpack.c.bf16 %v935_v50, %v931_v49  ;;  %v966_v47 = vld [vmem:[#allocation8 + $0xc70] sm:$0xff]  ;;  %v969_v49 = vld [vmem:[#allocation8 + $0xc88] sm:$0xff] }
 0x290   :  { %v973_v50 = vld [vmem:[#allocation8 + $0xca8] sm:$0xff] }
 0x291   :  { %4970 = vmatpush1.bf16.msra.mxu1 %v4969_v63  ;;  %v4989_v63 = vpack.c.bf16 %v932_v55, %v928_v54  ;;  %v975_v54 = vld [vmem:[#allocation8 + $0xcb8] sm:$0xff]  ;;  %v5261_v55 = vpack.c.bf16 %v966_v47, %v962_v43  ;;  %v1005_v35 = vld [vmem:[#allocation8 + $0xda8] sm:$0xff]  ;;  %v1002_v43 = vld [vmem:[#allocation8 + $0xd90] sm:$0xff] }
 0x292   :  { %5226 = vmatpush1.bf16.msra.mxu0 %v5225_v1  ;;  %4972 = vmatprep.subr.bf16.mxu1 %v4971_v2  ;;  %v5245_v1 = vpack.c.bf16 %v934_v58, %v930_v56  ;;  %v4991_v2 = vpack.c.bf16 %v941_v60, %v937_v59  ;;  %v5007_v56 = vpack.c.bf16 %v973_v50, %v969_v49  ;;  %v972_v58 = vld [vmem:[#allocation8 + $0xca0] sm:$0xff]  ;;  %v970_v59 = vld [vmem:[#allocation8 + $0xc90] sm:$0xff]  ;;  %v1009_v49 = vld [vmem:[#allocation8 + $0xdc8] sm:$0xff] }
 0x293   :  { %5228 = vmatprep.subr.bf16.mxu0 %v5227_v6  ;;  %v5247_v6 = vpack.c.bf16 %v943_v62, %v939_v61  ;;  %v974_v61 = vld [vmem:[#allocation8 + $0xcb0] sm:$0xff]  ;;  %v977_v62 = vld [vmem:[#allocation8 + $0xcc8] sm:$0xff] }
 0x294   :  { %v1006_v47 = vld [vmem:[#allocation8 + $0xdb0] sm:$0xff]  ;;  %v1013_v50 = vld [vmem:[#allocation8 + $0xde8] sm:$0xff] }
 0x295   :  { %4974 = vmatpush1.bf16.msra.mxu1 %v4973_v13  ;;  %v4993_v13 = vpack.c.bf16 %v940_v4, %v936_v3  ;;  %v5265_v3 = vpack.c.bf16 %v974_v61, %v970_v59  ;;  %v1014_v59 = vld [vmem:[#allocation8 + $0xdf0] sm:$0xff]  ;;  %v1021_v61 = vld [vmem:[#allocation8 + $0xe28] sm:$0xff] }
 0x296   :  { %5230 = vmatpush1.bf16.msra.mxu0 %v5229_v14  ;;  %4976 = vmatprep.subr.bf16.mxu1 %v4975_v11  ;;  %v5249_v14 = vpack.c.bf16 %v942_v7, %v938_v5  ;;  %v4995_v11 = vpack.c.bf16 %v949_v9, %v945_v8  ;;  %v976_v5 = vld [vmem:[#allocation8 + $0xcc0] sm:$0xff]  ;;  %v978_v7 = vld [vmem:[#allocation8 + $0xcd0] sm:$0xff] }
 0x297   :  { %5232 = vmatprep.subr.bf16.mxu0 %v5231_v18  ;;  %v5251_v18 = vpack.c.bf16 %v951_v12, %v947_v10  ;;  %v982_v9 = vld [vmem:[#allocation8 + $0xcf0] sm:$0xff]  ;;  %v985_v10 = vld [vmem:[#allocation8 + $0xd08] sm:$0xff] }
 0x298   :  { %v989_v12 = vld [vmem:[#allocation8 + $0xd28] sm:$0xff] }
 0x299   :  { %4978 = vmatpush1.bf16.msra.mxu1 %v4977_v24  ;;  %v4997_v24 = vpack.c.bf16 %v948_v16, %v944_v15  ;;  %v5269_v15 = vpack.c.bf16 %v982_v9, %v978_v7  ;;  %v5015_v16 = vpack.c.bf16 %v989_v12, %v985_v10  ;;  %v1022_v7 = vld [vmem:[#allocation8 + $0xe30] sm:$0xff]  ;;  %v1029_v9 = vld [vmem:[#allocation8 + $0xe68] sm:$0xff]  ;;  %v1027_v10 = vld [vmem:[#allocation8 + $0xe58] sm:$0xff] }
 0x29a   :  { %5234 = vmatpush1.bf16.msra.mxu0 %v5233_v25  ;;  %4980 = vmatprep.subr.bf16.mxu1 %v4979_v26  ;;  %v556_v25 = vmul.f32 0.01, %v6685_v38  ;;  %v5253_v26 = vpack.c.bf16 %v950_v19, %v946_v17  ;;  %v984_v17 = vld [vmem:[#allocation8 + $0xd00] sm:$0xff]  ;;  %v986_v19 = vld [vmem:[#allocation8 + $0xd10] sm:$0xff]  ;;  %v1031_v12 = vld [vmem:[#allocation8 + $0xe78] sm:$0xff] }
 0x29b   :  { %5236 = vmatprep.subr.bf16.mxu0 %v5235_v30  ;;  %v5255_v30 = vpack.c.bf16 %v959_v23, %v955_v22  ;;  %v993_v22 = vld [vmem:[#allocation8 + $0xd48] sm:$0xff] }
 0x29c   :  { %v564_v40 = vmax.f32 %v6685_v38, %v556_v25  ;;  %v997_v23 = vld [vmem:[#allocation8 + $0xd68] sm:$0xff]  ;;  %v999_v25 = vld [vmem:[#allocation8 + $0xd78] sm:$0xff] }
 0x29d   :  { %4982 = vmatpush1.bf16.msra.mxu1 %v4981_v48  ;;  %v5001_v48 = vpack.c.bf16 %v956_v29, %v952_v28  ;;  %v5019_v28 = vpack.c.bf16 %v997_v23, %v993_v22  ;;  %v992_v29 = vld [vmem:[#allocation8 + $0xd40] sm:$0xff]  ;;  %v1035_v22 = vld [vmem:[#allocation8 + $0xe98] sm:$0xff] }
 0x29e   :  { %5238 = vmatpush1.bf16.msra.mxu0 %v5237_v36  ;;  %4984 = vmatprep.subr.bf16.mxu1 %v4983_v37  ;;  %v963_v36 = vld [vmem:[#allocation8 + $0xc58] sm:$0xff] }
 0x29f   :  { %5240 = vmatprep.subr.bf16.mxu0 %v5239_v44  ;;  %v967_v37 = vld [vmem:[#allocation8 + $0xc78] sm:$0xff]  ;;  %v964_v44 = vld [vmem:[#allocation8 + $0xc60] sm:$0xff] }
 0x2a0   :  { %v5005_v38 = vpack.c.bf16 %v964_v44, %v960_v42  ;;  %v1000_v42 = vld [vmem:[#allocation8 + $0xd80] sm:$0xff]  ;;  %v1039_v23 = vld [vmem:[#allocation8 + $0xeb8] sm:$0xff] }
 0x2a1   :  { %4986 = vmatpush1.bf16.msra.mxu1 %v4985_v51  ;;  %v567_v51 = vmax.f32 %v6691_v45, %v559_v33  ;;  %v981_v45 = vld [vmem:[#allocation8 + $0xce8] sm:$0xff]  ;;  %v998_v33 = vld [vmem:[#allocation8 + $0xd70] sm:$0xff]  ;;  %v1004_v44 = vld [vmem:[#allocation8 + $0xda0] sm:$0xff] }
 0x2a2   :  { %5242 = vmatpush1.bf16.msra.mxu0 %v5241_v52  ;;  %4988 = vmatprep.subr.bf16.mxu1 %v4987_v53  ;;  %v5259_v52 = vpack.c.bf16 %v967_v37, %v963_v36  ;;  %v971_v53 = vld [vmem:[#allocation8 + $0xc98] sm:$0xff]  ;;  %v5011_v4 = vpack.c.bf16 %v981_v45, %v977_v62 }
 0x2a3   :  { %5244 = vmatprep.subr.bf16.mxu0 %v5243_v57  ;;  %v968_v57 = vld [vmem:[#allocation8 + $0xc80] sm:$0xff]  ;;  %v5263_v60 = vpack.c.bf16 %v975_v54, %v971_v53  ;;  %v1007_v36 = vld [vmem:[#allocation8 + $0xdb8] sm:$0xff]  ;;  %v5025_v53 = vpack.c.bf16 %v1004_v44, %v1000_v42  ;;  %v5281_v54 = vpack.c.bf16 %v1006_v47, %v1002_v43  ;;  %v1042_v42 = vld [vmem:[#allocation8 + $0xed0] sm:$0xff] }
 0x2a4   :  { %v1019_v62 = vld [vmem:[#allocation8 + $0xe18] sm:$0xff]  ;;  %v1046_v43 = vld [vmem:[#allocation8 + $0xef0] sm:$0xff]  ;;  %v1053_v47 = vld [vmem:[#allocation8 + $0xf28] sm:$0xff] }
 0x2a5   :  { %4990 = vmatpush1.bf16.msra.mxu1 %v4989_v63  ;;  %v979_v63 = vld [vmem:[#allocation8 + $0xcd8] sm:$0xff] }
 0x2a6   :  { %5246 = vmatpush1.bf16.msra.mxu0 %v5245_v1  ;;  %4992 = vmatprep.subr.bf16.mxu1 %v4991_v2  ;;  %v983_v1 = vld [vmem:[#allocation8 + $0xcf8] sm:$0xff]  ;;  %v5009_v2 = vpack.c.bf16 %v972_v58, %v968_v57  ;;  %v1010_v57 = vld [vmem:[#allocation8 + $0xdd0] sm:$0xff] }
 0x2a7   :  { %5248 = vmatprep.subr.bf16.mxu0 %v5247_v6  ;;  %v980_v6 = vld [vmem:[#allocation8 + $0xce0] sm:$0xff]  ;;  %v5267_v8 = vpack.c.bf16 %v983_v1, %v979_v63  ;;  %v1023_v45 = vld [vmem:[#allocation8 + $0xe38] sm:$0xff]  ;;  %v5285_v1 = vpack.c.bf16 %v1014_v59, %v1010_v57  ;;  %v1054_v57 = vld [vmem:[#allocation8 + $0xf30] sm:$0xff] }
 0x2a8   :  { %v1061_v59 = vld [vmem:[#allocation8 + $0xf68] sm:$0xff] }
 0x2a9   :  { %4994 = vmatpush1.bf16.msra.mxu1 %v4993_v13  ;;  %v987_v13 = vld [vmem:[#allocation8 + $0xd18] sm:$0xff] }
 0x2aa   :  { %5250 = vmatpush1.bf16.msra.mxu0 %v5249_v14  ;;  %4996 = vmatprep.subr.bf16.mxu1 %v4995_v11  ;;  %v991_v14 = vld [vmem:[#allocation8 + $0xd38] sm:$0xff]  ;;  %v5013_v11 = vpack.c.bf16 %v980_v6, %v976_v5  ;;  %v1018_v5 = vld [vmem:[#allocation8 + $0xe10] sm:$0xff]  ;;  %v5287_v6 = vpack.c.bf16 %v1023_v45, %v1019_v62 }
 0x2ab   :  { %5252 = vmatprep.subr.bf16.mxu0 %v5251_v18  ;;  %v988_v18 = vld [vmem:[#allocation8 + $0xd20] sm:$0xff]  ;;  %v5271_v20 = vpack.c.bf16 %v991_v14, %v987_v13  ;;  %v5289_v14 = vpack.c.bf16 %v1022_v7, %v1018_v5  ;;  %v1062_v5 = vld [vmem:[#allocation8 + $0xf70] sm:$0xff]  ;;  %v1069_v7 = vld [vmem:[#allocation8 + $0xfa8] sm:$0xff] }
 0x2ad   :  { %4998 = vmatpush1.bf16.msra.mxu1 %v4997_v24  ;;  %v995_v24 = vld [vmem:[#allocation8 + $0xd58] sm:$0xff] }
 0x2ae   :  { %5254 = vmatpush1.bf16.msra.mxu0 %v5253_v26  ;;  %5000 = vmatprep.subr.bf16.mxu1 %v4999_v27  ;;  %v5017_v26 = vpack.c.bf16 %v988_v18, %v984_v17  ;;  %v5273_v27 = vpack.c.bf16 %v990_v21, %v986_v19  ;;  %v5275_v32 = vpack.c.bf16 %v999_v25, %v995_v24  ;;  %v1026_v17 = vld [vmem:[#allocation8 + $0xe50] sm:$0xff]  ;;  %v1037_v21 = vld [vmem:[#allocation8 + $0xea8] sm:$0xff] }
 0x2af   :  { %5256 = vmatprep.subr.bf16.mxu0 %v5255_v30  ;;  %v996_v30 = vld [vmem:[#allocation8 + $0xd60] sm:$0xff]  ;;  %v5291_v18 = vpack.c.bf16 %v1031_v12, %v1027_v10  ;;  %v1030_v19 = vld [vmem:[#allocation8 + $0xe70] sm:$0xff] }
 0x2b0   :  { %1287 = vmatmul.mubr.f32.vlgmr.msra.gmra.mrb[4].mxu1 %v564_v40  ;;  %v5021_v37 = vpack.c.bf16 %v996_v30, %v992_v29  ;;  %v5293_v25 = vpack.c.bf16 %v1030_v19, %v1026_v17  ;;  %v1034_v29 = vld [vmem:[#allocation8 + $0xe90] sm:$0xff]  ;;  %v5295_v30 = vpack.c.bf16 %v1039_v23, %v1035_v22  ;;  %v1077_v19 = vld [vmem:[#allocation8 + $0xfe8] sm:$0xff] }
 0x2b1   :  { %1571 = vmatmul.mubr.f32.vlgmr.msra.gmra.mrb[6].mxu0 %v564_v40  ;;  %5002 = vmatpush1.bf16.msra.mxu1 %v5001_v48  ;;  %v1003_v48 = vld [vmem:[#allocation8 + $0xd98] sm:$0xff]  ;;  %v5277_v40 = vpack.c.bf16 %v998_v33, %v994_v31  ;;  %v1038_v31 = vld [vmem:[#allocation8 + $0xeb0] sm:$0xff]  ;;  %v1045_v33 = vld [vmem:[#allocation8 + $0xee8] sm:$0xff] }
 0x2b2   :  { %1357 = vmatprep.mubr.f32.mxu1 %v567_v51  ;;  %5258 = vmatpush1.bf16.msra.mxu0 %v5257_v41  ;;  %v5023_v41 = vpack.c.bf16 %v1005_v35, %v1001_v34  ;;  %v1043_v34 = vld [vmem:[#allocation8 + $0xed8] sm:$0xff]  ;;  %v1070_v17 = vld [vmem:[#allocation8 + $0xfb0] sm:$0xff] }
 0x2b3   :  { %1641 = vmatprep.mubr.f32.mxu0 %v567_v51  ;;  %5004 = vmatprep.subr.bf16.mxu1 %v5003_v46  ;;  %v5279_v46 = vpack.c.bf16 %v1007_v36, %v1003_v48  ;;  %v1011_v51 = vld [vmem:[#allocation8 + $0xdd8] sm:$0xff]  ;;  %v5297_v36 = vpack.c.bf16 %v1038_v31, %v1034_v29  ;;  %v1078_v29 = vld [vmem:[#allocation8 + $0xff0] sm:$0xff]  ;;  %v558_v31 = vmul.f32 0.01, %v6687_v39 }
 0x2b4   :  { %5260 = vmatprep.subr.bf16.mxu0 %v5259_v52  ;;  %v1015_v52 = vld [vmem:[#allocation8 + $0xdf8] sm:$0xff] }
 0x2b5   :  { %5006 = vmatpush1.bf16.msra.mxu1 %v5005_v38  ;;  %v5027_v38 = vpack.c.bf16 %v1013_v50, %v1009_v49  ;;  %v5283_v58 = vpack.c.bf16 %v1015_v52, %v1011_v51  ;;  %v1047_v35 = vld [vmem:[#allocation8 + $0xef8] sm:$0xff]  ;;  %v5301_v52 = vpack.c.bf16 %v1046_v43, %v1042_v42 }
 0x2b6   :  { %5262 = vmatpush1.bf16.msra.mxu0 %v5261_v55  ;;  %5008 = vmatprep.subr.bf16.mxu1 %v5007_v56  ;;  %v1008_v55 = vld [vmem:[#allocation8 + $0xdc0] sm:$0xff]  ;;  %v5299_v44 = vpack.c.bf16 %v1047_v35, %v1043_v34  ;;  %v1051_v49 = vld [vmem:[#allocation8 + $0xf18] sm:$0xff]  ;;  %v1799_v34 = vld [vmem:[#allocation10 + $0x8] sm:$0xff] }
 0x2b7   :  { %5264 = vmatprep.subr.bf16.mxu0 %v5263_v60  ;;  %v1012_v56 = vld [vmem:[#allocation8 + $0xde0] sm:$0xff]  ;;  %v1017_v60 = vld [vmem:[#allocation8 + $0xe08] sm:$0xff]  ;;  %v1055_v50 = vld [vmem:[#allocation8 + $0xf38] sm:$0xff] }
 0x2b8   :  { %v5029_v63 = vpack.c.bf16 %v1012_v56, %v1008_v55  ;;  %v1050_v55 = vld [vmem:[#allocation8 + $0xf10] sm:$0xff]  ;;  %v5303_v56 = vpack.c.bf16 %v1055_v50, %v1051_v49  ;;  %v1801_v35 = vld [vmem:[#allocation10 + $0x18] sm:$0xff]  ;;  %v1802_v49 = vld [vmem:[#allocation10 + $0x20] sm:$0xff] }
 0x2b9   :  { %5010 = vmatpush1.bf16.msra.mxu1 %v5009_v2  ;;  %v5031_v2 = vpack.c.bf16 %v1021_v61, %v1017_v60  ;;  %v1059_v60 = vld [vmem:[#allocation8 + $0xf58] sm:$0xff]  ;;  %v5305_v45 = vpack.c.bf16 %v1054_v57, %v1050_v55  ;;  %v5319_v43 = vpack.c.bf16 %v1801_v35, %v1799_v34  ;;  %v1804_v50 = vld [vmem:[#allocation10 + $0x30] sm:$0xff]  ;;  %v1806_v55 = vld [vmem:[#allocation10 + $0x40] sm:$0xff] }
 0x2ba   :  { %5266 = vmatpush1.bf16.msra.mxu0 %v5265_v3  ;;  %5012 = vmatprep.subr.bf16.mxu1 %v5011_v4  ;;  %v1016_v3 = vld [vmem:[#allocation8 + $0xe00] sm:$0xff]  ;;  %v1063_v61 = vld [vmem:[#allocation8 + $0xf78] sm:$0xff]  ;;  %v1811_v57 = vld [vmem:[#allocation10 + $0x68] sm:$0xff] }
 0x2bb   :  { %5268 = vmatprep.subr.bf16.mxu0 %v5267_v8  ;;  %v1020_v4 = vld [vmem:[#allocation8 + $0xe20] sm:$0xff]  ;;  %v1025_v8 = vld [vmem:[#allocation8 + $0xe48] sm:$0xff]  ;;  %v1836_v34 = vld [vmem:[#allocation10 + $0x130] sm:$0xff] }
 0x2bc   :  { %v5033_v13 = vpack.c.bf16 %v1020_v4, %v1016_v3  ;;  %v1058_v3 = vld [vmem:[#allocation8 + $0xf50] sm:$0xff]  ;;  %v5307_v4 = vpack.c.bf16 %v1063_v61, %v1059_v60  ;;  %v1810_v61 = vld [vmem:[#allocation10 + $0x60] sm:$0xff]  ;;  %v1839_v35 = vld [vmem:[#allocation10 + $0x148] sm:$0xff] }
 0x2bd   :  { %5014 = vmatpush1.bf16.msra.mxu1 %v5013_v11  ;;  %v5035_v11 = vpack.c.bf16 %v1029_v9, %v1025_v8  ;;  %v1067_v8 = vld [vmem:[#allocation8 + $0xf98] sm:$0xff]  ;;  %v5309_v12 = vpack.c.bf16 %v1062_v5, %v1058_v3  ;;  %v1814_v3 = vld [vmem:[#allocation10 + $0x80] sm:$0xff]  ;;  %v1819_v5 = vld [vmem:[#allocation10 + $0xa8] sm:$0xff] }
 0x2be   :  { %5270 = vmatpush1.bf16.msra.mxu0 %v5269_v15  ;;  %5016 = vmatprep.subr.bf16.mxu1 %v5015_v16  ;;  %v1024_v15 = vld [vmem:[#allocation8 + $0xe40] sm:$0xff]  ;;  %v1071_v9 = vld [vmem:[#allocation8 + $0xfb8] sm:$0xff] }
 0x2bf   :  { %5272 = vmatprep.subr.bf16.mxu0 %v5271_v20  ;;  %v1028_v16 = vld [vmem:[#allocation8 + $0xe60] sm:$0xff]  ;;  %v1033_v20 = vld [vmem:[#allocation8 + $0xe88] sm:$0xff] }
 0x2c0   :  { %v5037_v24 = vpack.c.bf16 %v1028_v16, %v1024_v15  ;;  %v1066_v15 = vld [vmem:[#allocation8 + $0xf90] sm:$0xff]  ;;  %v5311_v16 = vpack.c.bf16 %v1071_v9, %v1067_v8  ;;  %v1818_v9 = vld [vmem:[#allocation10 + $0xa0] sm:$0xff] }
 0x2c1   :  { %5018 = vmatpush1.bf16.msra.mxu1 %v5017_v26  ;;  %v5039_v26 = vpack.c.bf16 %v1037_v21, %v1033_v20  ;;  %v1075_v20 = vld [vmem:[#allocation8 + $0xfd8] sm:$0xff]  ;;  %v5313_v23 = vpack.c.bf16 %v1070_v17, %v1066_v15  ;;  %v1822_v15 = vld [vmem:[#allocation10 + $0xc0] sm:$0xff]  ;;  %v1827_v17 = vld [vmem:[#allocation10 + $0xe8] sm:$0xff] }
 0x2c2   :  { %5274 = vmatpush1.bf16.msra.mxu0 %v5273_v27  ;;  %5020 = vmatprep.subr.bf16.mxu1 %v5019_v28  ;;  %v1032_v27 = vld [vmem:[#allocation8 + $0xe80] sm:$0xff]  ;;  %v1079_v21 = vld [vmem:[#allocation8 + $0xff8] sm:$0xff] }
 0x2c3   :  { %5276 = vmatprep.subr.bf16.mxu0 %v5275_v32  ;;  %v1036_v28 = vld [vmem:[#allocation8 + $0xea0] sm:$0xff]  ;;  %v1041_v32 = vld [vmem:[#allocation8 + $0xec8] sm:$0xff] }
 0x2c4   :  { %v5041_v48 = vpack.c.bf16 %v1036_v28, %v1032_v27  ;;  %v5315_v27 = vpack.c.bf16 %v1079_v21, %v1075_v20  ;;  %v1074_v28 = vld [vmem:[#allocation8 + $0xfd0] sm:$0xff]  ;;  %v1826_v21 = vld [vmem:[#allocation10 + $0xe0] sm:$0xff] }
 0x2c5   :  { %5022 = vmatpush1.bf16.msra.mxu1 %v5021_v37  ;;  %v5043_v37 = vpack.c.bf16 %v1045_v33, %v1041_v32  ;;  %v5317_v32 = vpack.c.bf16 %v1078_v29, %v1074_v28  ;;  %v566_v33 = vmax.f32 %v6687_v39, %v558_v31  ;;  %v1832_v28 = vld [vmem:[#allocation10 + $0x110] sm:$0xff]  ;;  %v1835_v29 = vld [vmem:[#allocation10 + $0x128] sm:$0xff] }
 0x2c6   :  { %5278 = vmatpush1.bf16.msra.mxu0 %v5277_v40  ;;  %5024 = vmatprep.subr.bf16.mxu1 %v5023_v41  ;;  %v1040_v40 = vld [vmem:[#allocation8 + $0xec0] sm:$0xff] }
 0x2c7   :  { %5280 = vmatprep.subr.bf16.mxu0 %v5279_v46  ;;  %v1044_v41 = vld [vmem:[#allocation8 + $0xee0] sm:$0xff]  ;;  %v1049_v46 = vld [vmem:[#allocation8 + $0xf08] sm:$0xff] }
 0x2c8   :  { %v5045_v51 = vpack.c.bf16 %v1044_v41, %v1040_v40  ;;  %v1803_v40 = vld [vmem:[#allocation10 + $0x28] sm:$0xff]  ;;  %v1805_v41 = vld [vmem:[#allocation10 + $0x38] sm:$0xff] }
 0x2c9   :  { %5026 = vmatpush1.bf16.msra.mxu1 %v5025_v53  ;;  %v5047_v53 = vpack.c.bf16 %v1053_v47, %v1049_v46  ;;  %v5323_v47 = vpack.c.bf16 %v1805_v41, %v1803_v40  ;;  %v1838_v40 = vld [vmem:[#allocation10 + $0x140] sm:$0xff]  ;;  %v1840_v41 = vld [vmem:[#allocation10 + $0x150] sm:$0xff] }
 0x2ca   :  { %5282 = vmatpush1.bf16.msra.mxu0 %v5281_v54  ;;  %5028 = vmatprep.subr.bf16.mxu1 %v5027_v38  ;;  %v1048_v54 = vld [vmem:[#allocation8 + $0xf00] sm:$0xff] }
 0x2cb   :  { %5284 = vmatprep.subr.bf16.mxu0 %v5283_v58  ;;  %v1052_v38 = vld [vmem:[#allocation8 + $0xf20] sm:$0xff]  ;;  %v1057_v58 = vld [vmem:[#allocation8 + $0xf48] sm:$0xff] }
 0x2cc   :  { %v5049_v62 = vpack.c.bf16 %v1052_v38, %v1048_v54  ;;  %v5325_v54 = vpack.c.bf16 %v1804_v50, %v1802_v49  ;;  %v1847_v49 = vld [vmem:[#allocation10 + $0x188] sm:$0xff]  ;;  %v1849_v50 = vld [vmem:[#allocation10 + $0x198] sm:$0xff] }
 0x2cd   :  { %5030 = vmatpush1.bf16.msra.mxu1 %v5029_v63  ;;  %v5051_v63 = vpack.c.bf16 %v1061_v59, %v1057_v58  ;;  %v1813_v58 = vld [vmem:[#allocation10 + $0x78] sm:$0xff] }
 0x2ce   :  { %5286 = vmatpush1.bf16.msra.mxu0 %v5285_v1  ;;  %5032 = vmatprep.subr.bf16.mxu1 %v5031_v2  ;;  %v1056_v1 = vld [vmem:[#allocation8 + $0xf40] sm:$0xff]  ;;  %v5331_v60 = vpack.c.bf16 %v1813_v58, %v1811_v57 }
 0x2cf   :  { %5288 = vmatprep.subr.bf16.mxu0 %v5287_v6  ;;  %v1060_v2 = vld [vmem:[#allocation8 + $0xf60] sm:$0xff]  ;;  %v1065_v6 = vld [vmem:[#allocation8 + $0xf88] sm:$0xff] }
 0x2d0   :  { %v5053_v10 = vpack.c.bf16 %v1060_v2, %v1056_v1 }
 0x2d1   :  { %5034 = vmatpush1.bf16.msra.mxu1 %v5033_v13  ;;  %v5055_v13 = vpack.c.bf16 %v1069_v7, %v1065_v6  ;;  %v1821_v6 = vld [vmem:[#allocation10 + $0xb8] sm:$0xff] }
 0x2d2   :  { %5290 = vmatpush1.bf16.msra.mxu0 %v5289_v14  ;;  %5036 = vmatprep.subr.bf16.mxu1 %v5035_v11  ;;  %v1064_v14 = vld [vmem:[#allocation8 + $0xf80] sm:$0xff]  ;;  %v5339_v8 = vpack.c.bf16 %v1821_v6, %v1819_v5  ;;  %v1861_v5 = vld [vmem:[#allocation10 + $0x1f8] sm:$0xff] }
 0x2d3   :  { %5292 = vmatprep.subr.bf16.mxu0 %v5291_v18  ;;  %v1068_v11 = vld [vmem:[#allocation8 + $0xfa0] sm:$0xff]  ;;  %v1073_v18 = vld [vmem:[#allocation8 + $0xfc8] sm:$0xff] }
 0x2d4   :  { %v5057_v22 = vpack.c.bf16 %v1068_v11, %v1064_v14 }
 0x2d5   :  { %5038 = vmatpush1.bf16.msra.mxu1 %v5037_v24  ;;  %v5059_v24 = vpack.c.bf16 %v1077_v19, %v1073_v18  ;;  %v1829_v18 = vld [vmem:[#allocation10 + $0xf8] sm:$0xff] }
 0x2d6   :  { %5294 = vmatpush1.bf16.msra.mxu0 %v5293_v25  ;;  %5040 = vmatprep.subr.bf16.mxu1 %v5039_v26  ;;  %v1072_v25 = vld [vmem:[#allocation8 + $0xfc0] sm:$0xff]  ;;  %v5347_v20 = vpack.c.bf16 %v1829_v18, %v1827_v17  ;;  %v1864_v17 = vld [vmem:[#allocation10 + $0x210] sm:$0xff] }
 0x2d7   :  { %5296 = vmatprep.subr.bf16.mxu0 %v5295_v30  ;;  %v1076_v26 = vld [vmem:[#allocation8 + $0xfe0] sm:$0xff] }
 0x2d8   :  { %v5061_v30 = vpack.c.bf16 %v1076_v26, %v1072_v25 }
 0x2d9   :  { %5042 = vmatpush1.bf16.msra.mxu1 %v5041_v48  ;;  %v1798_v48 = vld [vmem:[#allocation10] sm:$0xff] }
 0x2da   :  { %5298 = vmatpush1.bf16.msra.mxu0 %v5297_v36  ;;  %5044 = vmatprep.subr.bf16.mxu1 %v5043_v37  ;;  %v1800_v36 = vld [vmem:[#allocation10 + $0x10] sm:$0xff] }
 0x2db   :  { %5300 = vmatprep.subr.bf16.mxu0 %v5299_v44  ;;  %v5321_v39 = vpack.c.bf16 %v1800_v36, %v1798_v48  ;;  %v1841_v48 = vld [vmem:[#allocation10 + $0x158] sm:$0xff] }
 0x2dd   :  { %5046 = vmatpush1.bf16.msra.mxu1 %v5045_v51  ;;  %v6705_v51 = vld [vmem:[#allocation2] sm:$0xff] }
 0x2de   :  { %5302 = vmatpush1.bf16.msra.mxu0 %v5301_v52  ;;  %5048 = vmatprep.subr.bf16.mxu1 %v5047_v53  ;;  %v1807_v52 = vld [vmem:[#allocation10 + $0x48] sm:$0xff]  ;;  %v1809_v53 = vld [vmem:[#allocation10 + $0x58] sm:$0xff] }
 0x2df   :  { %5304 = vmatprep.subr.bf16.mxu0 %v5303_v56  ;;  %v5327_v38 = vpack.c.bf16 %v1809_v53, %v1807_v52  ;;  %v1808_v56 = vld [vmem:[#allocation10 + $0x50] sm:$0xff]  ;;  %v5367_v53 = vpack.c.bf16 %v1849_v50, %v1847_v49  ;;  %v1878_v49 = vld [vmem:[#allocation10 + $0x280] sm:$0xff] }
 0x2e0   :  { %v5329_v59 = vpack.c.bf16 %v1808_v56, %v1806_v55  ;;  %v1851_v55 = vld [vmem:[#allocation10 + $0x1a8] sm:$0xff]  ;;  %v1853_v56 = vld [vmem:[#allocation10 + $0x1b8] sm:$0xff]  ;;  %v1880_v50 = vld [vmem:[#allocation10 + $0x290] sm:$0xff] }
 0x2e1   :  { %5050 = vmatpush1.bf16.msra.mxu1 %v5049_v62  ;;  %v1812_v62 = vld [vmem:[#allocation10 + $0x70] sm:$0xff]  ;;  %v5371_v58 = vpack.c.bf16 %v1853_v56, %v1851_v55  ;;  %v1882_v55 = vld [vmem:[#allocation10 + $0x2a0] sm:$0xff] }
 0x2e2   :  { %5306 = vmatpush1.bf16.msra.mxu0 %v5305_v45  ;;  %5052 = vmatprep.subr.bf16.mxu1 %v5051_v63  ;;  %v1815_v45 = vld [vmem:[#allocation10 + $0x88] sm:$0xff]  ;;  %v1817_v63 = vld [vmem:[#allocation10 + $0x98] sm:$0xff]  ;;  %v5333_v1 = vpack.c.bf16 %v1812_v62, %v1810_v61  ;;  %v1884_v56 = vld [vmem:[#allocation10 + $0x2b0] sm:$0xff] }
 0x2e3   :  { %5308 = vmatprep.subr.bf16.mxu0 %v5307_v4  ;;  %v5335_v2 = vpack.c.bf16 %v1817_v63, %v1815_v45  ;;  %v1816_v4 = vld [vmem:[#allocation10 + $0x90] sm:$0xff]  ;;  %v1855_v61 = vld [vmem:[#allocation10 + $0x1c8] sm:$0xff]  ;;  %v1857_v62 = vld [vmem:[#allocation10 + $0x1d8] sm:$0xff] }
 0x2e4   :  { %v5337_v7 = vpack.c.bf16 %v1816_v4, %v1814_v3  ;;  %v5375_v63 = vpack.c.bf16 %v1857_v62, %v1855_v61  ;;  %v1859_v4 = vld [vmem:[#allocation10 + $0x1e8] sm:$0xff]  ;;  %v1886_v61 = vld [vmem:[#allocation10 + $0x2c0] sm:$0xff]  ;;  %v1888_v62 = vld [vmem:[#allocation10 + $0x2d0] sm:$0xff] }
 0x2e5   :  { %5054 = vmatpush1.bf16.msra.mxu1 %v5053_v10  ;;  %v1820_v10 = vld [vmem:[#allocation10 + $0xb0] sm:$0xff]  ;;  %v5379_v6 = vpack.c.bf16 %v1861_v5, %v1859_v4  ;;  %v1895_v5 = vld [vmem:[#allocation10 + $0x308] sm:$0xff] }
 0x2e6   :  { %5310 = vmatpush1.bf16.msra.mxu0 %v5309_v12  ;;  %5056 = vmatprep.subr.bf16.mxu1 %v5055_v13  ;;  %v1823_v12 = vld [vmem:[#allocation10 + $0xc8] sm:$0xff]  ;;  %v1825_v13 = vld [vmem:[#allocation10 + $0xd8] sm:$0xff]  ;;  %v5341_v14 = vpack.c.bf16 %v1820_v10, %v1818_v9  ;;  %v1892_v4 = vld [vmem:[#allocation10 + $0x2f0] sm:$0xff] }
 0x2e7   :  { %5312 = vmatprep.subr.bf16.mxu0 %v5311_v16  ;;  %v5343_v11 = vpack.c.bf16 %v1825_v13, %v1823_v12  ;;  %v1824_v16 = vld [vmem:[#allocation10 + $0xd0] sm:$0xff]  ;;  %v1863_v10 = vld [vmem:[#allocation10 + $0x208] sm:$0xff]  ;;  %v1865_v12 = vld [vmem:[#allocation10 + $0x218] sm:$0xff] }
 0x2e8   :  { %v5345_v19 = vpack.c.bf16 %v1824_v16, %v1822_v15  ;;  %v5383_v13 = vpack.c.bf16 %v1865_v12, %v1863_v10  ;;  %v1862_v16 = vld [vmem:[#allocation10 + $0x200] sm:$0xff]  ;;  %v1896_v10 = vld [vmem:[#allocation10 + $0x310] sm:$0xff]  ;;  %v1899_v12 = vld [vmem:[#allocation10 + $0x328] sm:$0xff] }
 0x2e9   :  { %5058 = vmatpush1.bf16.msra.mxu1 %v5057_v22  ;;  %v1828_v22 = vld [vmem:[#allocation10 + $0xf0] sm:$0xff] }
 0x2ea   :  { %5314 = vmatpush1.bf16.msra.mxu0 %v5313_v23  ;;  %5060 = vmatprep.subr.bf16.mxu1 %v5059_v24  ;;  %v1831_v23 = vld [vmem:[#allocation10 + $0x108] sm:$0xff]  ;;  %v1833_v24 = vld [vmem:[#allocation10 + $0x118] sm:$0xff]  ;;  %v5349_v25 = vpack.c.bf16 %v1828_v22, %v1826_v21 }
 0x2eb   :  { %5316 = vmatprep.subr.bf16.mxu0 %v5315_v27  ;;  %v5351_v26 = vpack.c.bf16 %v1833_v24, %v1831_v23  ;;  %v1830_v27 = vld [vmem:[#allocation10 + $0x100] sm:$0xff]  ;;  %v1869_v21 = vld [vmem:[#allocation10 + $0x238] sm:$0xff] }
 0x2ec   :  { %v5353_v31 = vpack.c.bf16 %v1832_v28, %v1830_v27  ;;  %v1866_v28 = vld [vmem:[#allocation10 + $0x220] sm:$0xff] }
 0x2ed   :  { %5062 = vmatpush1.bf16.msra.mxu1 %v5061_v30  ;;  %v1837_v30 = vld [vmem:[#allocation10 + $0x138] sm:$0xff] }
 0x2ee   :  { %5318 = vmatpush1.bf16.msra.mxu0 %v5317_v32  ;;  %v5355_v32 = vpack.c.bf16 %v1837_v30, %v1835_v29  ;;  %v1868_v29 = vld [vmem:[#allocation10 + $0x230] sm:$0xff] }
 0x2f0   :  { %1358 = vmatmul.mubr.f32.vlgmr.msra.gmra.mrb[4].mxu1 %v566_v33 }
 0x2f1   :  { %1642 = vmatmul.mubr.f32.vlgmr.msra.gmra.mrb[6].mxu0 %v566_v33  ;;  %1712 = vmatprep.mubr.f32.mxu1 %v6513_v0  ;;  %v1834_v33 = vld [vmem:[#allocation10 + $0x120] sm:$0xff] }
 0x2f2   :  { %1783 = vmatprep.mubr.f32.mxu0 %v6513_v0  ;;  %v5357_v36 = vpack.c.bf16 %v1836_v34, %v1834_v33  ;;  %v5389_v33 = vpack.c.bf16 %v1868_v29, %v1866_v28  ;;  %v1906_v28 = vld [vmem:[#allocation10 + $0x360] sm:$0xff]  ;;  %v1908_v29 = vld [vmem:[#allocation10 + $0x370] sm:$0xff] }
 0x3c3   :  { %v1359_v37 = vpop.f32.mrb[4].mxu1 }
 0x3c4   :  { %v1643_v42 = vpop.f32.mrb[6].mxu0  ;;  %v1361_v44 = vpop.f32.mrb[5].mxu1 }
 0x3c5   :  { %v1645_v46 = vpop.f32.mrb[7].mxu0  ;;  %1648 = vmatprep.subr.mxu1 %v1361_v44  ;;  %v1845_v44 = vld [vmem:[#allocation10 + $0x178] sm:$0xff] }
 0x3c6   :  { %1719 = vmatprep.subr.mxu0 %v1645_v46  ;;  %1649 = vmatpush1.msra.mxu1 %v1359_v37  ;;  %v5359_v37 = vpack.c.bf16 %v1841_v48, %v1839_v35  ;;  %v1870_v35 = vld [vmem:[#allocation10 + $0x240] sm:$0xff]  ;;  %v1872_v48 = vld [vmem:[#allocation10 + $0x250] sm:$0xff] }
 0x3c7   :  { %1720 = vmatpush1.msra.mxu0 %v1643_v42  ;;  %4582 = vmatmul.mubr.msk.f32.vlgmr.msra.gmra.mrb[6].mxu1 %vm190_vm1, %v6705_v51  ;;  %v1843_v42 = vld [vmem:[#allocation10 + $0x168] sm:$0xff] }
 0x3c8   :  { %4583 = vmatmul.mubr.msk.f32.vlgmr.msra.gmra.mrb[8].mxu0 %vm190_vm1, %v6705_v51  ;;  %5320 = vmatprep.subr.bf16.mxu1 %v5319_v43  ;;  %v5361_v43 = vpack.c.bf16 %v1840_v41, %v1838_v40  ;;  %v5363_v46 = vpack.c.bf16 %v1845_v44, %v1843_v42  ;;  %v5393_v40 = vpack.c.bf16 %v1872_v48, %v1870_v35  ;;  %v1874_v42 = vld [vmem:[#allocation10 + $0x260] sm:$0xff]  ;;  %v1876_v44 = vld [vmem:[#allocation10 + $0x270] sm:$0xff]  ;;  %v1915_v48 = vld [vmem:[#allocation10 + $0x3a8] sm:$0xff] }
 0x3c9   :  { %5322 = vmatpush1.bf16.msra.mxu1 %v5321_v39  ;;  %2132 = vmatprep.mubr.f32.mxu0 %v6513_v0  ;;  %v1842_v39 = vld [vmem:[#allocation10 + $0x160] sm:$0xff]  ;;  %v1912_v35 = vld [vmem:[#allocation10 + $0x390] sm:$0xff] }
 0x3ca   :  { %5324 = vmatprep.subr.bf16.mxu1 %v5323_v47  ;;  %v1844_v47 = vld [vmem:[#allocation10 + $0x170] sm:$0xff] }
 0x3cb   :  { %v5365_v52 = vpack.c.bf16 %v1844_v47, %v1842_v39  ;;  %v5397_v39 = vpack.c.bf16 %v1876_v44, %v1874_v42  ;;  %v1916_v42 = vld [vmem:[#allocation10 + $0x3b0] sm:$0xff]  ;;  %v1919_v44 = vld [vmem:[#allocation10 + $0x3c8] sm:$0xff] }
 0x3cd   :  { %5326 = vmatpush1.bf16.msra.mxu1 %v5325_v54  ;;  %v1846_v54 = vld [vmem:[#allocation10 + $0x180] sm:$0xff] }
 0x3ce   :  { %5328 = vmatprep.subr.bf16.mxu1 %v5327_v38  ;;  %v1848_v38 = vld [vmem:[#allocation10 + $0x190] sm:$0xff] }
 0x3cf   :  { %v5369_v57 = vpack.c.bf16 %v1848_v38, %v1846_v54  ;;  %v5401_v54 = vpack.c.bf16 %v1880_v50, %v1878_v49  ;;  %v1920_v49 = vld [vmem:[#allocation10 + $0x3d0] sm:$0xff]  ;;  %v1923_v50 = vld [vmem:[#allocation10 + $0x3e8] sm:$0xff] }
 0x3d1   :  { %5330 = vmatpush1.bf16.msra.mxu1 %v5329_v59  ;;  %v1850_v59 = vld [vmem:[#allocation10 + $0x1a0] sm:$0xff] }
 0x3d2   :  { %5332 = vmatprep.subr.bf16.mxu1 %v5331_v60  ;;  %v1852_v60 = vld [vmem:[#allocation10 + $0x1b0] sm:$0xff] }
 0x3d3   :  { %v5373_v45 = vpack.c.bf16 %v1852_v60, %v1850_v59  ;;  %v5405_v59 = vpack.c.bf16 %v1884_v56, %v1882_v55  ;;  %v1924_v55 = vld [vmem:[#allocation10 + $0x3f0] sm:$0xff] }
 0x3d5   :  { %5334 = vmatpush1.bf16.msra.mxu1 %v5333_v1  ;;  %v1854_v1 = vld [vmem:[#allocation10 + $0x1c0] sm:$0xff] }
 0x3d6   :  { %5336 = vmatprep.subr.bf16.mxu1 %v5335_v2  ;;  %v1856_v2 = vld [vmem:[#allocation10 + $0x1d0] sm:$0xff] }
 0x3d7   :  { %v5377_v3 = vpack.c.bf16 %v1856_v2, %v1854_v1  ;;  %v5409_v1 = vpack.c.bf16 %v1888_v62, %v1886_v61  ;;  %v6515_v61 = vmov 1966171168  }
 0x3d8   :  { %v2148_v62 = vunpack.c.l.s4 %v6515_v61 }
 0x3d9   :  { %5338 = vmatpush1.bf16.msra.mxu1 %v5337_v7  ;;  %v1858_v7 = vld [vmem:[#allocation10 + $0x1e0] sm:$0xff] }
 0x3da   :  { %5340 = vmatprep.subr.bf16.mxu1 %v5339_v8  ;;  %v1860_v8 = vld [vmem:[#allocation10 + $0x1f0] sm:$0xff] }
 0x3db   :  { %v5381_v9 = vpack.c.bf16 %v1860_v8, %v1858_v7 }
 0x3dd   :  { %5342 = vmatpush1.bf16.msra.mxu1 %v5341_v14 }
 0x3de   :  { %5344 = vmatprep.subr.bf16.mxu1 %v5343_v11 }
 0x3e1   :  { %5346 = vmatpush1.bf16.msra.mxu1 %v5345_v19 }
 0x3e2   :  { %5348 = vmatprep.subr.bf16.mxu1 %v5347_v20  ;;  %v1867_v20 = vld [vmem:[#allocation10 + $0x228] sm:$0xff] }
 0x3e3   :  { %v5387_v27 = vpack.c.bf16 %v1869_v21, %v1867_v20 }
 0x3e5   :  { %5350 = vmatpush1.bf16.msra.mxu1 %v5349_v25  ;;  %v5385_v25 = vpack.c.bf16 %v1864_v17, %v1862_v16  ;;  %v1900_v16 = vld [vmem:[#allocation10 + $0x330] sm:$0xff]  ;;  %v1903_v17 = vld [vmem:[#allocation10 + $0x348] sm:$0xff] }
 0x3e6   :  { %5352 = vmatprep.subr.bf16.mxu1 %v5351_v26 }
 0x3e9   :  { %5354 = vmatpush1.bf16.msra.mxu1 %v5353_v31  ;;  %v1871_v31 = vld [vmem:[#allocation10 + $0x248] sm:$0xff] }
 0x3ea   :  { %5356 = vmatprep.subr.bf16.mxu1 %v5355_v32  ;;  %v1873_v32 = vld [vmem:[#allocation10 + $0x258] sm:$0xff] }
 0x3eb   :  { %v5391_v34 = vpack.c.bf16 %v1873_v32, %v1871_v31  ;;  %v1913_v31 = vld [vmem:[#allocation10 + $0x398] sm:$0xff]  ;;  %v5429_v32 = vpack.c.bf16 %v1908_v29, %v1906_v28 }
 0x3ed   :  { %5358 = vmatpush1.bf16.msra.mxu1 %v5357_v36  ;;  %v1875_v36 = vld [vmem:[#allocation10 + $0x268] sm:$0xff] }
 0x3ee   :  { %5360 = vmatprep.subr.bf16.mxu1 %v5359_v37  ;;  %v1877_v37 = vld [vmem:[#allocation10 + $0x278] sm:$0xff] }
 0x3ef   :  { %v5395_v41 = vpack.c.bf16 %v1877_v37, %v1875_v36  ;;  %v1917_v36 = vld [vmem:[#allocation10 + $0x3b8] sm:$0xff] }
 0x3f1   :  { %5362 = vmatpush1.bf16.msra.mxu1 %v5361_v43  ;;  %v1879_v43 = vld [vmem:[#allocation10 + $0x288] sm:$0xff] }
 0x3f2   :  { %5364 = vmatprep.subr.bf16.mxu1 %v5363_v46  ;;  %v1881_v46 = vld [vmem:[#allocation10 + $0x298] sm:$0xff] }
 0x3f3   :  { %v5399_v47 = vpack.c.bf16 %v1881_v46, %v1879_v43  ;;  %v1921_v43 = vld [vmem:[#allocation10 + $0x3d8] sm:$0xff] }
 0x3f5   :  { %5366 = vmatpush1.bf16.msra.mxu1 %v5365_v52  ;;  %v1883_v52 = vld [vmem:[#allocation10 + $0x2a8] sm:$0xff] }
 0x3f6   :  { %5368 = vmatprep.subr.bf16.mxu1 %v5367_v53  ;;  %v1885_v53 = vld [vmem:[#allocation10 + $0x2b8] sm:$0xff] }
 0x3f7   :  { %v5403_v38 = vpack.c.bf16 %v1885_v53, %v1883_v52  ;;  %v1925_v52 = vld [vmem:[#allocation10 + $0x3f8] sm:$0xff] }
 0x3f9   :  { %5370 = vmatpush1.bf16.msra.mxu1 %v5369_v57  ;;  %v1887_v57 = vld [vmem:[#allocation10 + $0x2c8] sm:$0xff] }
 0x3fa   :  { %5372 = vmatprep.subr.bf16.mxu1 %v5371_v58  ;;  %v1889_v58 = vld [vmem:[#allocation10 + $0x2d8] sm:$0xff] }
 0x3fb   :  { %v5407_v60 = vpack.c.bf16 %v1889_v58, %v1887_v57 }
 0x3fd   :  { %5374 = vmatpush1.bf16.msra.mxu1 %v5373_v45  ;;  %v1891_v45 = vld [vmem:[#allocation10 + $0x2e8] sm:$0xff] }
 0x3fe   :  { %5376 = vmatprep.subr.bf16.mxu1 %v5375_v63  ;;  %v1893_v63 = vld [vmem:[#allocation10 + $0x2f8] sm:$0xff] }
 0x3ff   :  { %v5411_v2 = vpack.c.bf16 %v1893_v63, %v1891_v45  ;;  %v2150_v45 = vlaneseq }
 0x401   :  { %5378 = vmatpush1.bf16.msra.mxu1 %v5377_v3  ;;  %v1890_v3 = vld [vmem:[#allocation10 + $0x2e0] sm:$0xff] }
 0x402   :  { %5380 = vmatprep.subr.bf16.mxu1 %v5379_v6  ;;  %v1897_v6 = vld [vmem:[#allocation10 + $0x318] sm:$0xff]  ;;  %v5413_v7 = vpack.c.bf16 %v1892_v4, %v1890_v3  ;;  %v2479_v4 = vld [vmem:[#allocation11 + $0x8] sm:$0xff] }
 0x403   :  { %v5415_v8 = vpack.c.bf16 %v1897_v6, %v1895_v5  ;;  %v2483_v5 = vld [vmem:[#allocation11 + $0x28] sm:$0xff] }
 0x405   :  { %5382 = vmatpush1.bf16.msra.mxu1 %v5381_v9  ;;  %v1894_v9 = vld [vmem:[#allocation10 + $0x300] sm:$0xff] }
 0x406   :  { %5384 = vmatprep.subr.bf16.mxu1 %v5383_v13  ;;  %v1901_v13 = vld [vmem:[#allocation10 + $0x338] sm:$0xff] }
 0x49a   :  { %v1714_v14 = vpop.f32.mrb[6].mxu1 }
 0x49b   :  { %v1790_v11 = vmul.f32 0.01, %v1714_v14  ;;  %v1716_v15 = vpop.f32.mrb[7].mxu1  ;;  %v6712_v18 = vpop.f32.mrb[8].mxu0 }
 0x49c   :  { %v1791_v19 = vmul.f32 0.01, %v1716_v15  ;;  %v1787_v22 = vpop.f32.mrb[9].mxu0  ;;  %v1792_v57 = vmul.f32 0.01, %v6712_v18 }
 0x49d   :  { %v1793_v23 = vmul.f32 0.01, %v1787_v22  ;;  %v1794_v26 = vmax.f32 %v1714_v14, %v1790_v11  ;;  %v5417_v14 = vpack.c.bf16 %v1896_v10, %v1894_v9  ;;  %v5419_v11 = vpack.c.bf16 %v1901_v13, %v1899_v12  ;;  %v2487_v10 = vld [vmem:[#allocation11 + $0x48] sm:$0xff] }
 0x49e   :  { %v1795_v24 = vmax.f32 %v1716_v15, %v1791_v19  ;;  %v1898_v15 = vld [vmem:[#allocation10 + $0x320] sm:$0xff]  ;;  %v1905_v19 = vld [vmem:[#allocation10 + $0x358] sm:$0xff]  ;;  %v1796_v58 = vmax.f32 %v6712_v18, %v1792_v57  ;;  %v2491_v12 = vld [vmem:[#allocation11 + $0x68] sm:$0xff] }
 0x49f   :  { %v1797_v30 = vmax.f32 %v1787_v22, %v1793_v23  ;;  %v5421_v20 = vpack.c.bf16 %v1900_v16, %v1898_v15  ;;  %v5423_v21 = vpack.c.bf16 %v1905_v19, %v1903_v17  ;;  %v1902_v22 = vld [vmem:[#allocation10 + $0x340] sm:$0xff]  ;;  %v1904_v23 = vld [vmem:[#allocation10 + $0x350] sm:$0xff]  ;;  %v5451_v19 = vpack.c.bf16 %v2491_v12, %v2487_v10 }
 0x4a0   :  { %1990 = vmatprep.mubr.f32.mxu1 %v1795_v24  ;;  %v1907_v24 = vld [vmem:[#allocation10 + $0x368] sm:$0xff] }
 0x4a1   :  { %1991 = vmatmul.mubr.f32.vlgmr.msra.gmra.mrb[8].mxu1 %v1794_v26  ;;  %v5425_v26 = vpack.c.bf16 %v1904_v23, %v1902_v22 }
 0x4a2   :  { %5386 = vmatpush1.bf16.msra.mxu1 %v5385_v25  ;;  %2061 = vmatprep.mubr.f32.mxu1 %v1797_v30  ;;  %v1909_v25 = vld [vmem:[#allocation10 + $0x378] sm:$0xff]  ;;  %v1911_v30 = vld [vmem:[#allocation10 + $0x388] sm:$0xff] }
 0x4a3   :  { %5388 = vmatprep.subr.bf16.mxu1 %v5387_v27  ;;  %v5427_v27 = vpack.c.bf16 %v1909_v25, %v1907_v24 }
 0x4a6   :  { %5390 = vmatpush1.bf16.msra.mxu1 %v5389_v33  ;;  %v5431_v33 = vpack.c.bf16 %v1913_v31, %v1911_v30 }
 0x4a7   :  { %5392 = vmatprep.subr.bf16.mxu1 %v5391_v34  ;;  %v1910_v34 = vld [vmem:[#allocation10 + $0x380] sm:$0xff] }
 0x4a8   :  { %v5433_v37 = vpack.c.bf16 %v1912_v35, %v1910_v34 }
 0x4aa   :  { %5394 = vmatpush1.bf16.msra.mxu1 %v5393_v40  ;;  %v5435_v40 = vpack.c.bf16 %v1917_v36, %v1915_v48 }
 0x4ab   :  { %5396 = vmatprep.subr.bf16.mxu1 %v5395_v41  ;;  %v1914_v41 = vld [vmem:[#allocation10 + $0x3a0] sm:$0xff] }
 0x4ac   :  { %v5437_v46 = vpack.c.bf16 %v1916_v42, %v1914_v41 }
 0x4ae   :  { %5398 = vmatpush1.bf16.msra.mxu1 %v5397_v39  ;;  %v5439_v39 = vpack.c.bf16 %v1921_v43, %v1919_v44 }
 0x4af   :  { %5400 = vmatprep.subr.bf16.mxu1 %v5399_v47  ;;  %v1918_v47 = vld [vmem:[#allocation10 + $0x3c0] sm:$0xff] }
 0x4b0   :  { %v5441_v53 = vpack.c.bf16 %v1920_v49, %v1918_v47 }
 0x4b2   :  { %5402 = vmatpush1.bf16.msra.mxu1 %v5401_v54  ;;  %v5443_v54 = vpack.c.bf16 %v1925_v52, %v1923_v50 }
 0x4b3   :  { %5404 = vmatprep.subr.bf16.mxu1 %v5403_v38  ;;  %v1922_v38 = vld [vmem:[#allocation10 + $0x3e0] sm:$0xff] }
 0x4b4   :  { %v5445_v56 = vpack.c.bf16 %v1924_v55, %v1922_v38 }
 0x4b6   :  { %5406 = vmatpush1.bf16.msra.mxu1 %v5405_v59 }
 0x4b7   :  { %5408 = vmatprep.subr.bf16.mxu1 %v5407_v60 }
 0x4ba   :  { %5410 = vmatpush1.bf16.msra.mxu1 %v5409_v1  ;;  %v2149_v1 = vunpack.c.0.s8 %v2148_v62 }
 0x4bb   :  { %5412 = vmatprep.subr.bf16.mxu1 %v5411_v2  ;;  %v6721_v2 = vshrl.u32 %v2150_v45, 7 }
 0x4bd   :  { %v6740_v22 = vsub.s32 1, %v6721_v2 }
 0x4be   :  { %5414 = vmatpush1.bf16.msra.mxu1 %v5413_v7  ;;  %v2478_v7 = vld [vmem:[#allocation11] sm:$0xff] }
 0x4bf   :  { %5416 = vmatprep.subr.bf16.mxu1 %v5415_v8  ;;  %v2482_v8 = vld [vmem:[#allocation11 + $0x20] sm:$0xff] }
 0x4c0   :  { %v5449_v15 = vpack.c.bf16 %v2482_v8, %v2478_v7 }
 0x4c2   :  { %5418 = vmatpush1.bf16.msra.mxu1 %v5417_v14  ;;  %v2152_v14 = vsub.s32 %v2149_v1, %v6721_v2 }
 0x4c3   :  { %5420 = vmatprep.subr.bf16.mxu1 %v5419_v11  ;;  %v5447_v11 = vpack.c.bf16 %v2483_v5, %v2479_v4 }
 0x4c6   :  { %5422 = vmatpush1.bf16.msra.mxu1 %v5421_v20 }
 0x4c7   :  { %5424 = vmatprep.subr.bf16.mxu1 %v5423_v21  ;;  %v6737_v21 = vsub.s32 0, %v6721_v2 }
 0x4ca   :  { %5426 = vmatpush1.bf16.msra.mxu1 %v5425_v26 }
 0x4cb   :  { %5428 = vmatprep.subr.bf16.mxu1 %v5427_v27 }
 0x4ce   :  { %5430 = vmatpush1.bf16.msra.mxu1 %v5429_v32 }
 0x4cf   :  { %5432 = vmatprep.subr.bf16.mxu1 %v5431_v33 }
 0x4d2   :  { %5434 = vmatpush1.bf16.msra.mxu1 %v5433_v37 }
 0x4d3   :  { %5436 = vmatprep.subr.bf16.mxu1 %v5435_v40 }
 0x4d6   :  { %5438 = vmatpush1.bf16.msra.mxu1 %v5437_v46 }
 0x4d7   :  { %5440 = vmatprep.subr.bf16.mxu1 %v5439_v39 }
 0x4da   :  { %5442 = vmatpush1.bf16.msra.mxu1 %v5441_v53 }
 0x4db   :  { %5444 = vmatprep.subr.bf16.mxu1 %v5443_v54 }
 0x4de   :  { %5446 = vmatpush1.bf16.msra.mxu1 %v5445_v56 }
 0x4e1   :  { %2062 = vmatmul.mubr.f32.vlgmr.msra.gmra.mrb[8].mxu1 %v1796_v58 }
 0x4e2   :  { %3403 = vmatprep.mubr.f32.mxu1 %v6513_v0 }
 0x5b4   :  { %v2063_v59 = vpop.f32.mrb[8].mxu1 }
 0x5b5   :  { %v2065_v60 = vpop.f32.mrb[9].mxu1 }
 0x5b6   :  { %2068 = vmatprep.subr.mxu0 %v2065_v60 }
 0x5b7   :  { %2069 = vmatpush1.msra.mxu0 %v2063_v59 }
 0x5b8   :  { %4584 = vmatmul.mubr.msk.f32.vlgmr.msra.gmra.mrb[10].mxu0 %vm190_vm1, %v6705_v51 }
 0x5b9   :  { %2670 = vmatprep.mubr.f32.mxu0 %v6513_v0 }
 0x68b   :  { %v2134_v63 = vpop.f32.mrb[10].mxu0 }
 0x68c   :  { %v2139_v18 = vmul.f32 0.01, %v2134_v63  ;;  %v2136_v3 = vpop.f32.mrb[11].mxu0 }
 0x68d   :  { %v2140_v6 = vmul.f32 0.01, %v2136_v3 }
 0x68e   :  { %v6723_v9 = vmax.f32 %v2134_v63, %v2139_v18 }
 0x68f   :  { %v6725_v13 = vmax.f32 %v2136_v3, %v2140_v6 }
 0x691   :  { %2606 = vmatprep.subr.mxu0 %v6725_v13  ;;  %v2145_v16 = vcombine.low %v6723_v9, %v6725_v13  ;;  %v2146_v17 = vcombine.high %v6723_v9, %v6725_v13 }
 0x692   :  { %2607 = vmatpush1.msra.mxu0 %v6723_v9 }
 0x693   :  { %4585 = vmatmul.mubr.msk.f32.vlgmr.msra.gmra.mrb[12].mxu0 %vm190_vm1, %v6705_v51  ;;  %v2153_v20 = vrot.slane %v2145_v16, %v2152_v14  ;;  %v2160_v23 = vrot.slane %v2146_v17, %v2152_v14  ;;  %5448 = vmatprep.subr.bf16.mxu0 %v5447_v11 }
 0x694   :  { %5450 = vmatpush1.bf16.msra.mxu0 %v5449_v15 }
 0x695   :  { %v2169_v24 = vrot.slane %v2153_v20, %v2152_v14  ;;  %v2161_v25 = vcombine.high %v2153_v20, %v2153_v20  ;;  %v2162_v26 = vcombine.high %v2160_v23, %v2160_v23  ;;  %v2176_v27 = vrot.slane %v2160_v23, %v2152_v14  ;;  %5452 = vmatprep.subr.bf16.mxu0 %v5451_v19 }
 0x697   :  { %v2198_v28 = vrot.slane %v2169_v24, %v6737_v21  ;;  %v2202_v29 = vrot.slane %v2169_v24, %v6740_v22  ;;  %v2191_v51 = vcombine.high %v2169_v24, %v2169_v24  ;;  %v2183_v30 = vrot.slane %v2161_v25, %v2152_v14 }
 0x698   :  { %v2190_v31 = vrot.slane %v2162_v26, %v2152_v14  ;;  %v2230_v32 = vrot.slane %v2176_v27, %v6737_v21  ;;  %v2234_v33 = vrot.slane %v2176_v27, %v6740_v22  ;;  %v2192_v34 = vcombine.high %v2176_v27, %v2176_v27 }
 0x699   :  { %v2275_v35 = vsub.f32 %v2198_v28, %v6723_v9  ;;  %v2276_v48 = vsub.f32 %v2202_v29, %v6725_v13  ;;  %v2214_v36 = vrot.slane %v2191_v51, %v6737_v21  ;;  %v2218_v37 = vrot.slane %v2191_v51, %v6740_v22 }
 0x69a   :  { %v2206_v40 = vrot.slane %v2183_v30, %v6737_v21  ;;  %v2210_v41 = vrot.slane %v2183_v30, %v6740_v22  ;;  %v2238_v42 = vrot.slane %v2190_v31, %v6737_v21  ;;  %v2242_v44 = vrot.slane %v2190_v31, %v6740_v22 }
 0x69b   :  { %v2291_v43 = vmul.f32 %v2275_v35, %v2275_v35  ;;  %v2292_v46 = vmul.f32 %v2276_v48, %v2276_v48  ;;  %v2279_v39 = vsub.f32 %v2214_v36, %v6723_v9  ;;  %v2280_v47 = vsub.f32 %v2218_v37, %v6725_v13  ;;  %v2494_v48 = vld [vmem:[#allocation11 + $0x80] sm:$0xff]  ;;  %v2507_v37 = vld [vmem:[#allocation11 + $0xe8] sm:$0xff] }
 0x69c   :  { %v2277_v49 = vsub.f32 %v2206_v40, %v6723_v9  ;;  %v2278_v50 = vsub.f32 %v2210_v41, %v6725_v13  ;;  %v2285_v52 = vsub.f32 %v2238_v42, %v6723_v9  ;;  %v2286_v53 = vsub.f32 %v2242_v44, %v6725_v13  ;;  %v2502_v41 = vld [vmem:[#allocation11 + $0xc0] sm:$0xff] }
 0x69d   :  { %v2307_v54 = vadd.f32 %v2292_v46, %v2291_v43  ;;  %v2295_v38 = vmul.f32 %v2279_v39, %v2279_v39  ;;  %v2296_v55 = vmul.f32 %v2280_v47, %v2280_v47  ;;  %v2283_v56 = vsub.f32 %v2230_v32, %v6723_v9  ;;  %v2490_v32 = vld [vmem:[#allocation11 + $0x60] sm:$0xff]  ;;  %v2511_v43 = vld [vmem:[#allocation11 + $0x108] sm:$0xff] }
 0x69e   :  { %v2293_v57 = vmul.f32 %v2277_v49, %v2277_v49  ;;  %v2294_v58 = vmul.f32 %v2278_v50, %v2278_v50  ;;  %v2301_v59 = vmul.f32 %v2285_v52, %v2285_v52  ;;  %v2302_v60 = vmul.f32 %v2286_v53, %v2286_v53  ;;  %v2506_v42 = vld [vmem:[#allocation11 + $0xe0] sm:$0xff]  ;;  %v2515_v46 = vld [vmem:[#allocation11 + $0x128] sm:$0xff] }
 0x69f   :  { %2308 = vadd.xlane.f32.xlu0 %v2307_v54  ;;  %v2313_v61 = vadd.f32 %v2296_v55, %v2295_v38  ;;  %v2284_v62 = vsub.f32 %v2234_v33, %v6725_v13  ;;  %v2299_v63 = vmul.f32 %v2283_v56, %v2283_v56  ;;  %v2193_v1 = vcombine.high %v2183_v30, %v2183_v30  ;;  %v2510_v47 = vld [vmem:[#allocation11 + $0x100] sm:$0xff]  ;;  %v2519_v52 = vld [vmem:[#allocation11 + $0x148] sm:$0xff] }
 0x6a0   :  { %v2310_v18 = vadd.f32 %v2294_v58, %v2293_v57  ;;  %v2322_v3 = vadd.f32 %v2302_v60, %v2301_v59  ;;  %v2246_v4 = vrot.slane %v2192_v34, %v6737_v21  ;;  %v2250_v5 = vrot.slane %v2192_v34, %v6740_v22  ;;  %v2499_v34 = vld [vmem:[#allocation11 + $0xa8] sm:$0xff]  ;;  %v2514_v49 = vld [vmem:[#allocation11 + $0x120] sm:$0xff] }
 0x6a1   :  { %2314 = vadd.xlane.f32.xlu1 %v2313_v61  ;;  %v2300_v6 = vmul.f32 %v2284_v62, %v2284_v62  ;;  %v2222_v7 = vrot.slane %v2193_v1, %v6737_v21  ;;  %v2226_v8 = vrot.slane %v2193_v1, %v6740_v22  ;;  %v2194_v10 = vcombine.high %v2190_v31, %v2190_v31  ;;  %v2523_v53 = vld [vmem:[#allocation11 + $0x168] sm:$0xff]  ;;  %v2518_v38 = vld [vmem:[#allocation11 + $0x140] sm:$0xff] }
 0x6a2   :  { %v2287_v12 = vsub.f32 %v2246_v4, %v6723_v9  ;;  %v2288_v14 = vsub.f32 %v2250_v5, %v6725_v13  ;;  %v5461_v44 = vpack.c.bf16 %v2506_v42, %v2502_v41  ;;  %v5463_v39 = vpack.c.bf16 %v2515_v46, %v2511_v43  ;;  %v2522_v55 = vld [vmem:[#allocation11 + $0x160] sm:$0xff]  ;;  %v2527_v57 = vld [vmem:[#allocation11 + $0x188] sm:$0xff] }
 0x6a3   :  { %2311 = vadd.xlane.f32.xlu0 %v2310_v18  ;;  %v2319_v11 = vadd.f32 %v2300_v6, %v2299_v63  ;;  %v2281_v15 = vsub.f32 %v2222_v7, %v6723_v9  ;;  %v2282_v16 = vsub.f32 %v2226_v8, %v6725_v13  ;;  %v2254_v17 = vrot.slane %v2194_v10, %v6737_v21  ;;  %v2486_v21 = vld [vmem:[#allocation11 + $0x40] sm:$0xff]  ;;  %v2531_v58 = vld [vmem:[#allocation11 + $0x1a8] sm:$0xff] }
 0x6a4   :  { %v2303_v19 = vmul.f32 %v2287_v12, %v2287_v12  ;;  %v2304_v20 = vmul.f32 %v2288_v14, %v2288_v14  ;;  %v2258_v23 = vrot.slane %v2194_v10, %v6740_v22  ;;  %v5453_v33 = vpack.c.bf16 %v2490_v32, %v2486_v21  ;;  %v2495_v22 = vld [vmem:[#allocation11 + $0x88] sm:$0xff]  ;;  %v2526_v60 = vld [vmem:[#allocation11 + $0x180] sm:$0xff] }
 0x6a5   :  { %2323 = vadd.xlane.f32.xlu1 %v2322_v3  ;;  %v2297_v24 = vmul.f32 %v2281_v15, %v2281_v15  ;;  %v2298_v25 = vmul.f32 %v2282_v16, %v2282_v16  ;;  %v2289_v26 = vsub.f32 %v2254_v17, %v6723_v9  ;;  %v5455_v35 = vpack.c.bf16 %v2499_v34, %v2495_v22  ;;  %v2498_v9 = vld [vmem:[#allocation11 + $0xa0] sm:$0xff]  ;;  %v2535_v63 = vld [vmem:[#allocation11 + $0x1c8] sm:$0xff] }
 0x6a6   :  { %v2325_v27 = vadd.f32 %v2304_v20, %v2303_v19  ;;  %v2290_v28 = vsub.f32 %v2258_v23, %v6725_v13  ;;  %5454 = vmatpush1.bf16.msra.mxu0 %v5453_v33  ;;  %v5457_v36 = vpack.c.bf16 %v2498_v9, %v2494_v48  ;;  %v2503_v13 = vld [vmem:[#allocation11 + $0xc8] sm:$0xff]  ;;  %v5465_v50 = vpack.c.bf16 %v2514_v49, %v2510_v47  ;;  %v2530_v61 = vld [vmem:[#allocation11 + $0x1a0] sm:$0xff] }
 0x6a7   :  { %2320 = vadd.xlane.f32.xlu0 %v2319_v11  ;;  %v2316_v29 = vadd.f32 %v2298_v25, %v2297_v24  ;;  %v2305_v51 = vmul.f32 %v2289_v26, %v2289_v26  ;;  %5456 = vmatprep.subr.bf16.mxu0 %v5455_v35  ;;  %v5459_v40 = vpack.c.bf16 %v2507_v37, %v2503_v13  ;;  %v2539_v1 = vld [vmem:[#allocation11 + $0x1e8] sm:$0xff]  ;;  %v2534_v3 = vld [vmem:[#allocation11 + $0x1c0] sm:$0xff] }
 0x6a8   :  { %v2306_v30 = vmul.f32 %v2290_v28, %v2290_v28  ;;  %v5467_v54 = vpack.c.bf16 %v2523_v53, %v2519_v52  ;;  %v5469_v56 = vpack.c.bf16 %v2522_v55, %v2518_v38  ;;  %v5471_v59 = vpack.c.bf16 %v2531_v58, %v2527_v57  ;;  %v2538_v4 = vld [vmem:[#allocation11 + $0x1e0] sm:$0xff]  ;;  %v2543_v6 = vld [vmem:[#allocation11 + $0x208] sm:$0xff]  ;;  %v2481_v55 = vld [vmem:[#allocation11 + $0x18] sm:$0xff] }
 0x6a9   :  { %2317 = vadd.xlane.f32.xlu1 %v2316_v29  ;;  %v5473_v62 = vpack.c.bf16 %v2530_v61, %v2526_v60  ;;  %v5475_v18 = vpack.c.bf16 %v2539_v1, %v2535_v63  ;;  %v5477_v5 = vpack.c.bf16 %v2538_v4, %v2534_v3  ;;  %v2547_v7 = vld [vmem:[#allocation11 + $0x228] sm:$0xff]  ;;  %v2542_v10 = vld [vmem:[#allocation11 + $0x200] sm:$0xff] }
 0x6aa   :  { %v2328_v31 = vadd.f32 %v2306_v30, %v2305_v51  ;;  %5458 = vmatpush1.bf16.msra.mxu0 %v5457_v36  ;;  %v5479_v8 = vpack.c.bf16 %v2547_v7, %v2543_v6  ;;  %v2546_v12 = vld [vmem:[#allocation11 + $0x220] sm:$0xff]  ;;  %v2551_v11 = vld [vmem:[#allocation11 + $0x248] sm:$0xff] }
 0x6ab   :  { %2326 = vadd.xlane.f32.xlu0 %v2325_v27  ;;  %5460 = vmatprep.subr.bf16.mxu0 %v5459_v40  ;;  %v5481_v14 = vpack.c.bf16 %v2546_v12, %v2542_v10  ;;  %v2555_v15 = vld [vmem:[#allocation11 + $0x268] sm:$0xff]  ;;  %v2550_v16 = vld [vmem:[#allocation11 + $0x240] sm:$0xff] }
 0x6ac   :  { %v5483_v17 = vpack.c.bf16 %v2555_v15, %v2551_v11  ;;  %v2554_v19 = vld [vmem:[#allocation11 + $0x260] sm:$0xff]  ;;  %v2559_v20 = vld [vmem:[#allocation11 + $0x288] sm:$0xff] }
 0x6ad   :  { %2329 = vadd.xlane.f32.xlu1 %v2328_v31  ;;  %v2563_v23 = vld [vmem:[#allocation11 + $0x2a8] sm:$0xff]  ;;  %v5485_v24 = vpack.c.bf16 %v2554_v19, %v2550_v16  ;;  %v2558_v26 = vld [vmem:[#allocation11 + $0x280] sm:$0xff] }
 0x6ae   :  { %5462 = vmatpush1.bf16.msra.mxu0 %v5461_v44  ;;  %v5487_v25 = vpack.c.bf16 %v2563_v23, %v2559_v20  ;;  %v2562_v27 = vld [vmem:[#allocation11 + $0x2a0] sm:$0xff]  ;;  %v2567_v28 = vld [vmem:[#allocation11 + $0x2c8] sm:$0xff] }
 0x6af   :  { %5464 = vmatprep.subr.bf16.mxu0 %v5463_v39  ;;  %v2571_v29 = vld [vmem:[#allocation11 + $0x2e8] sm:$0xff]  ;;  %v5489_v51 = vpack.c.bf16 %v2562_v27, %v2558_v26  ;;  %v2566_v31 = vld [vmem:[#allocation11 + $0x2c0] sm:$0xff] }
 0x6b0   :  { %v5491_v30 = vpack.c.bf16 %v2571_v29, %v2567_v28  ;;  %v2570_v21 = vld [vmem:[#allocation11 + $0x2e0] sm:$0xff]  ;;  %v2575_v32 = vld [vmem:[#allocation11 + $0x308] sm:$0xff] }
 0x6b1   :  { %v2579_v33 = vld [vmem:[#allocation11 + $0x328] sm:$0xff]  ;;  %v5493_v22 = vpack.c.bf16 %v2570_v21, %v2566_v31  ;;  %v2574_v35 = vld [vmem:[#allocation11 + $0x300] sm:$0xff] }
 0x6b2   :  { %5466 = vmatpush1.bf16.msra.mxu0 %v5465_v50  ;;  %v5495_v34 = vpack.c.bf16 %v2579_v33, %v2575_v32  ;;  %v2578_v48 = vld [vmem:[#allocation11 + $0x320] sm:$0xff]  ;;  %v2583_v9 = vld [vmem:[#allocation11 + $0x348] sm:$0xff] }
 0x6b3   :  { %5468 = vmatprep.subr.bf16.mxu0 %v5467_v54  ;;  %v2587_v36 = vld [vmem:[#allocation11 + $0x368] sm:$0xff]  ;;  %v5497_v13 = vpack.c.bf16 %v2578_v48, %v2574_v35  ;;  %v2582_v40 = vld [vmem:[#allocation11 + $0x340] sm:$0xff] }
 0x6b4   :  { %v5499_v37 = vpack.c.bf16 %v2587_v36, %v2583_v9  ;;  %v2586_v41 = vld [vmem:[#allocation11 + $0x360] sm:$0xff]  ;;  %v2591_v42 = vld [vmem:[#allocation11 + $0x388] sm:$0xff] }
 0x6b5   :  { %v2595_v44 = vld [vmem:[#allocation11 + $0x3a8] sm:$0xff]  ;;  %v5501_v43 = vpack.c.bf16 %v2586_v41, %v2582_v40  ;;  %v2590_v39 = vld [vmem:[#allocation11 + $0x380] sm:$0xff] }
 0x6b6   :  { %5470 = vmatpush1.bf16.msra.mxu0 %v5469_v56  ;;  %v5503_v46 = vpack.c.bf16 %v2595_v44, %v2591_v42  ;;  %v2594_v47 = vld [vmem:[#allocation11 + $0x3a0] sm:$0xff]  ;;  %v2599_v49 = vld [vmem:[#allocation11 + $0x3c8] sm:$0xff]  ;;  %v2485_v56 = vld [vmem:[#allocation11 + $0x38] sm:$0xff] }
 0x6b7   :  { %5472 = vmatprep.subr.bf16.mxu0 %v5471_v59  ;;  %v2603_v50 = vld [vmem:[#allocation11 + $0x3e8] sm:$0xff]  ;;  %v5505_v52 = vpack.c.bf16 %v2594_v47, %v2590_v39  ;;  %v2598_v54 = vld [vmem:[#allocation11 + $0x3c0] sm:$0xff]  ;;  %v5511_v58 = vpack.c.bf16 %v2485_v56, %v2481_v55 }
 0x6b8   :  { %v5507_v53 = vpack.c.bf16 %v2603_v50, %v2599_v49  ;;  %v2602_v38 = vld [vmem:[#allocation11 + $0x3e0] sm:$0xff] }
 0x6b9   :  { %v5509_v57 = vpack.c.bf16 %v2602_v38, %v2598_v54 }
 0x6ba   :  { %5474 = vmatpush1.bf16.msra.mxu0 %v5473_v62 }
 0x6bb   :  { %5476 = vmatprep.subr.bf16.mxu0 %v5475_v18 }
 0x6be   :  { %5478 = vmatpush1.bf16.msra.mxu0 %v5477_v5 }
 0x6bf   :  { %5480 = vmatprep.subr.bf16.mxu0 %v5479_v8 }
 0x6c2   :  { %5482 = vmatpush1.bf16.msra.mxu0 %v5481_v14 }
 0x6c3   :  { %5484 = vmatprep.subr.bf16.mxu0 %v5483_v17 }
 0x6c6   :  { %5486 = vmatpush1.bf16.msra.mxu0 %v5485_v24 }
 0x6c7   :  { %5488 = vmatprep.subr.bf16.mxu0 %v5487_v25 }
 0x6ca   :  { %5490 = vmatpush1.bf16.msra.mxu0 %v5489_v51 }
 0x6cb   :  { %5492 = vmatprep.subr.bf16.mxu0 %v5491_v30 }
 0x6ce   :  { %5494 = vmatpush1.bf16.msra.mxu0 %v5493_v22 }
 0x6cf   :  { %5496 = vmatprep.subr.bf16.mxu0 %v5495_v34 }
 0x6d2   :  { %5498 = vmatpush1.bf16.msra.mxu0 %v5497_v13 }
 0x6d3   :  { %5500 = vmatprep.subr.bf16.mxu0 %v5499_v37 }
 0x6d6   :  { %5502 = vmatpush1.bf16.msra.mxu0 %v5501_v43 }
 0x6d7   :  { %5504 = vmatprep.subr.bf16.mxu0 %v5503_v46 }
 0x6da   :  { %5506 = vmatpush1.bf16.msra.mxu0 %v5505_v52 }
 0x6db   :  { %5508 = vmatprep.subr.bf16.mxu0 %v5507_v53 }
 0x6de   :  { %5510 = vmatpush1.bf16.msra.mxu0 %v5509_v57 }
 0x6df   :  { %5512 = vmatprep.subr.bf16.mxu0 %v5511_v58 }
 0x72c   :  { %v2309_v59 = vpop.xlane.xlu0 %2308 }
 0x72d   :  { %6255 = vrsqrt.f32 %v2309_v59  ;;  %vm2333_vm3 = vcmp.eq.f32.partialorder %v2309_v59, inf  ;;  %vm2335_vm4 = vcmp.eq.f32.partialorder %v2309_v59, 0.0  ;;  %v2336_v6 = vand.u32 2147483648, %v2309_v59 }
 0x72e   :  { %v2315_v60 = vpop.xlane.xlu1 %2314 }
 0x72f   :  { %6257 = vrsqrt.f32 %v2315_v60  ;;  %vm2347_vm5 = vcmp.eq.f32.partialorder %v2315_v60, inf  ;;  %vm2349_vm6 = vcmp.eq.f32.partialorder %v2315_v60, 0.0  ;;  %v2350_v10 = vand.u32 2147483648, %v2315_v60 }
 0x730   :  { %v2312_v61 = vpop.xlane.xlu0 %2311 }
 0x731   :  { %6259 = vrsqrt.f32 %v2312_v61  ;;  %vm2340_vm7 = vcmp.eq.f32.partialorder %v2312_v61, inf  ;;  %vm2342_vm8 = vcmp.eq.f32.partialorder %v2312_v61, 0.0  ;;  %v2343_v15 = vand.u32 2147483648, %v2312_v61 }
 0x732   :  { %v2324_v62 = vpop.xlane.xlu1 %2323 }
 0x733   :  { %6261 = vrsqrt.f32 %v2324_v62  ;;  %vm2368_vm9 = vcmp.eq.f32.partialorder %v2324_v62, inf  ;;  %vm2370_vm10 = vcmp.eq.f32.partialorder %v2324_v62, 0.0  ;;  %v2371_v24 = vand.u32 2147483648, %v2324_v62 }
 0x734   :  { %v6774_v63 = vpop.xlane.xlu0 %2320 }
 0x735   :  { %6263 = vrsqrt.f32 %v6774_v63  ;;  %vm2361_vm11 = vcmp.eq.f32.partialorder %v6774_v63, inf  ;;  %vm2363_vm12 = vcmp.eq.f32.partialorder %v6774_v63, 0.0  ;;  %v2364_v30 = vand.u32 2147483648, %v6774_v63 }
 0x736   :  { %v6777_v1 = vpop.xlane.xlu1 %2317 }
 0x737   :  { %v6256_v18 = vpop.eup %6255  ;;  %6265 = vrsqrt.f32 %v6777_v1  ;;  %vm2354_vm13 = vcmp.eq.f32.partialorder %v6777_v1, inf  ;;  %vm2356_vm14 = vcmp.eq.f32.partialorder %v6777_v1, 0.0  ;;  %v2357_v32 = vand.u32 2147483648, %v6777_v1 }
 0x738   :  { %v2332_v3 = vmul.f32 %v6256_v18, %v2309_v59  ;;  %v6780_v4 = vpop.xlane.xlu0 %2326 }
 0x739   :  { %v6258_v5 = vpop.eup %6257  ;;  %6267 = vrsqrt.f32 %v6780_v4  ;;  %vm2375_vm15 = vcmp.eq.f32.partialorder %v6780_v4, inf  ;;  %v2378_v41 = vand.u32 2147483648, %v6780_v4 }
 0x73a   :  { %v2334_v7 = vsel %vm2333_vm3, %v2309_v59, %v2332_v3  ;;  %v2346_v8 = vmul.f32 %v6258_v5, %v2315_v60  ;;  %v6783_v12 = vpop.xlane.xlu1 %2329  ;;  %vm2377_vm3 = vcmp.eq.f32.partialorder %v6780_v4, 0.0  ;;  %v2429_v5 = vand.u32 127, %v2150_v45 }
 0x73b   :  { %v6260_v14 = vpop.eup %6259  ;;  %v2337_v11 = vsel %vm2335_vm4, %v2336_v6, %v2334_v7  ;;  %6269 = vrsqrt.f32 %v6783_v12  ;;  %vm2382_vm4 = vcmp.eq.f32.partialorder %v6783_v12, inf  ;;  %v2385_v46 = vand.u32 2147483648, %v6783_v12 }
 0x73c   :  { %v2387_v16 = vsub.f32 0.0, %v2337_v11  ;;  %v2348_v17 = vsel %vm2347_vm5, %v2315_v60, %v2346_v8  ;;  %v2339_v19 = vmul.f32 %v6260_v14, %v2312_v61  ;;  %vm2384_vm5 = vcmp.eq.f32.partialorder %v6783_v12, 0.0 }
 0x73d   :  { %v6262_v20 = vpop.eup %6261  ;;  %v2351_v23 = vsel %vm2349_vm6, %v2350_v10, %v2348_v17  ;;  %vm2462_vm6 = vcmask 1041409  }
 0x73e   :  { %v2396_v25 = vmul.f32 100.0, %v2387_v16  ;;  %v2389_v26 = vsub.f32 0.0, %v2351_v23  ;;  %v2341_v27 = vsel %vm2340_vm7, %v2312_v61, %v2339_v19  ;;  %v2367_v28 = vmul.f32 %v6262_v20, %v2324_v62 }
 0x73f   :  { %v6264_v29 = vpop.eup %6263  ;;  %v2344_v51 = vsel %vm2342_vm8, %v2343_v15, %v2341_v27  ;;  %vm2464_vm7 = vcmask 1042434   ;;  %vm2466_vm8 = vcmask 1043459  }
 0x740   :  { %v2388_v31 = vsub.f32 0.0, %v2344_v51  ;;  %v2369_v21 = vsel %vm2368_vm9, %v2324_v62, %v2367_v28  ;;  %v2404_v22 = vmul.f32 1.442695, %v2396_v25  ;;  %v2360_v35 = vmul.f32 %v6264_v29, %v6774_v63 }
 0x741   :  { %v6266_v33 = vpop.eup %6265  ;;  %v2372_v34 = vsel %vm2370_vm10, %v2371_v24, %v2369_v21  ;;  %v2398_v48 = vmul.f32 100.0, %v2389_v26  ;;  %vm2468_vm9 = vcmask 1044484   ;;  %vm2470_vm10 = vcmask 1045509  }
 0x742   :  { %v2397_v9 = vmul.f32 100.0, %v2388_v31  ;;  %v2392_v36 = vsub.f32 0.0, %v2372_v34  ;;  %v2362_v37 = vsel %vm2361_vm11, %v6774_v63, %v2360_v35  ;;  %v2353_v40 = vmul.f32 %v6266_v33, %v6777_v1  ;;  %v2480_v33 = vld [vmem:[#allocation11 + $0x10] sm:$0xff]  ;;  %v2489_v34 = vld [vmem:[#allocation11 + $0x58] sm:$0xff] }
 0x743   :  { %v6268_v13 = vpop.eup %6267  ;;  %v2365_v43 = vsel %vm2363_vm12, %v2364_v30, %v2362_v37  ;;  %6271 = vpow2.f32 %v2404_v22  ;;  %v2408_v52 = vmul.f32 1.442695, %v2398_v48  ;;  %vm2472_vm11 = vcmask 1046534   ;;  %v2484_v22 = vld [vmem:[#allocation11 + $0x30] sm:$0xff]  ;;  %v2493_v35 = vld [vmem:[#allocation11 + $0x78] sm:$0xff] }
 0x744   :  { %v2406_v42 = vmul.f32 1.442695, %v2397_v9  ;;  %v2401_v44 = vmul.f32 100.0, %v2392_v36  ;;  %v2391_v47 = vsub.f32 0.0, %v2365_v43  ;;  %v2355_v49 = vsel %vm2354_vm13, %v6777_v1, %v2353_v40  ;;  %v2488_v37 = vld [vmem:[#allocation11 + $0x50] sm:$0xff] }
 0x745   :  { %v6270_v39 = vpop.eup %6269  ;;  %v2374_v50 = vmul.f32 %v6268_v13, %v6780_v4  ;;  %v2358_v53 = vsel %vm2356_vm14, %v2357_v32, %v2355_v49  ;;  %vm2474_vm12 = vcmask 1047559   ;;  %v5513_v9 = vpack.c.bf16 %v2484_v22, %v2480_v33  ;;  %v2492_v40 = vld [vmem:[#allocation11 + $0x70] sm:$0xff]  ;;  %v2509_v49 = vld [vmem:[#allocation11 + $0xf8] sm:$0xff] }
 0x746   :  { %6273 = vpow2.f32 %v2406_v42  ;;  %v2381_v54 = vmul.f32 %v6270_v39, %v6783_v12  ;;  %v2414_v38 = vmul.f32 1.442695, %v2401_v44  ;;  %v2400_v55 = vmul.f32 100.0, %v2391_v47  ;;  %v2501_v42 = vld [vmem:[#allocation11 + $0xb8] sm:$0xff]  ;;  %v2500_v39 = vld [vmem:[#allocation11 + $0xb0] sm:$0xff] }
 0x747   :  { %v2390_v56 = vsub.f32 0.0, %v2358_v53  ;;  %v2376_v57 = vsel %vm2375_vm15, %v6780_v4, %v2374_v50  ;;  %6275 = vpow2.f32 %v2408_v52  ;;  %v5515_v13 = vpack.c.bf16 %v2493_v35, %v2489_v34  ;;  %v2505_v47 = vld [vmem:[#allocation11 + $0xd8] sm:$0xff]  ;;  %v2504_v53 = vld [vmem:[#allocation11 + $0xd0] sm:$0xff] }
 0x748   :  { %v2379_v58 = vsel %vm2377_vm3, %v2378_v41, %v2376_v57  ;;  %v2383_v59 = vsel %vm2382_vm4, %v6783_v12, %v2381_v54  ;;  %v2412_v60 = vmul.f32 1.442695, %v2400_v55  ;;  %6277 = vpow2.f32 %v2414_v38  ;;  %v2497_v41 = vld [vmem:[#allocation11 + $0x98] sm:$0xff]  ;;  %v2508_v54 = vld [vmem:[#allocation11 + $0xf0] sm:$0xff] }
 0x749   :  { %v2399_v61 = vmul.f32 100.0, %v2390_v56  ;;  %v2393_v62 = vsub.f32 0.0, %v2379_v58  ;;  %v2386_v63 = vsel %vm2384_vm5, %v2385_v46, %v2383_v59  ;;  %v2432_v12 = vsub.s32 %v2429_v5, %v6721_v2  ;;  %v2496_v46 = vld [vmem:[#allocation11 + $0x90] sm:$0xff]  ;;  %v2513_v38 = vld [vmem:[#allocation11 + $0x118] sm:$0xff] }
 0x74a   :  { %v2394_v1 = vsub.f32 0.0, %v2386_v63  ;;  %6279 = vpow2.f32 %v2412_v60  ;;  %v5517_v44 = vpack.c.bf16 %v2492_v40, %v2488_v37  ;;  %v5519_v43 = vpack.c.bf16 %v2501_v42, %v2497_v41  ;;  %v2517_v55 = vld [vmem:[#allocation11 + $0x138] sm:$0xff]  ;;  %v2512_v58 = vld [vmem:[#allocation11 + $0x110] sm:$0xff] }
 0x74b   :  { %v2410_v18 = vmul.f32 1.442695, %v2399_v61  ;;  %v2402_v3 = vmul.f32 100.0, %v2393_v62  ;;  %v5521_v50 = vpack.c.bf16 %v2500_v39, %v2496_v46  ;;  %v5523_v52 = vpack.c.bf16 %v2509_v49, %v2505_v47  ;;  %v2516_v59 = vld [vmem:[#allocation11 + $0x130] sm:$0xff]  ;;  %v2521_v60 = vld [vmem:[#allocation11 + $0x158] sm:$0xff] }
 0x74c   :  { %v2403_v4 = vmul.f32 100.0, %v2394_v1  ;;  %v5525_v56 = vpack.c.bf16 %v2508_v54, %v2504_v53  ;;  %v5527_v57 = vpack.c.bf16 %v2517_v55, %v2513_v38  ;;  %v2525_v61 = vld [vmem:[#allocation11 + $0x178] sm:$0xff]  ;;  %v5529_v62 = vpack.c.bf16 %v2516_v59, %v2512_v58  ;;  %v2520_v1 = vld [vmem:[#allocation11 + $0x150] sm:$0xff] }
 0x74d   :  { %6281 = vpow2.f32 %v2410_v18  ;;  %v2416_v6 = vmul.f32 1.442695, %v2402_v3  ;;  %v6272_v8 = vpop.eup %6271  ;;  %v5531_v63 = vpack.c.bf16 %v2525_v61, %v2521_v60  ;;  %v2524_v18 = vld [vmem:[#allocation11 + $0x170] sm:$0xff]  ;;  %v2529_v3 = vld [vmem:[#allocation11 + $0x198] sm:$0xff] }
 0x74e   :  { %v2418_v7 = vmul.f32 1.442695, %v2403_v4  ;;  %v2433_v15 = vrot.slane %v6272_v8, %v2432_v12  ;;  %v2533_v5 = vld [vmem:[#allocation11 + $0x1b8] sm:$0xff]  ;;  %v5533_v4 = vpack.c.bf16 %v2524_v18, %v2520_v1  ;;  %v2532_v8 = vld [vmem:[#allocation11 + $0x1b0] sm:$0xff] }
 0x74f   :  { %6283 = vpow2.f32 %v2416_v6  ;;  %v5535_v6 = vpack.c.bf16 %v2533_v5, %v2529_v3  ;;  %v2564_v33 = vld [vmem:[#allocation11 + $0x2b0] sm:$0xff]  ;;  %v2569_v22 = vld [vmem:[#allocation11 + $0x2d8] sm:$0xff] }
 0x750   :  { %v6274_v10 = vpop.eup %6273  ;;  %6285 = vpow2.f32 %v2418_v7  ;;  %v2528_v7 = vld [vmem:[#allocation11 + $0x190] sm:$0xff]  ;;  %v2573_v34 = vld [vmem:[#allocation11 + $0x2f8] sm:$0xff] }
 0x751   :  { %v2437_v14 = vrot.slane %v6274_v10, %v2432_v12  ;;  %v6276_v11 = vpop.eup %6275  ;;  %v2537_v10 = vld [vmem:[#allocation11 + $0x1d8] sm:$0xff] }
 0x752   :  { %v6278_v16 = vpop.eup %6277  ;;  %v2441_v20 = vrot.slane %v6276_v11, %v2432_v12  ;;  %v2577_v37 = vld [vmem:[#allocation11 + $0x318] sm:$0xff] }
 0x753   :  { %v2463_v19 = vsel %vm2462_vm6, %v2437_v14, %v2433_v15  ;;  %v2453_v28 = vrot.slane %v6278_v16, %v2432_v12  ;;  %v5537_v14 = vpack.c.bf16 %v2532_v8, %v2528_v7  ;;  %v2536_v15 = vld [vmem:[#allocation11 + $0x1d0] sm:$0xff]  ;;  %v2581_v40 = vld [vmem:[#allocation11 + $0x338] sm:$0xff] }
 0x754   :  { %v6280_v17 = vpop.eup %6279  ;;  %v2465_v26 = vsel %vm2464_vm7, %v2441_v20, %v2463_v19  ;;  %v2540_v16 = vld [vmem:[#allocation11 + $0x1f0] sm:$0xff]  ;;  %v2549_v19 = vld [vmem:[#allocation11 + $0x238] sm:$0xff]  ;;  %v5559_v42 = vpack.c.bf16 %v2581_v40, %v2577_v37 }
 0x755   :  { %v2449_v25 = vrot.slane %v6280_v17, %v2432_v12  ;;  %v2545_v17 = vld [vmem:[#allocation11 + $0x218] sm:$0xff]  ;;  %v2925_v40 = vld [vmem:[#allocation13 + $0x310] sm:$0xff] }
 0x756   :  { %v5543_v20 = vpack.c.bf16 %v2549_v19, %v2545_v17  ;;  %v2585_v46 = vld [vmem:[#allocation11 + $0x358] sm:$0xff] }
 0x757   :  { %v6282_v45 = vpop.eup %6281  ;;  %v2589_v39 = vld [vmem:[#allocation11 + $0x378] sm:$0xff] }
 0x758   :  { %v2445_v23 = vrot.slane %v6282_v45, %v2432_v12  ;;  %v5541_v45 = vpack.c.bf16 %v2540_v16, %v2536_v15  ;;  %v5563_v49 = vpack.c.bf16 %v2589_v39, %v2585_v46  ;;  %v2593_v53 = vld [vmem:[#allocation11 + $0x398] sm:$0xff]  ;;  %v2941_v39 = vld [vmem:[#allocation13 + $0x390] sm:$0xff] }
 0x759   :  { %v6284_v24 = vpop.eup %6283  ;;  %v2597_v54 = vld [vmem:[#allocation11 + $0x3b8] sm:$0xff] }
 0x75a   :  { %v6286_v27 = vpop.eup %6285  ;;  %v2457_v2 = vrot.slane %v6284_v24, %v2432_v12  ;;  %v2467_v29 = vsel %vm2466_vm8, %v2445_v23, %v2465_v26  ;;  %v2544_v23 = vld [vmem:[#allocation11 + $0x210] sm:$0xff]  ;;  %v2557_v26 = vld [vmem:[#allocation11 + $0x278] sm:$0xff]  ;;  %v5567_v55 = vpack.c.bf16 %v2597_v54, %v2593_v53 }
 0x75b   :  { %v2461_v51 = vrot.slane %v6286_v27, %v2432_v12  ;;  %v2469_v30 = vsel %vm2468_vm9, %v2449_v25, %v2467_v29  ;;  %v2541_v12 = vld [vmem:[#allocation11 + $0x1f8] sm:$0xff]  ;;  %v2548_v24 = vld [vmem:[#allocation11 + $0x230] sm:$0xff] }
 0x75c   :  { %v2471_v31 = vsel %vm2470_vm10, %v2453_v28, %v2469_v30  ;;  %v5539_v11 = vpack.c.bf16 %v2541_v12, %v2537_v10  ;;  %v2553_v25 = vld [vmem:[#allocation11 + $0x258] sm:$0xff]  ;;  %v5545_v27 = vpack.c.bf16 %v2548_v24, %v2544_v23  ;;  %v2556_v29 = vld [vmem:[#allocation11 + $0x270] sm:$0xff] }
 0x75d   :  { %v2473_v21 = vsel %vm2472_vm11, %v2457_v2, %v2471_v31  ;;  %v5547_v28 = vpack.c.bf16 %v2557_v26, %v2553_v25  ;;  %v2552_v2 = vld [vmem:[#allocation11 + $0x250] sm:$0xff]  ;;  %v2565_v30 = vld [vmem:[#allocation11 + $0x2b8] sm:$0xff] }
 0x75e   :  { %v2475_v32 = vsel %vm2474_vm12, %v2461_v51, %v2473_v21  ;;  %v2561_v51 = vld [vmem:[#allocation11 + $0x298] sm:$0xff]  ;;  %v5549_v31 = vpack.c.bf16 %v2556_v29, %v2552_v2  ;;  %v2877_v26 = vld [vmem:[#allocation13 + $0x190] sm:$0xff] }
 0x75f   :  { %2477 = vst.msk [vmem:[#allocation15] sm:$0xff] %vm190_vm1, %v2475_v32  ;;  %v5551_v21 = vpack.c.bf16 %v2565_v30, %v2561_v51  ;;  %v2560_v32 = vld [vmem:[#allocation11 + $0x290] sm:$0xff]  ;;  %v2601_v58 = vld [vmem:[#allocation11 + $0x3d8] sm:$0xff] }
 0x760   :  { %v5553_v35 = vpack.c.bf16 %v2564_v33, %v2560_v32  ;;  %v2605_v59 = vld [vmem:[#allocation11 + $0x3f8] sm:$0xff]  ;;  %v2893_v30 = vld [vmem:[#allocation13 + $0x210] sm:$0xff] }
 0x761   :  { %v5571_v61 = vpack.c.bf16 %v2605_v59, %v2601_v58  ;;  %v2830_v18 = vld [vmem:[#allocation13 + $0x18] sm:$0xff]  ;;  %v2957_v54 = vld [vmem:[#allocation13 + $0x410] sm:$0xff] }
 0x762   :  { %v2838_v3 = vld [vmem:[#allocation13 + $0x58] sm:$0xff]  ;;  %v2973_v59 = vld [vmem:[#allocation13 + $0x490] sm:$0xff] }
 0x763   :  { %v5703_v5 = vpack.c.bf16 %v2838_v3, %v2830_v18  ;;  %v2846_v8 = vld [vmem:[#allocation13 + $0x98] sm:$0xff]  ;;  %v2989_v18 = vld [vmem:[#allocation13 + $0x510] sm:$0xff] }
 0x764   :  { %v2854_v10 = vld [vmem:[#allocation13 + $0xd8] sm:$0xff]  ;;  %v2997_v3 = vld [vmem:[#allocation13 + $0x550] sm:$0xff] }
 0x765   :  { %v5707_v12 = vpack.c.bf16 %v2854_v10, %v2846_v8  ;;  %v2862_v16 = vld [vmem:[#allocation13 + $0x118] sm:$0xff]  ;;  %v3005_v8 = vld [vmem:[#allocation13 + $0x590] sm:$0xff] }
 0x766   :  { %v6828_v48 = vpop.f32.mrb[12].mxu0  ;;  %v2870_v17 = vld [vmem:[#allocation13 + $0x158] sm:$0xff]  ;;  %v3013_v10 = vld [vmem:[#allocation13 + $0x5d0] sm:$0xff] }
 0x767   :  { %v2674_v36 = vpop.f32.mrb[13].mxu0  ;;  %v5711_v19 = vpack.c.bf16 %v2870_v17, %v2862_v16  ;;  %v2878_v23 = vld [vmem:[#allocation13 + $0x198] sm:$0xff]  ;;  %v3021_v16 = vld [vmem:[#allocation13 + $0x610] sm:$0xff] }
 0x768   :  { %2741 = vmatprep.mubr.f32.mxu0 %v2674_v36  ;;  %v2886_v24 = vld [vmem:[#allocation13 + $0x1d8] sm:$0xff]  ;;  %v3029_v17 = vld [vmem:[#allocation13 + $0x650] sm:$0xff] }
 0x769   :  { %2742 = vmatmul.mubr.f32.vlgmr.msra.gmra.mrb[14].mxu0 %v6828_v48  ;;  %v5715_v25 = vpack.c.bf16 %v2886_v24, %v2878_v23  ;;  %v2894_v2 = vld [vmem:[#allocation13 + $0x218] sm:$0xff]  ;;  %v3037_v23 = vld [vmem:[#allocation13 + $0x690] sm:$0xff] }
 0x76a   :  { %5514 = vmatpush1.bf16.msra.mxu0 %v5513_v9  ;;  %2812 = vmatprep.mubr.f32.mxu0 %v2674_v36  ;;  %v5555_v9 = vpack.c.bf16 %v2573_v34, %v2569_v22  ;;  %v2568_v36 = vld [vmem:[#allocation11 + $0x2d0] sm:$0xff]  ;;  %v2902_v29 = vld [vmem:[#allocation13 + $0x258] sm:$0xff] }
 0x76b   :  { %5516 = vmatprep.subr.bf16.mxu0 %v5515_v13  ;;  %v2572_v13 = vld [vmem:[#allocation11 + $0x2f0] sm:$0xff]  ;;  %v5719_v51 = vpack.c.bf16 %v2902_v29, %v2894_v2  ;;  %v2910_v32 = vld [vmem:[#allocation13 + $0x298] sm:$0xff] }
 0x76c   :  { %v5557_v41 = vpack.c.bf16 %v2572_v13, %v2568_v36  ;;  %v2918_v33 = vld [vmem:[#allocation13 + $0x2d8] sm:$0xff]  ;;  %v2909_v34 = vld [vmem:[#allocation13 + $0x290] sm:$0xff] }
 0x76d   :  { %v5723_v22 = vpack.c.bf16 %v2918_v33, %v2910_v32  ;;  %v2926_v36 = vld [vmem:[#allocation13 + $0x318] sm:$0xff]  ;;  %v3045_v24 = vld [vmem:[#allocation13 + $0x6d0] sm:$0xff] }
 0x76e   :  { %5518 = vmatpush1.bf16.msra.mxu0 %v5517_v44  ;;  %v2576_v44 = vld [vmem:[#allocation11 + $0x310] sm:$0xff]  ;;  %v2934_v13 = vld [vmem:[#allocation13 + $0x358] sm:$0xff] }
 0x76f   :  { %5520 = vmatprep.subr.bf16.mxu0 %v5519_v43  ;;  %v2580_v43 = vld [vmem:[#allocation11 + $0x330] sm:$0xff]  ;;  %v5727_v37 = vpack.c.bf16 %v2934_v13, %v2926_v36  ;;  %v3070_v33 = vld [vmem:[#allocation13 + $0x798] sm:$0xff] }
 0x770   :  { %v5561_v47 = vpack.c.bf16 %v2580_v43, %v2576_v44  ;;  %v2942_v44 = vld [vmem:[#allocation13 + $0x398] sm:$0xff]  ;;  %v3069_v36 = vld [vmem:[#allocation13 + $0x790] sm:$0xff] }
 0x771   :  { %v2950_v43 = vld [vmem:[#allocation13 + $0x3d8] sm:$0xff]  ;;  %v3077_v13 = vld [vmem:[#allocation13 + $0x7d0] sm:$0xff] }
 0x772   :  { %5522 = vmatpush1.bf16.msra.mxu0 %v5521_v50  ;;  %v2584_v50 = vld [vmem:[#allocation11 + $0x350] sm:$0xff]  ;;  %v5731_v46 = vpack.c.bf16 %v2950_v43, %v2942_v44  ;;  %v2828_v43 = vld [vmem:[#allocation13 + $0x8] sm:$0xff] }
 0x773   :  { %5524 = vmatprep.subr.bf16.mxu0 %v5523_v52  ;;  %v2588_v52 = vld [vmem:[#allocation11 + $0x370] sm:$0xff] }
 0x774   :  { %v5565_v38 = vpack.c.bf16 %v2588_v52, %v2584_v50  ;;  %v2958_v50 = vld [vmem:[#allocation13 + $0x418] sm:$0xff] }
 0x775   :  { %v2966_v52 = vld [vmem:[#allocation13 + $0x458] sm:$0xff] }
 0x776   :  { %5526 = vmatpush1.bf16.msra.mxu0 %v5525_v56  ;;  %v2592_v56 = vld [vmem:[#allocation11 + $0x390] sm:$0xff]  ;;  %v5735_v53 = vpack.c.bf16 %v2966_v52, %v2958_v50  ;;  %v2844_v50 = vld [vmem:[#allocation13 + $0x88] sm:$0xff] }
 0x777   :  { %5528 = vmatprep.subr.bf16.mxu0 %v5527_v57  ;;  %v2596_v57 = vld [vmem:[#allocation11 + $0x3b0] sm:$0xff]  ;;  %v2852_v52 = vld [vmem:[#allocation13 + $0xc8] sm:$0xff] }
 0x778   :  { %v5569_v60 = vpack.c.bf16 %v2596_v57, %v2592_v56  ;;  %v2974_v56 = vld [vmem:[#allocation13 + $0x498] sm:$0xff] }
 0x779   :  { %v2982_v57 = vld [vmem:[#allocation13 + $0x4d8] sm:$0xff] }
 0x77a   :  { %5530 = vmatpush1.bf16.msra.mxu0 %v5529_v62  ;;  %v2600_v62 = vld [vmem:[#allocation11 + $0x3d0] sm:$0xff]  ;;  %v5739_v58 = vpack.c.bf16 %v2982_v57, %v2974_v56  ;;  %v5579_v56 = vpack.c.bf16 %v2852_v52, %v2844_v50  ;;  %v2843_v57 = vld [vmem:[#allocation13 + $0x80] sm:$0xff] }
 0x77b   :  { %5532 = vmatprep.subr.bf16.mxu0 %v5531_v63  ;;  %v2604_v63 = vld [vmem:[#allocation11 + $0x3f0] sm:$0xff]  ;;  %v2987_v52 = vld [vmem:[#allocation13 + $0x500] sm:$0xff] }
 0x77c   :  { %v5573_v1 = vpack.c.bf16 %v2604_v63, %v2600_v62  ;;  %v2990_v62 = vld [vmem:[#allocation13 + $0x518] sm:$0xff] }
 0x77d   :  { %v2998_v63 = vld [vmem:[#allocation13 + $0x558] sm:$0xff] }
 0x77e   :  { %5534 = vmatpush1.bf16.msra.mxu0 %v5533_v4  ;;  %v2829_v4 = vld [vmem:[#allocation13 + $0x10] sm:$0xff] }
 0x77f   :  { %5536 = vmatprep.subr.bf16.mxu0 %v5535_v6  ;;  %v2837_v6 = vld [vmem:[#allocation13 + $0x50] sm:$0xff] }
 0x780   :  { %v5705_v7 = vpack.c.bf16 %v2837_v6, %v2829_v4  ;;  %v3006_v4 = vld [vmem:[#allocation13 + $0x598] sm:$0xff] }
 0x781   :  { %v3014_v6 = vld [vmem:[#allocation13 + $0x5d8] sm:$0xff] }
 0x782   :  { %5538 = vmatpush1.bf16.msra.mxu0 %v5537_v14  ;;  %v2845_v14 = vld [vmem:[#allocation13 + $0x90] sm:$0xff] }
 0x783   :  { %5540 = vmatprep.subr.bf16.mxu0 %v5539_v11  ;;  %v2853_v11 = vld [vmem:[#allocation13 + $0xd0] sm:$0xff] }
 0x784   :  { %v5709_v15 = vpack.c.bf16 %v2853_v11, %v2845_v14  ;;  %v3022_v14 = vld [vmem:[#allocation13 + $0x618] sm:$0xff] }
 0x785   :  { %v3030_v11 = vld [vmem:[#allocation13 + $0x658] sm:$0xff] }
 0x786   :  { %5542 = vmatpush1.bf16.msra.mxu0 %v5541_v45  ;;  %v2869_v45 = vld [vmem:[#allocation13 + $0x150] sm:$0xff] }
 0x787   :  { %5544 = vmatprep.subr.bf16.mxu0 %v5543_v20 }
 0x78a   :  { %5546 = vmatpush1.bf16.msra.mxu0 %v5545_v27  ;;  %v2885_v27 = vld [vmem:[#allocation13 + $0x1d0] sm:$0xff] }
 0x78b   :  { %5548 = vmatprep.subr.bf16.mxu0 %v5547_v28  ;;  %v5717_v28 = vpack.c.bf16 %v2885_v27, %v2877_v26  ;;  %v3054_v26 = vld [vmem:[#allocation13 + $0x718] sm:$0xff] }
 0x78c   :  { %v3062_v27 = vld [vmem:[#allocation13 + $0x758] sm:$0xff] }
 0x78e   :  { %5550 = vmatpush1.bf16.msra.mxu0 %v5549_v31  ;;  %v2901_v31 = vld [vmem:[#allocation13 + $0x250] sm:$0xff] }
 0x78f   :  { %5552 = vmatprep.subr.bf16.mxu0 %v5551_v21  ;;  %v5721_v21 = vpack.c.bf16 %v2901_v31, %v2893_v30  ;;  %v3053_v30 = vld [vmem:[#allocation13 + $0x710] sm:$0xff] }
 0x790   :  { %v3061_v31 = vld [vmem:[#allocation13 + $0x750] sm:$0xff] }
 0x791   :  { %v5761_v32 = vpack.c.bf16 %v3061_v31, %v3053_v30  ;;  %v3086_v30 = vld [vmem:[#allocation13 + $0x818] sm:$0xff] }
 0x792   :  { %5554 = vmatpush1.bf16.msra.mxu0 %v5553_v35  ;;  %v2917_v35 = vld [vmem:[#allocation13 + $0x2d0] sm:$0xff] }
 0x793   :  { %5556 = vmatprep.subr.bf16.mxu0 %v5555_v9  ;;  %v5725_v9 = vpack.c.bf16 %v2917_v35, %v2909_v34 }
 0x796   :  { %5558 = vmatpush1.bf16.msra.mxu0 %v5557_v41  ;;  %v2933_v41 = vld [vmem:[#allocation13 + $0x350] sm:$0xff] }
 0x797   :  { %5560 = vmatprep.subr.bf16.mxu0 %v5559_v42  ;;  %v5729_v42 = vpack.c.bf16 %v2933_v41, %v2925_v40  ;;  %v6288_v40 = vld [vmem:[#allocation2] sm:$0xff] }
 0x79a   :  { %5562 = vmatpush1.bf16.msra.mxu0 %v5561_v47  ;;  %v2949_v47 = vld [vmem:[#allocation13 + $0x3d0] sm:$0xff] }
 0x79b   :  { %5564 = vmatprep.subr.bf16.mxu0 %v5563_v49  ;;  %v5733_v49 = vpack.c.bf16 %v2949_v47, %v2941_v39  ;;  %v2827_v47 = vld [vmem:[#allocation13] sm:$0xff] }
 0x79e   :  { %5566 = vmatpush1.bf16.msra.mxu0 %v5565_v38  ;;  %v2965_v38 = vld [vmem:[#allocation13 + $0x450] sm:$0xff] }
 0x79f   :  { %5568 = vmatprep.subr.bf16.mxu0 %v5567_v55  ;;  %v5737_v55 = vpack.c.bf16 %v2965_v38, %v2957_v54 }
 0x7a2   :  { %5570 = vmatpush1.bf16.msra.mxu0 %v5569_v60  ;;  %v2981_v60 = vld [vmem:[#allocation13 + $0x4d0] sm:$0xff] }
 0x7a3   :  { %5572 = vmatprep.subr.bf16.mxu0 %v5571_v61  ;;  %v5741_v61 = vpack.c.bf16 %v2981_v60, %v2973_v59  ;;  %v2860_v59 = vld [vmem:[#allocation13 + $0x108] sm:$0xff] }
 0x7a4   :  { %v2868_v60 = vld [vmem:[#allocation13 + $0x148] sm:$0xff] }
 0x7a6   :  { %5574 = vmatpush1.bf16.msra.mxu0 %v5573_v1  ;;  %v5743_v1 = vpack.c.bf16 %v2998_v63, %v2990_v62  ;;  %v5583_v62 = vpack.c.bf16 %v2868_v60, %v2860_v59  ;;  %v2859_v63 = vld [vmem:[#allocation13 + $0x100] sm:$0xff]  ;;  %v3020_v59 = vld [vmem:[#allocation13 + $0x608] sm:$0xff] }
 0x7a7   :  { %5704 = vmatprep.subr.bf16.mxu0 %v5703_v5  ;;  %v5745_v5 = vpack.c.bf16 %v2997_v3, %v2989_v18  ;;  %v2876_v18 = vld [vmem:[#allocation13 + $0x188] sm:$0xff] }
 0x7a8   :  { %v2884_v3 = vld [vmem:[#allocation13 + $0x1c8] sm:$0xff] }
 0x7a9   :  { %2813 = vmatmul.mubr.f32.vlgmr.msra.gmra.mrb[16].mxu0 %v6828_v48  ;;  %v2861_v48 = vld [vmem:[#allocation13 + $0x110] sm:$0xff]  ;;  %v3028_v60 = vld [vmem:[#allocation13 + $0x648] sm:$0xff] }
 0x7aa   :  { %5706 = vmatpush1.bf16.msra.mxu0 %v5705_v7  ;;  %v5713_v20 = vpack.c.bf16 %v2869_v45, %v2861_v48  ;;  %v5747_v7 = vpack.c.bf16 %v3014_v6, %v3006_v4  ;;  %v3038_v48 = vld [vmem:[#allocation13 + $0x698] sm:$0xff]  ;;  %v5587_v4 = vpack.c.bf16 %v2884_v3, %v2876_v18  ;;  %v2875_v6 = vld [vmem:[#allocation13 + $0x180] sm:$0xff]  ;;  %v3036_v18 = vld [vmem:[#allocation13 + $0x688] sm:$0xff] }
 0x7ab   :  { %5708 = vmatprep.subr.bf16.mxu0 %v5707_v12  ;;  %v5749_v12 = vpack.c.bf16 %v3013_v10, %v3005_v8  ;;  %v3046_v45 = vld [vmem:[#allocation13 + $0x6d8] sm:$0xff]  ;;  %v2892_v8 = vld [vmem:[#allocation13 + $0x208] sm:$0xff] }
 0x7ac   :  { %v2900_v10 = vld [vmem:[#allocation13 + $0x248] sm:$0xff] }
 0x7ad   :  { %v3044_v3 = vld [vmem:[#allocation13 + $0x6c8] sm:$0xff] }
 0x7ae   :  { %5710 = vmatpush1.bf16.msra.mxu0 %v5709_v15  ;;  %v5751_v15 = vpack.c.bf16 %v3030_v11, %v3022_v14  ;;  %v5591_v14 = vpack.c.bf16 %v2900_v10, %v2892_v8  ;;  %v2891_v11 = vld [vmem:[#allocation13 + $0x200] sm:$0xff]  ;;  %v3052_v8 = vld [vmem:[#allocation13 + $0x708] sm:$0xff] }
 0x7af   :  { %5712 = vmatprep.subr.bf16.mxu0 %v5711_v19  ;;  %v5753_v19 = vpack.c.bf16 %v3029_v17, %v3021_v16  ;;  %v2908_v16 = vld [vmem:[#allocation13 + $0x288] sm:$0xff] }
 0x7b0   :  { %v2916_v17 = vld [vmem:[#allocation13 + $0x2c8] sm:$0xff] }
 0x7b1   :  { %v3060_v10 = vld [vmem:[#allocation13 + $0x748] sm:$0xff] }
 0x7b2   :  { %5714 = vmatpush1.bf16.msra.mxu0 %v5713_v20  ;;  %v5755_v20 = vpack.c.bf16 %v3046_v45, %v3038_v48  ;;  %v5595_v48 = vpack.c.bf16 %v2916_v17, %v2908_v16  ;;  %v2907_v45 = vld [vmem:[#allocation13 + $0x280] sm:$0xff]  ;;  %v3068_v16 = vld [vmem:[#allocation13 + $0x788] sm:$0xff] }
 0x7b3   :  { %5716 = vmatprep.subr.bf16.mxu0 %v5715_v25  ;;  %v5757_v25 = vpack.c.bf16 %v3045_v24, %v3037_v23  ;;  %v2924_v23 = vld [vmem:[#allocation13 + $0x308] sm:$0xff] }
 0x7b4   :  { %v2932_v24 = vld [vmem:[#allocation13 + $0x348] sm:$0xff] }
 0x7b5   :  { %v3076_v17 = vld [vmem:[#allocation13 + $0x7c8] sm:$0xff] }
 0x7b6   :  { %5718 = vmatpush1.bf16.msra.mxu0 %v5717_v28  ;;  %v5759_v28 = vpack.c.bf16 %v3062_v27, %v3054_v26  ;;  %v5599_v26 = vpack.c.bf16 %v2932_v24, %v2924_v23  ;;  %v2923_v27 = vld [vmem:[#allocation13 + $0x300] sm:$0xff]  ;;  %v3084_v23 = vld [vmem:[#allocation13 + $0x808] sm:$0xff] }
 0x7b7   :  { %5720 = vmatprep.subr.bf16.mxu0 %v5719_v51  ;;  %v3092_v24 = vld [vmem:[#allocation13 + $0x848] sm:$0xff] }
 0x7ba   :  { %5722 = vmatpush1.bf16.msra.mxu0 %v5721_v21 }
 0x7bb   :  { %5724 = vmatprep.subr.bf16.mxu0 %v5723_v22  ;;  %v3078_v22 = vld [vmem:[#allocation13 + $0x7d8] sm:$0xff] }
 0x7bc   :  { %v5763_v34 = vpack.c.bf16 %v3078_v22, %v3070_v33  ;;  %v3094_v33 = vld [vmem:[#allocation13 + $0x858] sm:$0xff]  ;;  %v2956_v22 = vld [vmem:[#allocation13 + $0x408] sm:$0xff] }
 0x7be   :  { %5726 = vmatpush1.bf16.msra.mxu0 %v5725_v9 }
 0x7bf   :  { %5728 = vmatprep.subr.bf16.mxu0 %v5727_v37  ;;  %v5765_v37 = vpack.c.bf16 %v3077_v13, %v3069_v36  ;;  %v2955_v13 = vld [vmem:[#allocation13 + $0x400] sm:$0xff] }
 0x7c2   :  { %5730 = vmatpush1.bf16.msra.mxu0 %v5729_v42 }
 0x7c3   :  { %5732 = vmatprep.subr.bf16.mxu0 %v5731_v46  ;;  %v2836_v46 = vld [vmem:[#allocation13 + $0x48] sm:$0xff] }
 0x7c4   :  { %v5575_v54 = vpack.c.bf16 %v2836_v46, %v2828_v43  ;;  %v2971_v43 = vld [vmem:[#allocation13 + $0x480] sm:$0xff] }
 0x7c5   :  { %v2979_v46 = vld [vmem:[#allocation13 + $0x4c0] sm:$0xff] }
 0x7c6   :  { %5734 = vmatpush1.bf16.msra.mxu0 %v5733_v49  ;;  %v2835_v49 = vld [vmem:[#allocation13 + $0x40] sm:$0xff] }
 0x7c7   :  { %5736 = vmatprep.subr.bf16.mxu0 %v5735_v53 }
 0x7ca   :  { %5738 = vmatpush1.bf16.msra.mxu0 %v5737_v55  ;;  %v5577_v55 = vpack.c.bf16 %v2835_v49, %v2827_v47  ;;  %v2996_v47 = vld [vmem:[#allocation13 + $0x548] sm:$0xff]  ;;  %v5613_v49 = vpack.c.bf16 %v2979_v46, %v2971_v43  ;;  %v3126_v43 = vld [vmem:[#allocation13 + $0x958] sm:$0xff] }
 0x7cb   :  { %5740 = vmatprep.subr.bf16.mxu0 %v5739_v58  ;;  %v2851_v58 = vld [vmem:[#allocation13 + $0xc0] sm:$0xff] }
 0x7ce   :  { %5742 = vmatpush1.bf16.msra.mxu0 %v5741_v61  ;;  %v5581_v61 = vpack.c.bf16 %v2851_v58, %v2843_v57  ;;  %v3003_v57 = vld [vmem:[#allocation13 + $0x580] sm:$0xff] }
 0x7cf   :  { %5744 = vmatprep.subr.bf16.mxu0 %v5743_v1  ;;  %v2867_v1 = vld [vmem:[#allocation13 + $0x140] sm:$0xff] }
 0x7d0   :  { %v3011_v58 = vld [vmem:[#allocation13 + $0x5c0] sm:$0xff] }
 0x7d2   :  { %5746 = vmatpush1.bf16.msra.mxu0 %v5745_v5  ;;  %v5585_v5 = vpack.c.bf16 %v2867_v1, %v2859_v63  ;;  %v3019_v63 = vld [vmem:[#allocation13 + $0x600] sm:$0xff] }
 0x7d3   :  { %5748 = vmatprep.subr.bf16.mxu0 %v5747_v7  ;;  %v2883_v7 = vld [vmem:[#allocation13 + $0x1c0] sm:$0xff] }
 0x7d4   :  { %v3027_v1 = vld [vmem:[#allocation13 + $0x640] sm:$0xff] }
 0x7d6   :  { %5750 = vmatpush1.bf16.msra.mxu0 %v5749_v12  ;;  %v5589_v12 = vpack.c.bf16 %v2883_v7, %v2875_v6  ;;  %v3035_v6 = vld [vmem:[#allocation13 + $0x680] sm:$0xff] }
 0x7d7   :  { %5752 = vmatprep.subr.bf16.mxu0 %v5751_v15  ;;  %v2899_v15 = vld [vmem:[#allocation13 + $0x240] sm:$0xff] }
 0x7d8   :  { %v3043_v7 = vld [vmem:[#allocation13 + $0x6c0] sm:$0xff] }
 0x7da   :  { %5754 = vmatpush1.bf16.msra.mxu0 %v5753_v19  ;;  %v5593_v19 = vpack.c.bf16 %v2899_v15, %v2891_v11  ;;  %v3051_v11 = vld [vmem:[#allocation13 + $0x700] sm:$0xff] }
 0x7db   :  { %5756 = vmatprep.subr.bf16.mxu0 %v5755_v20  ;;  %v2915_v20 = vld [vmem:[#allocation13 + $0x2c0] sm:$0xff] }
 0x7dc   :  { %v3059_v15 = vld [vmem:[#allocation13 + $0x740] sm:$0xff] }
 0x7de   :  { %5758 = vmatpush1.bf16.msra.mxu0 %v5757_v25  ;;  %v5597_v25 = vpack.c.bf16 %v2915_v20, %v2907_v45  ;;  %v3067_v45 = vld [vmem:[#allocation13 + $0x780] sm:$0xff] }
 0x7df   :  { %5760 = vmatprep.subr.bf16.mxu0 %v5759_v28  ;;  %v2931_v28 = vld [vmem:[#allocation13 + $0x340] sm:$0xff] }
 0x7e0   :  { %v3075_v20 = vld [vmem:[#allocation13 + $0x7c0] sm:$0xff] }
 0x7e2   :  { %5762 = vmatpush1.bf16.msra.mxu0 %v5761_v32  ;;  %v2947_v32 = vld [vmem:[#allocation13 + $0x3c0] sm:$0xff] }
 0x7e3   :  { %5764 = vmatprep.subr.bf16.mxu0 %v5763_v34  ;;  %v2964_v34 = vld [vmem:[#allocation13 + $0x448] sm:$0xff] }
 0x7e4   :  { %v5607_v36 = vpack.c.bf16 %v2964_v34, %v2956_v22  ;;  %v3099_v34 = vld [vmem:[#allocation13 + $0x880] sm:$0xff] }
 0x7e6   :  { %5766 = vmatpush1.bf16.msra.mxu0 %v5765_v37  ;;  %v2963_v37 = vld [vmem:[#allocation13 + $0x440] sm:$0xff] }
 0x83c   :  { %v2743_v2 = vpop.f32.mrb[14].mxu0 }
 0x83d   :  { %v2819_v29 = vmul.f32 0.01, %v2743_v2  ;;  %v2745_v51 = vpop.f32.mrb[15].mxu0 }
 0x83e   :  { %v2820_v21 = vmul.f32 0.01, %v2745_v51 }
 0x83f   :  { %v2823_v9 = vmax.f32 %v2743_v2, %v2819_v29  ;;  %v2940_v2 = vld [vmem:[#allocation13 + $0x388] sm:$0xff] }
 0x840   :  { %v2824_v35 = vmax.f32 %v2745_v51, %v2820_v21  ;;  %v2948_v29 = vld [vmem:[#allocation13 + $0x3c8] sm:$0xff]  ;;  %v5601_v51 = vpack.c.bf16 %v2931_v28, %v2923_v27  ;;  %v2939_v21 = vld [vmem:[#allocation13 + $0x380] sm:$0xff] }
 0x841   :  { %v5603_v31 = vpack.c.bf16 %v2948_v29, %v2940_v2  ;;  %v3083_v27 = vld [vmem:[#allocation13 + $0x800] sm:$0xff]  ;;  %v3085_v2 = vld [vmem:[#allocation13 + $0x810] sm:$0xff] }
 0x842   :  { %3339 = vmatprep.subr.mxu1 %v2824_v35  ;;  %v5767_v35 = vpack.c.bf16 %v3094_v33, %v3086_v30  ;;  %v3091_v28 = vld [vmem:[#allocation13 + $0x840] sm:$0xff]  ;;  %v3093_v29 = vld [vmem:[#allocation13 + $0x850] sm:$0xff]  ;;  %v3108_v30 = vld [vmem:[#allocation13 + $0x8c8] sm:$0xff] }
 0x843   :  { %3340 = vmatpush1.msra.mxu1 %v2823_v9  ;;  %v5605_v9 = vpack.c.bf16 %v2947_v32, %v2939_v21  ;;  %v3110_v21 = vld [vmem:[#allocation13 + $0x8d8] sm:$0xff]  ;;  %v5641_v33 = vpack.c.bf16 %v3091_v28, %v3083_v27  ;;  %v5769_v22 = vpack.c.bf16 %v3093_v29, %v3085_v2  ;;  %v3165_v28 = vld [vmem:[#allocation13 + $0xa90] sm:$0xff]  ;;  %v3180_v29 = vld [vmem:[#allocation13 + $0xb08] sm:$0xff] }
 0x844   :  { %4586 = vmatmul.mubr.msk.f32.vlgmr.msra.gmra.mrb[10].mxu1 %vm190_vm1, %v6288_v40  ;;  %5768 = vmatprep.subr.bf16.mxu0 %v5767_v35  ;;  %v3107_v35 = vld [vmem:[#allocation13 + $0x8c0] sm:$0xff]  ;;  %v3173_v2 = vld [vmem:[#allocation13 + $0xad0] sm:$0xff] }
 0x845   :  { %3474 = vmatprep.mubr.f32.mxu1 %v6513_v0  ;;  %v5645_v46 = vpack.c.bf16 %v3107_v35, %v3099_v34  ;;  %v3187_v34 = vld [vmem:[#allocation13 + $0xb40] sm:$0xff] }
 0x87c   :  { %v2814_v41 = vpop.f32.mrb[16].mxu0 }
 0x87d   :  { %v2821_v42 = vmul.f32 0.01, %v2814_v41  ;;  %v2816_v44 = vpop.f32.mrb[17].mxu0 }
 0x87e   :  { %v2822_v39 = vmul.f32 0.01, %v2816_v44 }
 0x87f   :  { %v2825_v38 = vmax.f32 %v2814_v41, %v2821_v42  ;;  %v2980_v41 = vld [vmem:[#allocation13 + $0x4c8] sm:$0xff]  ;;  %v5609_v42 = vpack.c.bf16 %v2963_v37, %v2955_v13  ;;  %v3101_v37 = vld [vmem:[#allocation13 + $0x890] sm:$0xff] }
 0x880   :  { %v2826_v53 = vmax.f32 %v2816_v44, %v2822_v39  ;;  %v2988_v39 = vld [vmem:[#allocation13 + $0x508] sm:$0xff] }
 0x881   :  { %v5615_v50 = vpack.c.bf16 %v2996_v47, %v2988_v39  ;;  %v3115_v47 = vld [vmem:[#allocation13 + $0x900] sm:$0xff] }
 0x882   :  { %3410 = vmatprep.subr.mxu1 %v2826_v53  ;;  %v2995_v53 = vld [vmem:[#allocation13 + $0x540] sm:$0xff] }
 0x883   :  { %3411 = vmatpush1.msra.mxu1 %v2825_v38  ;;  %v3012_v38 = vld [vmem:[#allocation13 + $0x5c8] sm:$0xff] }
 0x884   :  { %4587 = vmatmul.mubr.msk.f32.vlgmr.msra.gmra.mrb[12].mxu1 %vm190_vm1, %v6288_v40  ;;  %5576 = vmatprep.subr.bf16.mxu1 %v5575_v54  ;;  %v2972_v40 = vld [vmem:[#allocation13 + $0x488] sm:$0xff] }
 0x885   :  { %5578 = vmatpush1.bf16.msra.mxu1 %v5577_v55  ;;  %v5611_v44 = vpack.c.bf16 %v2980_v41, %v2972_v40  ;;  %v3004_v54 = vld [vmem:[#allocation13 + $0x588] sm:$0xff]  ;;  %v5617_v55 = vpack.c.bf16 %v2995_v53, %v2987_v52  ;;  %v3109_v40 = vld [vmem:[#allocation13 + $0x8d0] sm:$0xff] }
 0x886   :  { %5580 = vmatprep.subr.bf16.mxu1 %v5579_v56  ;;  %v5619_v56 = vpack.c.bf16 %v3012_v38, %v3004_v54  ;;  %v3116_v41 = vld [vmem:[#allocation13 + $0x908] sm:$0xff]  ;;  %v5773_v39 = vpack.c.bf16 %v3109_v40, %v3101_v37  ;;  %v3117_v53 = vld [vmem:[#allocation13 + $0x910] sm:$0xff] }
 0x887   :  { %v3125_v54 = vld [vmem:[#allocation13 + $0x950] sm:$0xff]  ;;  %v3132_v38 = vld [vmem:[#allocation13 + $0x988] sm:$0xff] }
 0x888   :  { %v3189_v37 = vld [vmem:[#allocation13 + $0xb50] sm:$0xff]  ;;  %v3196_v40 = vld [vmem:[#allocation13 + $0xb88] sm:$0xff] }
 0x889   :  { %5582 = vmatpush1.bf16.msra.mxu1 %v5581_v61  ;;  %v5621_v61 = vpack.c.bf16 %v3011_v58, %v3003_v57  ;;  %v3142_v57 = vld [vmem:[#allocation13 + $0x9d8] sm:$0xff] }
 0x88a   :  { %5584 = vmatprep.subr.bf16.mxu1 %v5583_v62  ;;  %v5623_v62 = vpack.c.bf16 %v3028_v60, %v3020_v59  ;;  %v5777_v59 = vpack.c.bf16 %v3125_v54, %v3117_v53  ;;  %v3131_v60 = vld [vmem:[#allocation13 + $0x980] sm:$0xff]  ;;  %v3205_v53 = vld [vmem:[#allocation13 + $0xbd0] sm:$0xff]  ;;  %v3212_v54 = vld [vmem:[#allocation13 + $0xc08] sm:$0xff] }
 0x88d   :  { %5586 = vmatpush1.bf16.msra.mxu1 %v5585_v5  ;;  %v5625_v5 = vpack.c.bf16 %v3027_v1, %v3019_v63  ;;  %v3133_v1 = vld [vmem:[#allocation13 + $0x990] sm:$0xff] }
 0x88e   :  { %5588 = vmatprep.subr.bf16.mxu1 %v5587_v4  ;;  %v5627_v4 = vpack.c.bf16 %v3044_v3, %v3036_v18  ;;  %v3141_v18 = vld [vmem:[#allocation13 + $0x9d0] sm:$0xff]  ;;  %v3148_v3 = vld [vmem:[#allocation13 + $0xa08] sm:$0xff] }
 0x891   :  { %5590 = vmatpush1.bf16.msra.mxu1 %v5589_v12  ;;  %v5629_v12 = vpack.c.bf16 %v3043_v7, %v3035_v6  ;;  %v3158_v6 = vld [vmem:[#allocation13 + $0xa58] sm:$0xff] }
 0x892   :  { %5592 = vmatprep.subr.bf16.mxu1 %v5591_v14  ;;  %v5631_v14 = vpack.c.bf16 %v3060_v10, %v3052_v8  ;;  %v5781_v8 = vpack.c.bf16 %v3141_v18, %v3133_v1  ;;  %v3147_v10 = vld [vmem:[#allocation13 + $0xa00] sm:$0xff]  ;;  %v3221_v1 = vld [vmem:[#allocation13 + $0xc50] sm:$0xff]  ;;  %v3228_v18 = vld [vmem:[#allocation13 + $0xc88] sm:$0xff] }
 0x895   :  { %5594 = vmatpush1.bf16.msra.mxu1 %v5593_v19  ;;  %v5633_v19 = vpack.c.bf16 %v3059_v15, %v3051_v11  ;;  %v3149_v15 = vld [vmem:[#allocation13 + $0xa10] sm:$0xff] }
 0x896   :  { %5596 = vmatprep.subr.bf16.mxu1 %v5595_v48  ;;  %v5635_v48 = vpack.c.bf16 %v3076_v17, %v3068_v16  ;;  %v3157_v16 = vld [vmem:[#allocation13 + $0xa50] sm:$0xff]  ;;  %v3164_v17 = vld [vmem:[#allocation13 + $0xa88] sm:$0xff] }
 0x899   :  { %5598 = vmatpush1.bf16.msra.mxu1 %v5597_v25  ;;  %v5637_v25 = vpack.c.bf16 %v3075_v20, %v3067_v45  ;;  %v3174_v45 = vld [vmem:[#allocation13 + $0xad8] sm:$0xff] }
 0x89a   :  { %5600 = vmatprep.subr.bf16.mxu1 %v5599_v26  ;;  %v5639_v26 = vpack.c.bf16 %v3092_v24, %v3084_v23  ;;  %v5785_v23 = vpack.c.bf16 %v3157_v16, %v3149_v15  ;;  %v3163_v24 = vld [vmem:[#allocation13 + $0xa80] sm:$0xff]  ;;  %v3237_v15 = vld [vmem:[#allocation13 + $0xcd0] sm:$0xff]  ;;  %v3244_v16 = vld [vmem:[#allocation13 + $0xd08] sm:$0xff] }
 0x89d   :  { %5602 = vmatpush1.bf16.msra.mxu1 %v5601_v51  ;;  %v3100_v51 = vld [vmem:[#allocation13 + $0x888] sm:$0xff] }
 0x89e   :  { %5604 = vmatprep.subr.bf16.mxu1 %v5603_v31  ;;  %v3102_v31 = vld [vmem:[#allocation13 + $0x898] sm:$0xff] }
 0x89f   :  { %v5771_v13 = vpack.c.bf16 %v3110_v21, %v3102_v31  ;;  %v3190_v31 = vld [vmem:[#allocation13 + $0xb58] sm:$0xff] }
 0x8a1   :  { %5606 = vmatpush1.bf16.msra.mxu1 %v5605_v9 }
 0x8a2   :  { %5608 = vmatprep.subr.bf16.mxu1 %v5607_v36  ;;  %v5643_v36 = vpack.c.bf16 %v3108_v30, %v3100_v51  ;;  %v3188_v51 = vld [vmem:[#allocation13 + $0xb48] sm:$0xff]  ;;  %v3182_v30 = vld [vmem:[#allocation13 + $0xb18] sm:$0xff] }
 0x8a3   :  { %v5663_v35 = vpack.c.bf16 %v3188_v51, %v3180_v29  ;;  %v3268_v29 = vld [vmem:[#allocation13 + $0xdc8] sm:$0xff]  ;;  %v3262_v51 = vld [vmem:[#allocation13 + $0xd98] sm:$0xff] }
 0x8a5   :  { %5610 = vmatpush1.bf16.msra.mxu1 %v5609_v42  ;;  %v3124_v42 = vld [vmem:[#allocation13 + $0x948] sm:$0xff] }
 0x8a6   :  { %5612 = vmatprep.subr.bf16.mxu1 %v5611_v44  ;;  %v3118_v44 = vld [vmem:[#allocation13 + $0x918] sm:$0xff] }
 0x8a7   :  { %v5775_v52 = vpack.c.bf16 %v3126_v43, %v3118_v44  ;;  %v3206_v44 = vld [vmem:[#allocation13 + $0xbd8] sm:$0xff] }
 0x8a9   :  { %5614 = vmatpush1.bf16.msra.mxu1 %v5613_v49  ;;  %v3123_v49 = vld [vmem:[#allocation13 + $0x940] sm:$0xff] }
 0x8aa   :  { %5616 = vmatprep.subr.bf16.mxu1 %v5615_v50  ;;  %v5647_v50 = vpack.c.bf16 %v3124_v42, %v3116_v41  ;;  %v5649_v58 = vpack.c.bf16 %v3123_v49, %v3115_v47  ;;  %v3204_v41 = vld [vmem:[#allocation13 + $0xbc8] sm:$0xff]  ;;  %v3198_v42 = vld [vmem:[#allocation13 + $0xb98] sm:$0xff]  ;;  %v3203_v47 = vld [vmem:[#allocation13 + $0xbc0] sm:$0xff] }
 0x8ab   :  { %v5667_v49 = vpack.c.bf16 %v3204_v41, %v3196_v40  ;;  %v3284_v40 = vld [vmem:[#allocation13 + $0xe48] sm:$0xff]  ;;  %v3278_v41 = vld [vmem:[#allocation13 + $0xe18] sm:$0xff] }
 0x8ad   :  { %5618 = vmatpush1.bf16.msra.mxu1 %v5617_v55  ;;  %v3140_v55 = vld [vmem:[#allocation13 + $0x9c8] sm:$0xff] }
 0x8ae   :  { %5620 = vmatprep.subr.bf16.mxu1 %v5619_v56  ;;  %v3134_v56 = vld [vmem:[#allocation13 + $0x998] sm:$0xff] }
 0x8af   :  { %v5779_v63 = vpack.c.bf16 %v3142_v57, %v3134_v56  ;;  %v3222_v56 = vld [vmem:[#allocation13 + $0xc58] sm:$0xff] }
 0x8b1   :  { %5622 = vmatpush1.bf16.msra.mxu1 %v5621_v61  ;;  %v3139_v61 = vld [vmem:[#allocation13 + $0x9c0] sm:$0xff] }
 0x8b2   :  { %5624 = vmatprep.subr.bf16.mxu1 %v5623_v62  ;;  %v5651_v62 = vpack.c.bf16 %v3140_v55, %v3132_v38  ;;  %v5653_v7 = vpack.c.bf16 %v3139_v61, %v3131_v60  ;;  %v3220_v38 = vld [vmem:[#allocation13 + $0xc48] sm:$0xff]  ;;  %v3214_v55 = vld [vmem:[#allocation13 + $0xc18] sm:$0xff]  ;;  %v3219_v60 = vld [vmem:[#allocation13 + $0xc40] sm:$0xff] }
 0x8b3   :  { %v5671_v61 = vpack.c.bf16 %v3220_v38, %v3212_v54  ;;  %v3300_v54 = vld [vmem:[#allocation13 + $0xec8] sm:$0xff]  ;;  %v3294_v38 = vld [vmem:[#allocation13 + $0xe98] sm:$0xff] }
 0x8b5   :  { %5626 = vmatpush1.bf16.msra.mxu1 %v5625_v5  ;;  %v3156_v5 = vld [vmem:[#allocation13 + $0xa48] sm:$0xff] }
 0x8b6   :  { %5628 = vmatprep.subr.bf16.mxu1 %v5627_v4  ;;  %v3150_v4 = vld [vmem:[#allocation13 + $0xa18] sm:$0xff] }
 0x8b7   :  { %v5783_v11 = vpack.c.bf16 %v3158_v6, %v3150_v4  ;;  %v3238_v4 = vld [vmem:[#allocation13 + $0xcd8] sm:$0xff] }
 0x8b9   :  { %5630 = vmatpush1.bf16.msra.mxu1 %v5629_v12  ;;  %v3155_v12 = vld [vmem:[#allocation13 + $0xa40] sm:$0xff] }
 0x8ba   :  { %5632 = vmatprep.subr.bf16.mxu1 %v5631_v14  ;;  %v5655_v14 = vpack.c.bf16 %v3156_v5, %v3148_v3  ;;  %v5657_v20 = vpack.c.bf16 %v3155_v12, %v3147_v10  ;;  %v3236_v3 = vld [vmem:[#allocation13 + $0xcc8] sm:$0xff]  ;;  %v3230_v5 = vld [vmem:[#allocation13 + $0xc98] sm:$0xff]  ;;  %v3235_v10 = vld [vmem:[#allocation13 + $0xcc0] sm:$0xff] }
 0x8bb   :  { %v5675_v12 = vpack.c.bf16 %v3236_v3, %v3228_v18  ;;  %v3316_v18 = vld [vmem:[#allocation13 + $0xf48] sm:$0xff]  ;;  %v3310_v3 = vld [vmem:[#allocation13 + $0xf18] sm:$0xff] }
 0x8bd   :  { %5634 = vmatpush1.bf16.msra.mxu1 %v5633_v19  ;;  %v3172_v19 = vld [vmem:[#allocation13 + $0xac8] sm:$0xff] }
 0x8be   :  { %5636 = vmatprep.subr.bf16.mxu1 %v5635_v48  ;;  %v3166_v48 = vld [vmem:[#allocation13 + $0xa98] sm:$0xff] }
 0x8bf   :  { %v5787_v27 = vpack.c.bf16 %v3174_v45, %v3166_v48  ;;  %v3254_v48 = vld [vmem:[#allocation13 + $0xd58] sm:$0xff] }
 0x8c1   :  { %5638 = vmatpush1.bf16.msra.mxu1 %v5637_v25  ;;  %v3171_v25 = vld [vmem:[#allocation13 + $0xac0] sm:$0xff] }
 0x8c2   :  { %5640 = vmatprep.subr.bf16.mxu1 %v5639_v26  ;;  %v5659_v26 = vpack.c.bf16 %v3172_v19, %v3164_v17  ;;  %v5661_v21 = vpack.c.bf16 %v3171_v25, %v3163_v24  ;;  %v3252_v17 = vld [vmem:[#allocation13 + $0xd48] sm:$0xff]  ;;  %v3246_v19 = vld [vmem:[#allocation13 + $0xd18] sm:$0xff]  ;;  %v3251_v24 = vld [vmem:[#allocation13 + $0xd40] sm:$0xff] }
 0x8c3   :  { %v5679_v25 = vpack.c.bf16 %v3252_v17, %v3244_v16  ;;  %v3332_v16 = vld [vmem:[#allocation13 + $0xfc8] sm:$0xff]  ;;  %v3326_v17 = vld [vmem:[#allocation13 + $0xf98] sm:$0xff] }
 0x917   :  { %v6835_v32 = vpop.f32.mrb[10].mxu1 }
 0x918   :  { %v6837_v9 = vpop.f32.mrb[11].mxu1 }
 0x919   :  { %3545 = vmatprep.mubr.f32.mxu1 %v6837_v9  ;;  %3687 = vmatprep.mubr.f32.mxu0 %v6837_v9 }
 0x91a   :  { %3546 = vmatmul.mubr.f32.vlgmr.msra.gmra.mrb[14].mxu1 %v6835_v32  ;;  %3688 = vmatmul.mubr.f32.vlgmr.msra.gmra.mrb[18].mxu0 %v6835_v32 }
 0x91b   :  { %5642 = vmatpush1.bf16.msra.mxu1 %v5641_v33  ;;  %5770 = vmatpush1.bf16.msra.mxu0 %v5769_v22  ;;  %v5789_v33 = vpack.c.bf16 %v3173_v2, %v3165_v28  ;;  %v3179_v22 = vld [vmem:[#allocation13 + $0xb00] sm:$0xff]  ;;  %v3253_v28 = vld [vmem:[#allocation13 + $0xd50] sm:$0xff]  ;;  %v3260_v2 = vld [vmem:[#allocation13 + $0xd88] sm:$0xff] }
 0x91c   :  { %5644 = vmatprep.subr.bf16.mxu1 %v5643_v36  ;;  %5772 = vmatprep.subr.bf16.mxu0 %v5771_v13  ;;  %v5791_v36 = vpack.c.bf16 %v3190_v31, %v3182_v30  ;;  %v3181_v13 = vld [vmem:[#allocation13 + $0xb10] sm:$0xff]  ;;  %v5665_v43 = vpack.c.bf16 %v3187_v34, %v3179_v22  ;;  %v3270_v30 = vld [vmem:[#allocation13 + $0xdd8] sm:$0xff]  ;;  %v3267_v22 = vld [vmem:[#allocation13 + $0xdc0] sm:$0xff]  ;;  %v5683_v34 = vpack.c.bf16 %v3268_v29, %v3260_v2 }
 0x91d   :  { %v2840_v2 = vld [vmem:[#allocation13 + $0x68] sm:$0xff]  ;;  %v2834_v29 = vld [vmem:[#allocation13 + $0x38] sm:$0xff] }
 0x91f   :  { %5646 = vmatpush1.bf16.msra.mxu1 %v5645_v46  ;;  %5774 = vmatpush1.bf16.msra.mxu0 %v5773_v39  ;;  %v5793_v46 = vpack.c.bf16 %v3189_v37, %v3181_v13  ;;  %v3195_v39 = vld [vmem:[#allocation13 + $0xb80] sm:$0xff]  ;;  %v3269_v13 = vld [vmem:[#allocation13 + $0xdd0] sm:$0xff]  ;;  %v3276_v37 = vld [vmem:[#allocation13 + $0xe08] sm:$0xff] }
 0x920   :  { %5648 = vmatprep.subr.bf16.mxu1 %v5647_v50  ;;  %5776 = vmatprep.subr.bf16.mxu0 %v5775_v52  ;;  %v5795_v50 = vpack.c.bf16 %v3206_v44, %v3198_v42  ;;  %v3197_v52 = vld [vmem:[#allocation13 + $0xb90] sm:$0xff]  ;;  %v5669_v57 = vpack.c.bf16 %v3203_v47, %v3195_v39  ;;  %v3286_v42 = vld [vmem:[#allocation13 + $0xe58] sm:$0xff]  ;;  %v3283_v39 = vld [vmem:[#allocation13 + $0xe40] sm:$0xff]  ;;  %v5687_v47 = vpack.c.bf16 %v3284_v40, %v3276_v37 }
 0x921   :  { %v2856_v37 = vld [vmem:[#allocation13 + $0xe8] sm:$0xff]  ;;  %v2850_v40 = vld [vmem:[#allocation13 + $0xb8] sm:$0xff] }
 0x923   :  { %5650 = vmatpush1.bf16.msra.mxu1 %v5649_v58  ;;  %5778 = vmatpush1.bf16.msra.mxu0 %v5777_v59  ;;  %v5797_v58 = vpack.c.bf16 %v3205_v53, %v3197_v52  ;;  %v3211_v59 = vld [vmem:[#allocation13 + $0xc00] sm:$0xff]  ;;  %v3285_v52 = vld [vmem:[#allocation13 + $0xe50] sm:$0xff]  ;;  %v3292_v53 = vld [vmem:[#allocation13 + $0xe88] sm:$0xff] }
 0x924   :  { %5652 = vmatprep.subr.bf16.mxu1 %v5651_v62  ;;  %5780 = vmatprep.subr.bf16.mxu0 %v5779_v63  ;;  %v5799_v62 = vpack.c.bf16 %v3222_v56, %v3214_v55  ;;  %v3213_v63 = vld [vmem:[#allocation13 + $0xc10] sm:$0xff]  ;;  %v5673_v6 = vpack.c.bf16 %v3219_v60, %v3211_v59  ;;  %v3302_v55 = vld [vmem:[#allocation13 + $0xed8] sm:$0xff]  ;;  %v3299_v59 = vld [vmem:[#allocation13 + $0xec0] sm:$0xff]  ;;  %v5691_v60 = vpack.c.bf16 %v3300_v54, %v3292_v53 }
 0x925   :  { %v2857_v53 = vld [vmem:[#allocation13 + $0xf0] sm:$0xff]  ;;  %v2864_v54 = vld [vmem:[#allocation13 + $0x128] sm:$0xff] }
 0x927   :  { %5654 = vmatpush1.bf16.msra.mxu1 %v5653_v7  ;;  %5782 = vmatpush1.bf16.msra.mxu0 %v5781_v8  ;;  %v5801_v7 = vpack.c.bf16 %v3221_v1, %v3213_v63  ;;  %v3227_v8 = vld [vmem:[#allocation13 + $0xc80] sm:$0xff]  ;;  %v3301_v63 = vld [vmem:[#allocation13 + $0xed0] sm:$0xff]  ;;  %v3308_v1 = vld [vmem:[#allocation13 + $0xf08] sm:$0xff] }
 0x928   :  { %5656 = vmatprep.subr.bf16.mxu1 %v5655_v14  ;;  %5784 = vmatprep.subr.bf16.mxu0 %v5783_v11  ;;  %v5803_v14 = vpack.c.bf16 %v3238_v4, %v3230_v5  ;;  %v3229_v11 = vld [vmem:[#allocation13 + $0xc90] sm:$0xff]  ;;  %v5677_v45 = vpack.c.bf16 %v3235_v10, %v3227_v8  ;;  %v3318_v5 = vld [vmem:[#allocation13 + $0xf58] sm:$0xff]  ;;  %v3315_v8 = vld [vmem:[#allocation13 + $0xf40] sm:$0xff]  ;;  %v5695_v10 = vpack.c.bf16 %v3316_v18, %v3308_v1 }
 0x929   :  { %v2873_v1 = vld [vmem:[#allocation13 + $0x170] sm:$0xff]  ;;  %v2880_v18 = vld [vmem:[#allocation13 + $0x1a8] sm:$0xff] }
 0x92b   :  { %5658 = vmatpush1.bf16.msra.mxu1 %v5657_v20  ;;  %5786 = vmatpush1.bf16.msra.mxu0 %v5785_v23  ;;  %v5805_v20 = vpack.c.bf16 %v3237_v15, %v3229_v11  ;;  %v3243_v23 = vld [vmem:[#allocation13 + $0xd00] sm:$0xff]  ;;  %v3317_v11 = vld [vmem:[#allocation13 + $0xf50] sm:$0xff]  ;;  %v3324_v15 = vld [vmem:[#allocation13 + $0xf88] sm:$0xff] }
 0x92c   :  { %5660 = vmatprep.subr.bf16.mxu1 %v5659_v26  ;;  %5788 = vmatprep.subr.bf16.mxu0 %v5787_v27  ;;  %v5807_v26 = vpack.c.bf16 %v3254_v48, %v3246_v19  ;;  %v3245_v27 = vld [vmem:[#allocation13 + $0xd10] sm:$0xff]  ;;  %v5681_v31 = vpack.c.bf16 %v3251_v24, %v3243_v23  ;;  %v3334_v19 = vld [vmem:[#allocation13 + $0xfd8] sm:$0xff]  ;;  %v3331_v23 = vld [vmem:[#allocation13 + $0xfc0] sm:$0xff]  ;;  %v5699_v24 = vpack.c.bf16 %v3332_v16, %v3324_v15 }
 0x92d   :  { %v2896_v15 = vld [vmem:[#allocation13 + $0x228] sm:$0xff] }
 0x92e   :  { %v2904_v16 = vld [vmem:[#allocation13 + $0x268] sm:$0xff] }
 0x92f   :  { %5662 = vmatpush1.bf16.msra.mxu1 %v5661_v21  ;;  %5790 = vmatpush1.bf16.msra.mxu0 %v5789_v33  ;;  %v5809_v21 = vpack.c.bf16 %v3253_v28, %v3245_v27  ;;  %v3259_v33 = vld [vmem:[#allocation13 + $0xd80] sm:$0xff]  ;;  %v3333_v27 = vld [vmem:[#allocation13 + $0xfd0] sm:$0xff]  ;;  %v2832_v28 = vld [vmem:[#allocation13 + $0x28] sm:$0xff] }
 0x930   :  { %5664 = vmatprep.subr.bf16.mxu1 %v5663_v35  ;;  %5792 = vmatprep.subr.bf16.mxu0 %v5791_v36  ;;  %v5811_v35 = vpack.c.bf16 %v3270_v30, %v3262_v51  ;;  %v3261_v36 = vld [vmem:[#allocation13 + $0xd90] sm:$0xff]  ;;  %v5685_v44 = vpack.c.bf16 %v3267_v22, %v3259_v33  ;;  %v2842_v51 = vld [vmem:[#allocation13 + $0x78] sm:$0xff]  ;;  %v2831_v22 = vld [vmem:[#allocation13 + $0x20] sm:$0xff] }
 0x931   :  { %v5959_v33 = vpack.c.bf16 %v2842_v51, %v2834_v29  ;;  %v2914_v29 = vld [vmem:[#allocation13 + $0x2b8] sm:$0xff] }
 0x932   :  { %v2922_v51 = vld [vmem:[#allocation13 + $0x2f8] sm:$0xff] }
 0x933   :  { %5666 = vmatpush1.bf16.msra.mxu1 %v5665_v43  ;;  %5794 = vmatpush1.bf16.msra.mxu0 %v5793_v46  ;;  %v5813_v43 = vpack.c.bf16 %v3269_v13, %v3261_v36  ;;  %v3275_v46 = vld [vmem:[#allocation13 + $0xe00] sm:$0xff]  ;;  %v2841_v36 = vld [vmem:[#allocation13 + $0x70] sm:$0xff]  ;;  %v2848_v13 = vld [vmem:[#allocation13 + $0xa8] sm:$0xff] }
 0x934   :  { %5668 = vmatprep.subr.bf16.mxu1 %v5667_v49  ;;  %5796 = vmatprep.subr.bf16.mxu0 %v5795_v50  ;;  %v5815_v49 = vpack.c.bf16 %v3286_v42, %v3278_v41  ;;  %v3277_v50 = vld [vmem:[#allocation13 + $0xe10] sm:$0xff]  ;;  %v5689_v56 = vpack.c.bf16 %v3283_v39, %v3275_v46  ;;  %v2858_v41 = vld [vmem:[#allocation13 + $0xf8] sm:$0xff]  ;;  %v2847_v39 = vld [vmem:[#allocation13 + $0xa0] sm:$0xff] }
 0x937   :  { %5670 = vmatpush1.bf16.msra.mxu1 %v5669_v57  ;;  %5798 = vmatpush1.bf16.msra.mxu0 %v5797_v58  ;;  %v5817_v57 = vpack.c.bf16 %v3285_v52, %v3277_v50  ;;  %v3291_v58 = vld [vmem:[#allocation13 + $0xe80] sm:$0xff]  ;;  %v5835_v50 = vpack.c.bf16 %v2856_v37, %v2848_v13  ;;  %v5963_v52 = vpack.c.bf16 %v2858_v41, %v2850_v40  ;;  %v2928_v13 = vld [vmem:[#allocation13 + $0x328] sm:$0xff]  ;;  %v2930_v40 = vld [vmem:[#allocation13 + $0x338] sm:$0xff] }
 0x938   :  { %5672 = vmatprep.subr.bf16.mxu1 %v5671_v61  ;;  %5800 = vmatprep.subr.bf16.mxu0 %v5799_v62  ;;  %v5819_v61 = vpack.c.bf16 %v3302_v55, %v3294_v38  ;;  %v3293_v62 = vld [vmem:[#allocation13 + $0xe90] sm:$0xff]  ;;  %v5693_v4 = vpack.c.bf16 %v3299_v59, %v3291_v58  ;;  %v2872_v38 = vld [vmem:[#allocation13 + $0x168] sm:$0xff]  ;;  %v2866_v55 = vld [vmem:[#allocation13 + $0x138] sm:$0xff] }
 0x939   :  { %v5839_v59 = vpack.c.bf16 %v2872_v38, %v2864_v54  ;;  %v2936_v37 = vld [vmem:[#allocation13 + $0x368] sm:$0xff]  ;;  %v2938_v41 = vld [vmem:[#allocation13 + $0x378] sm:$0xff] }
 0x93a   :  { %v2944_v54 = vld [vmem:[#allocation13 + $0x3a8] sm:$0xff] }
 0x93b   :  { %5674 = vmatpush1.bf16.msra.mxu1 %v5673_v6  ;;  %5802 = vmatpush1.bf16.msra.mxu0 %v5801_v7  ;;  %v5821_v6 = vpack.c.bf16 %v3301_v63, %v3293_v62  ;;  %v3307_v7 = vld [vmem:[#allocation13 + $0xf00] sm:$0xff]  ;;  %v2865_v62 = vld [vmem:[#allocation13 + $0x130] sm:$0xff]  ;;  %v2952_v38 = vld [vmem:[#allocation13 + $0x3e8] sm:$0xff] }
 0x93c   :  { %5676 = vmatprep.subr.bf16.mxu1 %v5675_v12  ;;  %5804 = vmatprep.subr.bf16.mxu0 %v5803_v14  ;;  %v5823_v12 = vpack.c.bf16 %v3318_v5, %v3310_v3  ;;  %v3309_v14 = vld [vmem:[#allocation13 + $0xf10] sm:$0xff]  ;;  %v5697_v48 = vpack.c.bf16 %v3315_v8, %v3307_v7  ;;  %v2888_v3 = vld [vmem:[#allocation13 + $0x1e8] sm:$0xff]  ;;  %v2882_v5 = vld [vmem:[#allocation13 + $0x1b8] sm:$0xff]  ;;  %v5969_v7 = vpack.c.bf16 %v2873_v1, %v2865_v62 }
 0x93d   :  { %v5843_v8 = vpack.c.bf16 %v2888_v3, %v2880_v18  ;;  %v2945_v62 = vld [vmem:[#allocation13 + $0x3b0] sm:$0xff]  ;;  %v2960_v18 = vld [vmem:[#allocation13 + $0x428] sm:$0xff] }
 0x93e   :  { %v2953_v1 = vld [vmem:[#allocation13 + $0x3f0] sm:$0xff]  ;;  %v2968_v3 = vld [vmem:[#allocation13 + $0x468] sm:$0xff] }
 0x93f   :  { %5678 = vmatpush1.bf16.msra.mxu1 %v5677_v45  ;;  %5806 = vmatpush1.bf16.msra.mxu0 %v5805_v20  ;;  %v5825_v45 = vpack.c.bf16 %v3317_v11, %v3309_v14  ;;  %v3323_v20 = vld [vmem:[#allocation13 + $0xf80] sm:$0xff]  ;;  %v2889_v11 = vld [vmem:[#allocation13 + $0x1f0] sm:$0xff] }
 0x940   :  { %5680 = vmatprep.subr.bf16.mxu1 %v5679_v25  ;;  %5808 = vmatprep.subr.bf16.mxu0 %v5807_v26  ;;  %v5827_v25 = vpack.c.bf16 %v3334_v19, %v3326_v17  ;;  %v3325_v26 = vld [vmem:[#allocation13 + $0xf90] sm:$0xff]  ;;  %v5701_v30 = vpack.c.bf16 %v3331_v23, %v3323_v20  ;;  %v2898_v17 = vld [vmem:[#allocation13 + $0x238] sm:$0xff]  ;;  %v5847_v20 = vpack.c.bf16 %v2904_v16, %v2896_v15  ;;  %v2895_v23 = vld [vmem:[#allocation13 + $0x220] sm:$0xff] }
 0x941   :  { %v2906_v19 = vld [vmem:[#allocation13 + $0x278] sm:$0xff]  ;;  %v2976_v15 = vld [vmem:[#allocation13 + $0x4a8] sm:$0xff] }
 0x942   :  { %v2984_v16 = vld [vmem:[#allocation13 + $0x4e8] sm:$0xff] }
 0x943   :  { %5682 = vmatpush1.bf16.msra.mxu1 %v5681_v31  ;;  %5810 = vmatpush1.bf16.msra.mxu0 %v5809_v21  ;;  %v5829_v31 = vpack.c.bf16 %v3333_v27, %v3325_v26  ;;  %v5831_v21 = vpack.c.bf16 %v2840_v2, %v2832_v28  ;;  %v5975_v26 = vpack.c.bf16 %v2906_v19, %v2898_v17  ;;  %v2905_v27 = vld [vmem:[#allocation13 + $0x270] sm:$0xff]  ;;  %v2912_v28 = vld [vmem:[#allocation13 + $0x2a8] sm:$0xff]  ;;  %v2978_v17 = vld [vmem:[#allocation13 + $0x4b8] sm:$0xff] }
 0x944   :  { %5684 = vmatprep.subr.bf16.mxu1 %v5683_v34  ;;  %5812 = vmatprep.subr.bf16.mxu0 %v5811_v35  ;;  %v2839_v34 = vld [vmem:[#allocation13 + $0x60] sm:$0xff]  ;;  %v2833_v35 = vld [vmem:[#allocation13 + $0x30] sm:$0xff]  ;;  %v2920_v2 = vld [vmem:[#allocation13 + $0x2e8] sm:$0xff] }
 0x945   :  { %v5961_v46 = vpack.c.bf16 %v2841_v36, %v2833_v35  ;;  %v5979_v35 = vpack.c.bf16 %v2922_v51, %v2914_v29  ;;  %v2921_v36 = vld [vmem:[#allocation13 + $0x2f0] sm:$0xff]  ;;  %v2986_v19 = vld [vmem:[#allocation13 + $0x4f8] sm:$0xff] }
 0x946   :  { %v2994_v29 = vld [vmem:[#allocation13 + $0x538] sm:$0xff] }
 0x947   :  { %5686 = vmatpush1.bf16.msra.mxu1 %v5685_v44  ;;  %5814 = vmatpush1.bf16.msra.mxu0 %v5813_v43  ;;  %v5833_v44 = vpack.c.bf16 %v2839_v34, %v2831_v22  ;;  %v2919_v22 = vld [vmem:[#allocation13 + $0x2e0] sm:$0xff]  ;;  %v2913_v34 = vld [vmem:[#allocation13 + $0x2b0] sm:$0xff]  ;;  %v3002_v51 = vld [vmem:[#allocation13 + $0x578] sm:$0xff] }
 0x948   :  { %5688 = vmatprep.subr.bf16.mxu1 %v5687_v47  ;;  %5816 = vmatprep.subr.bf16.mxu0 %v5815_v49  ;;  %v2855_v47 = vld [vmem:[#allocation13 + $0xe0] sm:$0xff]  ;;  %v2849_v49 = vld [vmem:[#allocation13 + $0xb0] sm:$0xff] }
 0x949   :  { %v5965_v58 = vpack.c.bf16 %v2857_v53, %v2849_v49  ;;  %v2935_v49 = vld [vmem:[#allocation13 + $0x360] sm:$0xff]  ;;  %v2937_v53 = vld [vmem:[#allocation13 + $0x370] sm:$0xff] }
 0x94b   :  { %5690 = vmatpush1.bf16.msra.mxu1 %v5689_v56  ;;  %5818 = vmatpush1.bf16.msra.mxu0 %v5817_v57  ;;  %v2874_v56 = vld [vmem:[#allocation13 + $0x178] sm:$0xff]  ;;  %v5837_v57 = vpack.c.bf16 %v2855_v47, %v2847_v39  ;;  %v5855_v39 = vpack.c.bf16 %v2936_v37, %v2928_v13  ;;  %v2927_v47 = vld [vmem:[#allocation13 + $0x320] sm:$0xff]  ;;  %v3008_v13 = vld [vmem:[#allocation13 + $0x5a8] sm:$0xff] }
 0x94c   :  { %5692 = vmatprep.subr.bf16.mxu1 %v5691_v60  ;;  %5820 = vmatprep.subr.bf16.mxu0 %v5819_v61  ;;  %v2863_v60 = vld [vmem:[#allocation13 + $0x120] sm:$0xff]  ;;  %v5967_v63 = vpack.c.bf16 %v2874_v56, %v2866_v55  ;;  %v2946_v55 = vld [vmem:[#allocation13 + $0x3b8] sm:$0xff]  ;;  %v3016_v37 = vld [vmem:[#allocation13 + $0x5e8] sm:$0xff] }
 0x94d   :  { %v2871_v61 = vld [vmem:[#allocation13 + $0x160] sm:$0xff]  ;;  %v2954_v56 = vld [vmem:[#allocation13 + $0x3f8] sm:$0xff] }
 0x94f   :  { %5694 = vmatpush1.bf16.msra.mxu1 %v5693_v4  ;;  %5822 = vmatpush1.bf16.msra.mxu0 %v5821_v6  ;;  %v2890_v4 = vld [vmem:[#allocation13 + $0x1f8] sm:$0xff]  ;;  %v5841_v6 = vpack.c.bf16 %v2871_v61, %v2863_v60  ;;  %v2943_v60 = vld [vmem:[#allocation13 + $0x3a0] sm:$0xff] }
 0x950   :  { %5696 = vmatprep.subr.bf16.mxu1 %v5695_v10  ;;  %5824 = vmatprep.subr.bf16.mxu0 %v5823_v12  ;;  %v2887_v10 = vld [vmem:[#allocation13 + $0x1e0] sm:$0xff]  ;;  %v2881_v12 = vld [vmem:[#allocation13 + $0x1b0] sm:$0xff]  ;;  %v5971_v14 = vpack.c.bf16 %v2890_v4, %v2882_v5  ;;  %v2962_v5 = vld [vmem:[#allocation13 + $0x438] sm:$0xff] }
 0x951   :  { %v2951_v61 = vld [vmem:[#allocation13 + $0x3e0] sm:$0xff]  ;;  %v2970_v4 = vld [vmem:[#allocation13 + $0x478] sm:$0xff] }
 0x953   :  { %5698 = vmatpush1.bf16.msra.mxu1 %v5697_v48  ;;  %5826 = vmatpush1.bf16.msra.mxu0 %v5825_v45  ;;  %v5973_v45 = vpack.c.bf16 %v2889_v11, %v2881_v12  ;;  %v2961_v12 = vld [vmem:[#allocation13 + $0x430] sm:$0xff] }
 0x954   :  { %5700 = vmatprep.subr.bf16.mxu1 %v5699_v24  ;;  %5828 = vmatprep.subr.bf16.mxu0 %v5827_v25  ;;  %v2903_v24 = vld [vmem:[#allocation13 + $0x260] sm:$0xff]  ;;  %v2897_v25 = vld [vmem:[#allocation13 + $0x230] sm:$0xff] }
 0x955   :  { %v2969_v11 = vld [vmem:[#allocation13 + $0x470] sm:$0xff] }
 0x957   :  { %v6843_v42 = vpop.f32.mrb[12].mxu1  ;;  %5702 = vmatpush1.bf16.msra.mxu1 %v5701_v30  ;;  %5830 = vmatpush1.bf16.msra.mxu0 %v5829_v31  ;;  %v5849_v30 = vpack.c.bf16 %v2903_v24, %v2895_v23  ;;  %v5977_v31 = vpack.c.bf16 %v2905_v27, %v2897_v25  ;;  %v2975_v23 = vld [vmem:[#allocation13 + $0x4a0] sm:$0xff]  ;;  %v2977_v25 = vld [vmem:[#allocation13 + $0x4b0] sm:$0xff] }
 0x958   :  { %v6845_v43 = vpop.f32.mrb[13].mxu1  ;;  %5832 = vmatprep.subr.bf16.mxu1 %v5831_v21  ;;  %5960 = vmatprep.subr.bf16.mxu0 %v5959_v33  ;;  %v5851_v21 = vpack.c.bf16 %v2920_v2, %v2912_v28  ;;  %v2911_v33 = vld [vmem:[#allocation13 + $0x2a0] sm:$0xff]  ;;  %v2985_v27 = vld [vmem:[#allocation13 + $0x4f0] sm:$0xff]  ;;  %v2992_v28 = vld [vmem:[#allocation13 + $0x528] sm:$0xff] }
 0x959   :  { %3616 = vmatprep.mubr.f32.mxu1 %v6845_v43  ;;  %3758 = vmatprep.mubr.f32.mxu0 %v6845_v43  ;;  %v2983_v24 = vld [vmem:[#allocation13 + $0x4e0] sm:$0xff]  ;;  %v3000_v2 = vld [vmem:[#allocation13 + $0x568] sm:$0xff] }
 0x95a   :  { %3617 = vmatmul.mubr.f32.vlgmr.msra.gmra.mrb[14].mxu1 %v6843_v42  ;;  %3759 = vmatmul.mubr.f32.vlgmr.msra.gmra.mrb[18].mxu0 %v6843_v42 }
 0x95b   :  { %5834 = vmatpush1.bf16.msra.mxu1 %v5833_v44  ;;  %3829 = vmatprep.mubr.f32.mxu1 %v6837_v9  ;;  %v5853_v44 = vpack.c.bf16 %v2919_v22, %v2911_v33  ;;  %v2991_v33 = vld [vmem:[#allocation13 + $0x520] sm:$0xff] }
 0x95c   :  { %5962 = vmatpush1.bf16.msra.mxu0 %v5961_v46  ;;  %3971 = vmatprep.mubr.f32.mxu0 %v6837_v9  ;;  %v2879_v9 = vld [vmem:[#allocation13 + $0x1a0] sm:$0xff]  ;;  %v5981_v46 = vpack.c.bf16 %v2921_v36, %v2913_v34  ;;  %v2993_v34 = vld [vmem:[#allocation13 + $0x530] sm:$0xff] }
 0x95d   :  { %5836 = vmatprep.subr.bf16.mxu1 %v5835_v50  ;;  %5964 = vmatprep.subr.bf16.mxu0 %v5963_v52  ;;  %v5845_v48 = vpack.c.bf16 %v2887_v10, %v2879_v9  ;;  %v2929_v50 = vld [vmem:[#allocation13 + $0x330] sm:$0xff]  ;;  %v5983_v52 = vpack.c.bf16 %v2938_v41, %v2930_v40  ;;  %v2959_v9 = vld [vmem:[#allocation13 + $0x420] sm:$0xff]  ;;  %v3010_v40 = vld [vmem:[#allocation13 + $0x5b8] sm:$0xff] }
 0x95e   :  { %v2967_v10 = vld [vmem:[#allocation13 + $0x460] sm:$0xff]  ;;  %v3001_v36 = vld [vmem:[#allocation13 + $0x570] sm:$0xff]  ;;  %v3018_v41 = vld [vmem:[#allocation13 + $0x5f8] sm:$0xff] }
 0x95f   :  { %5838 = vmatpush1.bf16.msra.mxu1 %v5837_v57  ;;  %v5857_v57 = vpack.c.bf16 %v2935_v49, %v2927_v47  ;;  %v2999_v22 = vld [vmem:[#allocation13 + $0x560] sm:$0xff] }
 0x960   :  { %5966 = vmatpush1.bf16.msra.mxu0 %v5965_v58  ;;  %5840 = vmatprep.subr.bf16.mxu1 %v5839_v59  ;;  %v5985_v58 = vpack.c.bf16 %v2937_v53, %v2929_v50  ;;  %v5859_v59 = vpack.c.bf16 %v2952_v38, %v2944_v54  ;;  %v3007_v47 = vld [vmem:[#allocation13 + $0x5a0] sm:$0xff]  ;;  %v3009_v50 = vld [vmem:[#allocation13 + $0x5b0] sm:$0xff]  ;;  %v3024_v54 = vld [vmem:[#allocation13 + $0x628] sm:$0xff] }
 0x961   :  { %5968 = vmatprep.subr.bf16.mxu0 %v5967_v63  ;;  %v5987_v63 = vpack.c.bf16 %v2954_v56, %v2946_v55  ;;  %v3015_v49 = vld [vmem:[#allocation13 + $0x5e0] sm:$0xff]  ;;  %v3017_v53 = vld [vmem:[#allocation13 + $0x5f0] sm:$0xff]  ;;  %v3032_v38 = vld [vmem:[#allocation13 + $0x668] sm:$0xff] }
 0x962   :  { %v3026_v55 = vld [vmem:[#allocation13 + $0x638] sm:$0xff] }
 0x963   :  { %5842 = vmatpush1.bf16.msra.mxu1 %v5841_v6  ;;  %v5861_v6 = vpack.c.bf16 %v2951_v61, %v2943_v60  ;;  %v3034_v56 = vld [vmem:[#allocation13 + $0x678] sm:$0xff]  ;;  %v3023_v60 = vld [vmem:[#allocation13 + $0x620] sm:$0xff] }
 0x964   :  { %5970 = vmatpush1.bf16.msra.mxu0 %v5969_v7  ;;  %5844 = vmatprep.subr.bf16.mxu1 %v5843_v8  ;;  %v5989_v7 = vpack.c.bf16 %v2953_v1, %v2945_v62  ;;  %v5863_v8 = vpack.c.bf16 %v2968_v3, %v2960_v18  ;;  %v3031_v61 = vld [vmem:[#allocation13 + $0x660] sm:$0xff]  ;;  %v3025_v62 = vld [vmem:[#allocation13 + $0x630] sm:$0xff]  ;;  %v3040_v18 = vld [vmem:[#allocation13 + $0x6a8] sm:$0xff] }
 0x965   :  { %5972 = vmatprep.subr.bf16.mxu0 %v5971_v14  ;;  %v5991_v14 = vpack.c.bf16 %v2970_v4, %v2962_v5  ;;  %v3033_v1 = vld [vmem:[#allocation13 + $0x670] sm:$0xff]  ;;  %v3048_v3 = vld [vmem:[#allocation13 + $0x6e8] sm:$0xff]  ;;  %v3042_v5 = vld [vmem:[#allocation13 + $0x6b8] sm:$0xff] }
 0x966   :  { %v3050_v4 = vld [vmem:[#allocation13 + $0x6f8] sm:$0xff] }
 0x967   :  { %5846 = vmatpush1.bf16.msra.mxu1 %v5845_v48  ;;  %v5865_v48 = vpack.c.bf16 %v2967_v10, %v2959_v9  ;;  %v3039_v9 = vld [vmem:[#allocation13 + $0x6a0] sm:$0xff] }
 0x968   :  { %5974 = vmatpush1.bf16.msra.mxu0 %v5973_v45  ;;  %5848 = vmatprep.subr.bf16.mxu1 %v5847_v20  ;;  %v5993_v45 = vpack.c.bf16 %v2969_v11, %v2961_v12  ;;  %v5867_v20 = vpack.c.bf16 %v2984_v16, %v2976_v15  ;;  %v3047_v10 = vld [vmem:[#allocation13 + $0x6e0] sm:$0xff]  ;;  %v3041_v12 = vld [vmem:[#allocation13 + $0x6b0] sm:$0xff]  ;;  %v3056_v15 = vld [vmem:[#allocation13 + $0x728] sm:$0xff] }
 0x969   :  { %5976 = vmatprep.subr.bf16.mxu0 %v5975_v26  ;;  %v5995_v26 = vpack.c.bf16 %v2986_v19, %v2978_v17  ;;  %v3049_v11 = vld [vmem:[#allocation13 + $0x6f0] sm:$0xff]  ;;  %v3064_v16 = vld [vmem:[#allocation13 + $0x768] sm:$0xff]  ;;  %v3058_v17 = vld [vmem:[#allocation13 + $0x738] sm:$0xff] }
 0x96a   :  { %v3066_v19 = vld [vmem:[#allocation13 + $0x778] sm:$0xff] }
 0x96b   :  { %5850 = vmatpush1.bf16.msra.mxu1 %v5849_v30  ;;  %v5869_v30 = vpack.c.bf16 %v2983_v24, %v2975_v23  ;;  %v3055_v23 = vld [vmem:[#allocation13 + $0x720] sm:$0xff] }
 0x96c   :  { %5978 = vmatpush1.bf16.msra.mxu0 %v5977_v31  ;;  %5852 = vmatprep.subr.bf16.mxu1 %v5851_v21  ;;  %v5997_v31 = vpack.c.bf16 %v2985_v27, %v2977_v25  ;;  %v5871_v21 = vpack.c.bf16 %v3000_v2, %v2992_v28  ;;  %v3063_v24 = vld [vmem:[#allocation13 + $0x760] sm:$0xff]  ;;  %v3057_v25 = vld [vmem:[#allocation13 + $0x730] sm:$0xff]  ;;  %v3072_v28 = vld [vmem:[#allocation13 + $0x7a8] sm:$0xff] }
 0x96d   :  { %5980 = vmatprep.subr.bf16.mxu0 %v5979_v35  ;;  %v5999_v35 = vpack.c.bf16 %v3002_v51, %v2994_v29  ;;  %v3065_v27 = vld [vmem:[#allocation13 + $0x770] sm:$0xff]  ;;  %v3080_v2 = vld [vmem:[#allocation13 + $0x7e8] sm:$0xff]  ;;  %v3074_v29 = vld [vmem:[#allocation13 + $0x7b8] sm:$0xff] }
 0x96e   :  { %v3082_v51 = vld [vmem:[#allocation13 + $0x7f8] sm:$0xff] }
 0x96f   :  { %5854 = vmatpush1.bf16.msra.mxu1 %v5853_v44  ;;  %v5873_v44 = vpack.c.bf16 %v2999_v22, %v2991_v33  ;;  %v3071_v33 = vld [vmem:[#allocation13 + $0x7a0] sm:$0xff] }
 0x970   :  { %5982 = vmatpush1.bf16.msra.mxu0 %v5981_v46  ;;  %5856 = vmatprep.subr.bf16.mxu1 %v5855_v39  ;;  %v6001_v46 = vpack.c.bf16 %v3001_v36, %v2993_v34  ;;  %v5875_v39 = vpack.c.bf16 %v3016_v37, %v3008_v13  ;;  %v3079_v22 = vld [vmem:[#allocation13 + $0x7e0] sm:$0xff]  ;;  %v3073_v34 = vld [vmem:[#allocation13 + $0x7b0] sm:$0xff]  ;;  %v3088_v13 = vld [vmem:[#allocation13 + $0x828] sm:$0xff] }
 0x971   :  { %5984 = vmatprep.subr.bf16.mxu0 %v5983_v52  ;;  %v6003_v52 = vpack.c.bf16 %v3018_v41, %v3010_v40  ;;  %v3081_v36 = vld [vmem:[#allocation13 + $0x7f0] sm:$0xff]  ;;  %v3096_v37 = vld [vmem:[#allocation13 + $0x868] sm:$0xff]  ;;  %v3090_v40 = vld [vmem:[#allocation13 + $0x838] sm:$0xff] }
 0x972   :  { %v3098_v41 = vld [vmem:[#allocation13 + $0x878] sm:$0xff] }
 0x973   :  { %5858 = vmatpush1.bf16.msra.mxu1 %v5857_v57  ;;  %v5877_v57 = vpack.c.bf16 %v3015_v49, %v3007_v47  ;;  %v3087_v47 = vld [vmem:[#allocation13 + $0x820] sm:$0xff] }
 0x974   :  { %5986 = vmatpush1.bf16.msra.mxu0 %v5985_v58  ;;  %5860 = vmatprep.subr.bf16.mxu1 %v5859_v59  ;;  %v6005_v58 = vpack.c.bf16 %v3017_v53, %v3009_v50  ;;  %v5879_v59 = vpack.c.bf16 %v3032_v38, %v3024_v54  ;;  %v3095_v49 = vld [vmem:[#allocation13 + $0x860] sm:$0xff]  ;;  %v6023_v50 = vpack.c.bf16 %v3098_v41, %v3090_v40  ;;  %v3097_v53 = vld [vmem:[#allocation13 + $0x870] sm:$0xff]  ;;  %v3104_v54 = vld [vmem:[#allocation13 + $0x8a8] sm:$0xff] }
 0x975   :  { %5988 = vmatprep.subr.bf16.mxu0 %v5987_v63  ;;  %v6007_v63 = vpack.c.bf16 %v3034_v56, %v3026_v55  ;;  %v3112_v38 = vld [vmem:[#allocation13 + $0x8e8] sm:$0xff]  ;;  %v5897_v55 = vpack.c.bf16 %v3095_v49, %v3087_v47  ;;  %v3106_v56 = vld [vmem:[#allocation13 + $0x8b8] sm:$0xff]  ;;  %v3169_v47 = vld [vmem:[#allocation13 + $0xab0] sm:$0xff] }
 0x977   :  { %5862 = vmatpush1.bf16.msra.mxu1 %v5861_v6  ;;  %v5881_v6 = vpack.c.bf16 %v3031_v61, %v3023_v60  ;;  %v3111_v60 = vld [vmem:[#allocation13 + $0x8e0] sm:$0xff]  ;;  %v3105_v61 = vld [vmem:[#allocation13 + $0x8b0] sm:$0xff] }
 0x978   :  { %5990 = vmatpush1.bf16.msra.mxu0 %v5989_v7  ;;  %5864 = vmatprep.subr.bf16.mxu1 %v5863_v8  ;;  %v6009_v7 = vpack.c.bf16 %v3033_v1, %v3025_v62  ;;  %v5883_v8 = vpack.c.bf16 %v3048_v3, %v3040_v18  ;;  %v5899_v62 = vpack.c.bf16 %v3112_v38, %v3104_v54  ;;  %v3120_v1 = vld [vmem:[#allocation13 + $0x928] sm:$0xff]  ;;  %v3186_v54 = vld [vmem:[#allocation13 + $0xb38] sm:$0xff] }
 0x979   :  { %5992 = vmatprep.subr.bf16.mxu0 %v5991_v14  ;;  %v6011_v14 = vpack.c.bf16 %v3050_v4, %v3042_v5  ;;  %v3128_v18 = vld [vmem:[#allocation13 + $0x968] sm:$0xff]  ;;  %v3122_v5 = vld [vmem:[#allocation13 + $0x938] sm:$0xff] }
 0x97a   :  { %v3130_v4 = vld [vmem:[#allocation13 + $0x978] sm:$0xff] }
 0x97b   :  { %5866 = vmatpush1.bf16.msra.mxu1 %v5865_v48  ;;  %v5885_v48 = vpack.c.bf16 %v3047_v10, %v3039_v9  ;;  %v3119_v9 = vld [vmem:[#allocation13 + $0x920] sm:$0xff]  ;;  %v3194_v38 = vld [vmem:[#allocation13 + $0xb78] sm:$0xff] }
 0x97c   :  { %5994 = vmatpush1.bf16.msra.mxu0 %v5993_v45  ;;  %5868 = vmatprep.subr.bf16.mxu1 %v5867_v20  ;;  %v6013_v45 = vpack.c.bf16 %v3049_v11, %v3041_v12  ;;  %v5887_v20 = vpack.c.bf16 %v3064_v16, %v3056_v15  ;;  %v3127_v10 = vld [vmem:[#allocation13 + $0x960] sm:$0xff]  ;;  %v3121_v12 = vld [vmem:[#allocation13 + $0x930] sm:$0xff]  ;;  %v3136_v15 = vld [vmem:[#allocation13 + $0x9a8] sm:$0xff] }
 0x97d   :  { %5996 = vmatprep.subr.bf16.mxu0 %v5995_v26  ;;  %v6015_v26 = vpack.c.bf16 %v3066_v19, %v3058_v17  ;;  %v3129_v11 = vld [vmem:[#allocation13 + $0x970] sm:$0xff]  ;;  %v3144_v16 = vld [vmem:[#allocation13 + $0x9e8] sm:$0xff]  ;;  %v3138_v17 = vld [vmem:[#allocation13 + $0x9b8] sm:$0xff]  ;;  %v5905_v19 = vpack.c.bf16 %v3127_v10, %v3119_v9 }
 0x97e   :  { %v3201_v9 = vld [vmem:[#allocation13 + $0xbb0] sm:$0xff] }
 0x97f   :  { %5870 = vmatpush1.bf16.msra.mxu1 %v5869_v30  ;;  %v5889_v30 = vpack.c.bf16 %v3063_v24, %v3055_v23  ;;  %v3143_v23 = vld [vmem:[#allocation13 + $0x9e0] sm:$0xff]  ;;  %v3137_v24 = vld [vmem:[#allocation13 + $0x9b0] sm:$0xff] }
 0x980   :  { %5998 = vmatpush1.bf16.msra.mxu0 %v5997_v31  ;;  %5872 = vmatprep.subr.bf16.mxu1 %v5871_v21  ;;  %v6017_v31 = vpack.c.bf16 %v3065_v27, %v3057_v25  ;;  %v5891_v21 = vpack.c.bf16 %v3080_v2, %v3072_v28  ;;  %v3160_v27 = vld [vmem:[#allocation13 + $0xa68] sm:$0xff]  ;;  %v3154_v28 = vld [vmem:[#allocation13 + $0xa38] sm:$0xff] }
 0x981   :  { %6000 = vmatprep.subr.bf16.mxu0 %v5999_v35  ;;  %v6019_v35 = vpack.c.bf16 %v3082_v51, %v3074_v29  ;;  %v3162_v2 = vld [vmem:[#allocation13 + $0xa78] sm:$0xff] }
 0x983   :  { %5874 = vmatpush1.bf16.msra.mxu1 %v5873_v44  ;;  %v5893_v44 = vpack.c.bf16 %v3079_v22, %v3071_v33  ;;  %v3153_v33 = vld [vmem:[#allocation13 + $0xa30] sm:$0xff]  ;;  %v6039_v22 = vpack.c.bf16 %v3162_v2, %v3154_v28 }
 0x984   :  { %6002 = vmatpush1.bf16.msra.mxu0 %v6001_v46  ;;  %5876 = vmatprep.subr.bf16.mxu1 %v5875_v39  ;;  %v6021_v46 = vpack.c.bf16 %v3081_v36, %v3073_v34  ;;  %v5895_v39 = vpack.c.bf16 %v3096_v37, %v3088_v13  ;;  %v3161_v34 = vld [vmem:[#allocation13 + $0xa70] sm:$0xff]  ;;  %v3176_v36 = vld [vmem:[#allocation13 + $0xae8] sm:$0xff]  ;;  %v3170_v13 = vld [vmem:[#allocation13 + $0xab8] sm:$0xff] }
 0x985   :  { %6004 = vmatprep.subr.bf16.mxu0 %v6003_v52  ;;  %v3089_v52 = vld [vmem:[#allocation13 + $0x830] sm:$0xff]  ;;  %v3178_v37 = vld [vmem:[#allocation13 + $0xaf8] sm:$0xff]  ;;  %v6041_v41 = vpack.c.bf16 %v3161_v34, %v3153_v33  ;;  %v3256_v34 = vld [vmem:[#allocation13 + $0xd68] sm:$0xff] }
 0x986   :  { %v6043_v49 = vpack.c.bf16 %v3178_v37, %v3170_v13  ;;  %v3241_v33 = vld [vmem:[#allocation13 + $0xcf0] sm:$0xff] }
 0x987   :  { %5878 = vmatpush1.bf16.msra.mxu1 %v5877_v57  ;;  %v3114_v57 = vld [vmem:[#allocation13 + $0x8f8] sm:$0xff] }
 0x988   :  { %6006 = vmatpush1.bf16.msra.mxu0 %v6005_v58  ;;  %5880 = vmatprep.subr.bf16.mxu1 %v5879_v59  ;;  %v6025_v58 = vpack.c.bf16 %v3097_v53, %v3089_v52  ;;  %v3103_v59 = vld [vmem:[#allocation13 + $0x8a0] sm:$0xff]  ;;  %v6027_v3 = vpack.c.bf16 %v3114_v57, %v3106_v56  ;;  %v3184_v52 = vld [vmem:[#allocation13 + $0xb28] sm:$0xff] }
 0x989   :  { %6008 = vmatprep.subr.bf16.mxu0 %v6007_v63  ;;  %v3113_v63 = vld [vmem:[#allocation13 + $0x8f0] sm:$0xff]  ;;  %v3192_v53 = vld [vmem:[#allocation13 + $0xb68] sm:$0xff] }
 0x98a   :  { %v5919_v57 = vpack.c.bf16 %v3192_v53, %v3184_v52  ;;  %v3266_v52 = vld [vmem:[#allocation13 + $0xdb8] sm:$0xff] }
 0x98b   :  { %5882 = vmatpush1.bf16.msra.mxu1 %v5881_v6  ;;  %v5901_v6 = vpack.c.bf16 %v3111_v60, %v3103_v59  ;;  %v3191_v59 = vld [vmem:[#allocation13 + $0xb60] sm:$0xff]  ;;  %v3185_v60 = vld [vmem:[#allocation13 + $0xb30] sm:$0xff]  ;;  %v3274_v53 = vld [vmem:[#allocation13 + $0xdf8] sm:$0xff] }
 0x98c   :  { %6010 = vmatpush1.bf16.msra.mxu0 %v6009_v7  ;;  %5884 = vmatprep.subr.bf16.mxu1 %v5883_v8  ;;  %v6029_v7 = vpack.c.bf16 %v3113_v63, %v3105_v61  ;;  %v5903_v8 = vpack.c.bf16 %v3128_v18, %v3120_v1  ;;  %v6047_v61 = vpack.c.bf16 %v3194_v38, %v3186_v54  ;;  %v3200_v63 = vld [vmem:[#allocation13 + $0xba8] sm:$0xff]  ;;  %v3202_v18 = vld [vmem:[#allocation13 + $0xbb8] sm:$0xff] }
 0x98d   :  { %6012 = vmatprep.subr.bf16.mxu0 %v6011_v14  ;;  %v6031_v14 = vpack.c.bf16 %v3130_v4, %v3122_v5  ;;  %v3208_v1 = vld [vmem:[#allocation13 + $0xbe8] sm:$0xff] }
 0x98f   :  { %5886 = vmatpush1.bf16.msra.mxu1 %v5885_v48  ;;  %v6033_v48 = vpack.c.bf16 %v3129_v11, %v3121_v12  ;;  %v3209_v12 = vld [vmem:[#allocation13 + $0xbf0] sm:$0xff]  ;;  %v3224_v11 = vld [vmem:[#allocation13 + $0xc68] sm:$0xff] }
 0x990   :  { %6014 = vmatpush1.bf16.msra.mxu0 %v6013_v45  ;;  %5888 = vmatprep.subr.bf16.mxu1 %v5887_v20  ;;  %v5907_v45 = vpack.c.bf16 %v3144_v16, %v3136_v15  ;;  %v3135_v20 = vld [vmem:[#allocation13 + $0x9a0] sm:$0xff]  ;;  %v3218_v15 = vld [vmem:[#allocation13 + $0xc38] sm:$0xff] }
 0x991   :  { %6016 = vmatprep.subr.bf16.mxu0 %v6015_v26  ;;  %v3152_v26 = vld [vmem:[#allocation13 + $0xa28] sm:$0xff]  ;;  %v5909_v29 = vpack.c.bf16 %v3143_v23, %v3135_v20  ;;  %v3226_v16 = vld [vmem:[#allocation13 + $0xc78] sm:$0xff]  ;;  %v3217_v20 = vld [vmem:[#allocation13 + $0xc30] sm:$0xff] }
 0x992   :  { %v6055_v23 = vpack.c.bf16 %v3226_v16, %v3218_v15 }
 0x993   :  { %5890 = vmatpush1.bf16.msra.mxu1 %v5889_v30  ;;  %v5911_v30 = vpack.c.bf16 %v3160_v27, %v3152_v26  ;;  %v3234_v26 = vld [vmem:[#allocation13 + $0xcb8] sm:$0xff] }
 0x994   :  { %6018 = vmatpush1.bf16.msra.mxu0 %v6017_v31  ;;  %5892 = vmatprep.subr.bf16.mxu1 %v5891_v21  ;;  %v3151_v31 = vld [vmem:[#allocation13 + $0xa20] sm:$0xff]  ;;  %v3242_v27 = vld [vmem:[#allocation13 + $0xcf8] sm:$0xff] }
 0x995   :  { %6020 = vmatprep.subr.bf16.mxu0 %v6019_v35  ;;  %v3159_v21 = vld [vmem:[#allocation13 + $0xa60] sm:$0xff]  ;;  %v3168_v35 = vld [vmem:[#allocation13 + $0xaa8] sm:$0xff] }
 0x996   :  { %v5913_v40 = vpack.c.bf16 %v3159_v21, %v3151_v31  ;;  %v3233_v31 = vld [vmem:[#allocation13 + $0xcb0] sm:$0xff]  ;;  %v6059_v21 = vpack.c.bf16 %v3242_v27, %v3234_v26 }
 0x997   :  { %5894 = vmatpush1.bf16.msra.mxu1 %v5893_v44  ;;  %v5915_v44 = vpack.c.bf16 %v3176_v36, %v3168_v35  ;;  %v3250_v35 = vld [vmem:[#allocation13 + $0xd38] sm:$0xff]  ;;  %v6061_v37 = vpack.c.bf16 %v3241_v33, %v3233_v31  ;;  %v3321_v31 = vld [vmem:[#allocation13 + $0xf70] sm:$0xff]  ;;  %v3336_v33 = vld [vmem:[#allocation13 + $0xfe8] sm:$0xff] }
 0x998   :  { %6022 = vmatpush1.bf16.msra.mxu0 %v6021_v46  ;;  %5896 = vmatprep.subr.bf16.mxu1 %v5895_v39  ;;  %v3167_v46 = vld [vmem:[#allocation13 + $0xaa0] sm:$0xff]  ;;  %v3258_v36 = vld [vmem:[#allocation13 + $0xd78] sm:$0xff] }
 0x999   :  { %6024 = vmatprep.subr.bf16.mxu0 %v6023_v50  ;;  %v3175_v39 = vld [vmem:[#allocation13 + $0xae0] sm:$0xff]  ;;  %v3177_v50 = vld [vmem:[#allocation13 + $0xaf0] sm:$0xff] }
 0x99a   :  { %3830 = vmatmul.mubr.f32.vlgmr.msra.gmra.mrb[16].mxu1 %v6835_v32  ;;  %v6045_v56 = vpack.c.bf16 %v3177_v50, %v3169_v47  ;;  %v3257_v47 = vld [vmem:[#allocation13 + $0xd70] sm:$0xff]  ;;  %v3272_v50 = vld [vmem:[#allocation13 + $0xde8] sm:$0xff] }
 0x99b   :  { %3972 = vmatmul.mubr.f32.vlgmr.msra.gmra.mrb[20].mxu0 %v6835_v32  ;;  %5898 = vmatpush1.bf16.msra.mxu1 %v5897_v55  ;;  %v3146_v32 = vld [vmem:[#allocation13 + $0x9f8] sm:$0xff]  ;;  %v5917_v55 = vpack.c.bf16 %v3175_v39, %v3167_v46  ;;  %v3249_v46 = vld [vmem:[#allocation13 + $0xd30] sm:$0xff]  ;;  %v6063_v39 = vpack.c.bf16 %v3258_v36, %v3250_v35 }
 0x99c   :  { %3900 = vmatprep.mubr.f32.mxu1 %v6845_v43  ;;  %6026 = vmatpush1.bf16.msra.mxu0 %v6025_v58  ;;  %v6035_v25 = vpack.c.bf16 %v3146_v32, %v3138_v17  ;;  %v3183_v58 = vld [vmem:[#allocation13 + $0xb20] sm:$0xff]  ;;  %v6053_v32 = vpack.c.bf16 %v3209_v12, %v3201_v9  ;;  %v6065_v38 = vpack.c.bf16 %v3257_v47, %v3249_v46  ;;  %v3289_v9 = vld [vmem:[#allocation13 + $0xe70] sm:$0xff]  ;;  %v3304_v12 = vld [vmem:[#allocation13 + $0xee8] sm:$0xff] }
 0x99d   :  { %4042 = vmatprep.mubr.f32.mxu0 %v6845_v43  ;;  %5900 = vmatprep.subr.bf16.mxu1 %v5899_v62  ;;  %v3145_v43 = vld [vmem:[#allocation13 + $0x9f0] sm:$0xff]  ;;  %v5921_v5 = vpack.c.bf16 %v3191_v59, %v3183_v58  ;;  %v6067_v59 = vpack.c.bf16 %v3274_v53, %v3266_v52  ;;  %v4082_v47 = vld [vmem:[%s7279_s7 + $0x88] sm:$0xff] }
 0x99e   :  { %6028 = vmatprep.subr.bf16.mxu0 %v6027_v3  ;;  %v6037_v51 = vpack.c.bf16 %v3145_v43, %v3137_v24  ;;  %v3193_v62 = vld [vmem:[#allocation13 + $0xb70] sm:$0xff]  ;;  %v3210_v3 = vld [vmem:[#allocation13 + $0xbf8] sm:$0xff]  ;;  %v3240_v43 = vld [vmem:[#allocation13 + $0xce8] sm:$0xff] }
 0x99f   :  { %5902 = vmatpush1.bf16.msra.mxu1 %v5901_v6  ;;  %v6049_v4 = vpack.c.bf16 %v3193_v62, %v3185_v60  ;;  %v5923_v6 = vpack.c.bf16 %v3208_v1, %v3200_v63  ;;  %v6051_v10 = vpack.c.bf16 %v3210_v3, %v3202_v18  ;;  %v3225_v24 = vld [vmem:[#allocation13 + $0xc70] sm:$0xff]  ;;  %v3288_v62 = vld [vmem:[#allocation13 + $0xe68] sm:$0xff]  ;;  %v3282_v63 = vld [vmem:[#allocation13 + $0xe38] sm:$0xff] }
 0x9a0   :  { %6030 = vmatpush1.bf16.msra.mxu0 %v6029_v7  ;;  %5904 = vmatprep.subr.bf16.mxu1 %v5903_v8  ;;  %v3199_v7 = vld [vmem:[#allocation13 + $0xba0] sm:$0xff]  ;;  %v6057_v2 = vpack.c.bf16 %v3225_v24, %v3217_v20  ;;  %v3265_v58 = vld [vmem:[#allocation13 + $0xdb0] sm:$0xff]  ;;  %v3290_v1 = vld [vmem:[#allocation13 + $0xe78] sm:$0xff] }
 0x9a1   :  { %6032 = vmatprep.subr.bf16.mxu0 %v6031_v14  ;;  %v3207_v8 = vld [vmem:[#allocation13 + $0xbe0] sm:$0xff]  ;;  %v3216_v14 = vld [vmem:[#allocation13 + $0xc28] sm:$0xff]  ;;  %v3273_v60 = vld [vmem:[#allocation13 + $0xdf0] sm:$0xff] }
 0x9a2   :  { %v5925_v17 = vpack.c.bf16 %v3207_v8, %v3199_v7  ;;  %v6069_v3 = vpack.c.bf16 %v3273_v60, %v3265_v58  ;;  %v3281_v7 = vld [vmem:[#allocation13 + $0xe30] sm:$0xff]  ;;  %v6071_v8 = vpack.c.bf16 %v3290_v1, %v3282_v63  ;;  %v3320_v24 = vld [vmem:[#allocation13 + $0xf68] sm:$0xff]  ;;  %v4098_v58 = vld [vmem:[%s7279_s7 + $0x108] sm:$0xff] }
 0x9a3   :  { %5906 = vmatpush1.bf16.msra.mxu1 %v5905_v19  ;;  %v5927_v19 = vpack.c.bf16 %v3224_v11, %v3216_v14  ;;  %v3298_v14 = vld [vmem:[#allocation13 + $0xeb8] sm:$0xff]  ;;  %v6073_v16 = vpack.c.bf16 %v3289_v9, %v3281_v7  ;;  %v3305_v20 = vld [vmem:[#allocation13 + $0xef0] sm:$0xff]  ;;  %v4084_v60 = vld [vmem:[%s7279_s7 + $0x98] sm:$0xff] }
 0x9a4   :  { %6034 = vmatpush1.bf16.msra.mxu0 %v6033_v48  ;;  %5908 = vmatprep.subr.bf16.mxu1 %v5907_v45  ;;  %v3215_v48 = vld [vmem:[#allocation13 + $0xc20] sm:$0xff]  ;;  %v3306_v11 = vld [vmem:[#allocation13 + $0xef8] sm:$0xff]  ;;  %v3337_v46 = vld [vmem:[#allocation13 + $0xff0] sm:$0xff] }
 0x9a5   :  { %6036 = vmatprep.subr.bf16.mxu0 %v6035_v25  ;;  %v3223_v45 = vld [vmem:[#allocation13 + $0xc60] sm:$0xff]  ;;  %v3232_v25 = vld [vmem:[#allocation13 + $0xca8] sm:$0xff]  ;;  %v4086_v9 = vld [vmem:[%s7279_s7 + $0xa8] sm:$0xff] }
 0x9a6   :  { %v5929_v28 = vpack.c.bf16 %v3223_v45, %v3215_v48  ;;  %v3297_v48 = vld [vmem:[#allocation13 + $0xeb0] sm:$0xff]  ;;  %v6075_v45 = vpack.c.bf16 %v3306_v11, %v3298_v14  ;;  %v4100_v7 = vld [vmem:[%s7279_s7 + $0x118] sm:$0xff] }
 0x9a7   :  { %5910 = vmatpush1.bf16.msra.mxu1 %v5909_v29  ;;  %v5931_v29 = vpack.c.bf16 %v3240_v43, %v3232_v25  ;;  %v3314_v25 = vld [vmem:[#allocation13 + $0xf38] sm:$0xff]  ;;  %v6077_v27 = vpack.c.bf16 %v3305_v20, %v3297_v48  ;;  %v4087_v48 = vld [vmem:[%s7279_s7 + $0xb0] sm:$0xff] }
 0x9a8   :  { %6038 = vmatpush1.bf16.msra.mxu0 %v6037_v51  ;;  %5912 = vmatprep.subr.bf16.mxu1 %v5911_v30  ;;  %v3231_v51 = vld [vmem:[#allocation13 + $0xca0] sm:$0xff]  ;;  %v3322_v43 = vld [vmem:[#allocation13 + $0xf78] sm:$0xff] }
 0x9a9   :  { %6040 = vmatprep.subr.bf16.mxu0 %v6039_v22  ;;  %v3239_v30 = vld [vmem:[#allocation13 + $0xce0] sm:$0xff]  ;;  %v3248_v22 = vld [vmem:[#allocation13 + $0xd28] sm:$0xff] }
 0x9aa   :  { %v5933_v13 = vpack.c.bf16 %v3239_v30, %v3231_v51  ;;  %v3313_v51 = vld [vmem:[#allocation13 + $0xf30] sm:$0xff]  ;;  %v6079_v30 = vpack.c.bf16 %v3322_v43, %v3314_v25  ;;  %v4119_v20 = vld [vmem:[%s7279_s7 + $0x1b0] sm:$0xff] }
 0x9ab   :  { %5914 = vmatpush1.bf16.msra.mxu1 %v5913_v40  ;;  %v5935_v40 = vpack.c.bf16 %v3256_v34, %v3248_v22  ;;  %v3330_v22 = vld [vmem:[#allocation13 + $0xfb8] sm:$0xff]  ;;  %v6081_v36 = vpack.c.bf16 %v3321_v31, %v3313_v51  ;;  %v4089_v51 = vld [vmem:[%s7279_s7 + $0xc0] sm:$0xff] }
 0x9ac   :  { %6042 = vmatpush1.bf16.msra.mxu0 %v6041_v41  ;;  %5916 = vmatprep.subr.bf16.mxu1 %v5915_v44  ;;  %v3247_v41 = vld [vmem:[#allocation13 + $0xd20] sm:$0xff]  ;;  %v3338_v34 = vld [vmem:[#allocation13 + $0xff8] sm:$0xff]  ;;  %v4121_v31 = vld [vmem:[%s7279_s7 + $0x1c0] sm:$0xff] }
 0x9ad   :  { %6044 = vmatprep.subr.bf16.mxu0 %v6043_v49  ;;  %v3255_v44 = vld [vmem:[#allocation13 + $0xd60] sm:$0xff]  ;;  %v3264_v49 = vld [vmem:[#allocation13 + $0xda8] sm:$0xff] }
 0x9ae   :  { %v5937_v54 = vpack.c.bf16 %v3255_v44, %v3247_v41  ;;  %v3329_v41 = vld [vmem:[#allocation13 + $0xfb0] sm:$0xff]  ;;  %v6083_v44 = vpack.c.bf16 %v3338_v34, %v3330_v22 }
 0x9af   :  { %5918 = vmatpush1.bf16.msra.mxu1 %v5917_v55  ;;  %v5939_v55 = vpack.c.bf16 %v3272_v50, %v3264_v49  ;;  %v4113_v49 = vld [vmem:[%s7279_s7 + $0x180] sm:$0xff]  ;;  %v4114_v50 = vld [vmem:[%s7279_s7 + $0x188] sm:$0xff]  ;;  %v6085_v53 = vpack.c.bf16 %v3337_v46, %v3329_v41  ;;  %v4091_v41 = vld [vmem:[%s7279_s7 + $0xd0] sm:$0xff] }
 0x9b0   :  { %6046 = vmatpush1.bf16.msra.mxu0 %v6045_v56  ;;  %5920 = vmatprep.subr.bf16.mxu1 %v5919_v57  ;;  %v3263_v56 = vld [vmem:[#allocation13 + $0xda0] sm:$0xff] }
 0x9b1   :  { %6048 = vmatprep.subr.bf16.mxu0 %v6047_v61  ;;  %v3271_v57 = vld [vmem:[#allocation13 + $0xde0] sm:$0xff]  ;;  %v3280_v61 = vld [vmem:[#allocation13 + $0xe28] sm:$0xff] }
 0x9b2   :  { %v5941_v18 = vpack.c.bf16 %v3271_v57, %v3263_v56  ;;  %v4097_v56 = vld [vmem:[%s7279_s7 + $0x100] sm:$0xff]  ;;  %v6119_v57 = vpack.c.bf16 %v4114_v50, %v4113_v49  ;;  %v4123_v46 = vld [vmem:[%s7279_s7 + $0x1d0] sm:$0xff] }
 0x9b3   :  { %5922 = vmatpush1.bf16.msra.mxu1 %v5921_v5  ;;  %v5943_v5 = vpack.c.bf16 %v3288_v62, %v3280_v61  ;;  %v4115_v61 = vld [vmem:[%s7279_s7 + $0x190] sm:$0xff]  ;;  %v4116_v62 = vld [vmem:[%s7279_s7 + $0x198] sm:$0xff]  ;;  %v6121_v1 = vpack.c.bf16 %v4098_v58, %v4097_v56  ;;  %v4093_v56 = vld [vmem:[%s7279_s7 + $0xe0] sm:$0xff] }
 0x9b4   :  { %6050 = vmatpush1.bf16.msra.mxu0 %v6049_v4  ;;  %5924 = vmatprep.subr.bf16.mxu1 %v5923_v6  ;;  %v3279_v4 = vld [vmem:[#allocation13 + $0xe20] sm:$0xff]  ;;  %v4125_v58 = vld [vmem:[%s7279_s7 + $0x1e0] sm:$0xff] }
 0x9b5   :  { %6052 = vmatprep.subr.bf16.mxu0 %v6051_v10  ;;  %v3287_v6 = vld [vmem:[#allocation13 + $0xe60] sm:$0xff]  ;;  %v3296_v10 = vld [vmem:[#allocation13 + $0xea8] sm:$0xff] }
 0x9b6   :  { %v5945_v15 = vpack.c.bf16 %v3287_v6, %v3279_v4  ;;  %v4099_v4 = vld [vmem:[%s7279_s7 + $0x110] sm:$0xff]  ;;  %v6123_v6 = vpack.c.bf16 %v4116_v62, %v4115_v61 }
 0x9b7   :  { %5926 = vmatpush1.bf16.msra.mxu1 %v5925_v17  ;;  %v5947_v17 = vpack.c.bf16 %v3304_v12, %v3296_v10  ;;  %v4117_v10 = vld [vmem:[%s7279_s7 + $0x1a0] sm:$0xff]  ;;  %v4118_v12 = vld [vmem:[%s7279_s7 + $0x1a8] sm:$0xff]  ;;  %v6125_v11 = vpack.c.bf16 %v4100_v7, %v4099_v4  ;;  %v4095_v4 = vld [vmem:[%s7279_s7 + $0xf0] sm:$0xff] }
 0x9b8   :  { %6054 = vmatpush1.bf16.msra.mxu0 %v6053_v32  ;;  %5928 = vmatprep.subr.bf16.mxu1 %v5927_v19  ;;  %v3295_v32 = vld [vmem:[#allocation13 + $0xea0] sm:$0xff] }
 0x9b9   :  { %6056 = vmatprep.subr.bf16.mxu0 %v6055_v23  ;;  %v3303_v19 = vld [vmem:[#allocation13 + $0xee0] sm:$0xff]  ;;  %v3312_v23 = vld [vmem:[#allocation13 + $0xf28] sm:$0xff] }
 0x9ba   :  { %v5949_v26 = vpack.c.bf16 %v3303_v19, %v3295_v32  ;;  %v4101_v32 = vld [vmem:[%s7279_s7 + $0x120] sm:$0xff]  ;;  %v4102_v19 = vld [vmem:[%s7279_s7 + $0x128] sm:$0xff]  ;;  %v4127_v7 = vld [vmem:[%s7279_s7 + $0x1f0] sm:$0xff] }
 0x9bb   :  { %5930 = vmatpush1.bf16.msra.mxu1 %v5929_v28  ;;  %v5951_v28 = vpack.c.bf16 %v3320_v24, %v3312_v23  ;;  %v4120_v23 = vld [vmem:[%s7279_s7 + $0x1b8] sm:$0xff]  ;;  %v6129_v25 = vpack.c.bf16 %v4102_v19, %v4101_v32  ;;  %v4145_v32 = vld [vmem:[%s7279_s7 + $0x280] sm:$0xff] }
 0x9bc   :  { %6058 = vmatpush1.bf16.msra.mxu0 %v6057_v2  ;;  %5932 = vmatprep.subr.bf16.mxu1 %v5931_v29  ;;  %v3311_v2 = vld [vmem:[#allocation13 + $0xf20] sm:$0xff]  ;;  %v4177_v19 = vld [vmem:[%s7279_s7 + $0x380] sm:$0xff] }
 0x9bd   :  { %6060 = vmatprep.subr.bf16.mxu0 %v6059_v21  ;;  %v3319_v29 = vld [vmem:[#allocation13 + $0xf60] sm:$0xff]  ;;  %v3328_v21 = vld [vmem:[#allocation13 + $0xfa8] sm:$0xff] }
 0x9be   :  { %v5953_v35 = vpack.c.bf16 %v3319_v29, %v3311_v2  ;;  %v6131_v2 = vpack.c.bf16 %v4120_v23, %v4119_v20  ;;  %v4104_v29 = vld [vmem:[%s7279_s7 + $0x138] sm:$0xff] }
 0x9bf   :  { %5934 = vmatpush1.bf16.msra.mxu1 %v5933_v13  ;;  %v5955_v13 = vpack.c.bf16 %v3336_v33, %v3328_v21  ;;  %v4122_v21 = vld [vmem:[%s7279_s7 + $0x1c8] sm:$0xff] }
 0x9c0   :  { %6062 = vmatpush1.bf16.msra.mxu0 %v6061_v37  ;;  %5936 = vmatprep.subr.bf16.mxu1 %v5935_v40  ;;  %v3327_v37 = vld [vmem:[#allocation13 + $0xfa0] sm:$0xff] }
 0x9c1   :  { %6064 = vmatprep.subr.bf16.mxu0 %v6063_v39  ;;  %v3335_v40 = vld [vmem:[#allocation13 + $0xfe0] sm:$0xff]  ;;  %v4081_v39 = vld [vmem:[%s7279_s7 + $0x80] sm:$0xff] }
 0x9c2   :  { %v5957_v52 = vpack.c.bf16 %v3335_v40, %v3327_v37  ;;  %v6135_v37 = vpack.c.bf16 %v4122_v21, %v4121_v31  ;;  %v4106_v40 = vld [vmem:[%s7279_s7 + $0x148] sm:$0xff] }
 0x9c3   :  { %5938 = vmatpush1.bf16.msra.mxu1 %v5937_v54  ;;  %v6087_v54 = vpack.c.bf16 %v4082_v47, %v4081_v39  ;;  %v4124_v39 = vld [vmem:[%s7279_s7 + $0x1d8] sm:$0xff] }
 0x9c4   :  { %6066 = vmatpush1.bf16.msra.mxu0 %v6065_v38  ;;  %5940 = vmatprep.subr.bf16.mxu1 %v5939_v55  ;;  %v4065_v38 = vld [vmem:[%s7279_s7] sm:$0xff]  ;;  %v4066_v55 = vld [vmem:[%s7279_s7 + $0x8] sm:$0xff] }
 0x9c5   :  { %6068 = vmatprep.subr.bf16.mxu0 %v6067_v59  ;;  %v4083_v59 = vld [vmem:[%s7279_s7 + $0x90] sm:$0xff]  ;;  %v6089_v63 = vpack.c.bf16 %v4066_v55, %v4065_v38  ;;  %v6139_v38 = vpack.c.bf16 %v4124_v39, %v4123_v46  ;;  %v4108_v55 = vld [vmem:[%s7279_s7 + $0x158] sm:$0xff] }
 0x9c6   :  { %v4132_v46 = vld [vmem:[%s7279_s7 + $0x218] sm:$0xff] }
 0x9c7   :  { %5942 = vmatpush1.bf16.msra.mxu1 %v5941_v18  ;;  %v6091_v18 = vpack.c.bf16 %v4084_v60, %v4083_v59  ;;  %v4126_v59 = vld [vmem:[%s7279_s7 + $0x1e8] sm:$0xff] }
 0x9c8   :  { %6070 = vmatpush1.bf16.msra.mxu0 %v6069_v3  ;;  %5944 = vmatprep.subr.bf16.mxu1 %v5943_v5  ;;  %v4067_v3 = vld [vmem:[%s7279_s7 + $0x10] sm:$0xff]  ;;  %v4068_v5 = vld [vmem:[%s7279_s7 + $0x18] sm:$0xff] }
 0x9c9   :  { %6072 = vmatprep.subr.bf16.mxu0 %v6071_v8  ;;  %v4085_v8 = vld [vmem:[%s7279_s7 + $0xa0] sm:$0xff]  ;;  %v6093_v14 = vpack.c.bf16 %v4068_v5, %v4067_v3  ;;  %v6143_v3 = vpack.c.bf16 %v4126_v59, %v4125_v58  ;;  %v4110_v5 = vld [vmem:[%s7279_s7 + $0x168] sm:$0xff] }
 0x9ca   :  { %v4133_v59 = vld [vmem:[%s7279_s7 + $0x220] sm:$0xff] }
 0x9cb   :  { %5946 = vmatpush1.bf16.msra.mxu1 %v5945_v15  ;;  %v6095_v15 = vpack.c.bf16 %v4086_v9, %v4085_v8  ;;  %v4128_v8 = vld [vmem:[%s7279_s7 + $0x1f8] sm:$0xff] }
 0x9cc   :  { %6074 = vmatpush1.bf16.msra.mxu0 %v6073_v16  ;;  %5948 = vmatprep.subr.bf16.mxu1 %v5947_v17  ;;  %v4069_v16 = vld [vmem:[%s7279_s7 + $0x20] sm:$0xff]  ;;  %v4070_v17 = vld [vmem:[%s7279_s7 + $0x28] sm:$0xff] }
 0x9cd   :  { %6076 = vmatprep.subr.bf16.mxu0 %v6075_v45  ;;  %v4088_v45 = vld [vmem:[%s7279_s7 + $0xb8] sm:$0xff]  ;;  %v6097_v24 = vpack.c.bf16 %v4070_v17, %v4069_v16  ;;  %v6147_v16 = vpack.c.bf16 %v4128_v8, %v4127_v7  ;;  %v4135_v8 = vld [vmem:[%s7279_s7 + $0x230] sm:$0xff] }
 0x9ce   :  { %v6099_v43 = vpack.c.bf16 %v4088_v45, %v4087_v48  ;;  %v4112_v17 = vld [vmem:[%s7279_s7 + $0x178] sm:$0xff]  ;;  %v4178_v48 = vld [vmem:[%s7279_s7 + $0x388] sm:$0xff] }
 0x9cf   :  { %5950 = vmatpush1.bf16.msra.mxu1 %v5949_v26  ;;  %v4071_v26 = vld [vmem:[%s7279_s7 + $0x30] sm:$0xff] }
 0x9d0   :  { %6078 = vmatpush1.bf16.msra.mxu0 %v6077_v27  ;;  %5952 = vmatprep.subr.bf16.mxu1 %v5951_v28  ;;  %v4072_v27 = vld [vmem:[%s7279_s7 + $0x38] sm:$0xff]  ;;  %v4103_v28 = vld [vmem:[%s7279_s7 + $0x130] sm:$0xff] }
 0x9d1   :  { %6080 = vmatprep.subr.bf16.mxu0 %v6079_v30  ;;  %v4090_v30 = vld [vmem:[%s7279_s7 + $0xc8] sm:$0xff]  ;;  %v6101_v33 = vpack.c.bf16 %v4072_v27, %v4071_v26  ;;  %v6133_v22 = vpack.c.bf16 %v4104_v29, %v4103_v28  ;;  %v4161_v26 = vld [vmem:[%s7279_s7 + $0x300] sm:$0xff]  ;;  %v4147_v29 = vld [vmem:[%s7279_s7 + $0x290] sm:$0xff] }
 0x9d2   :  { %v6103_v34 = vpack.c.bf16 %v4090_v30, %v4089_v51  ;;  %v4148_v51 = vld [vmem:[%s7279_s7 + $0x298] sm:$0xff] }
 0x9d3   :  { %5954 = vmatpush1.bf16.msra.mxu1 %v5953_v35  ;;  %v4073_v35 = vld [vmem:[%s7279_s7 + $0x40] sm:$0xff] }
 0x9d4   :  { %6082 = vmatpush1.bf16.msra.mxu0 %v6081_v36  ;;  %5956 = vmatprep.subr.bf16.mxu1 %v5955_v13  ;;  %v4074_v36 = vld [vmem:[%s7279_s7 + $0x48] sm:$0xff]  ;;  %v4105_v13 = vld [vmem:[%s7279_s7 + $0x140] sm:$0xff] }
 0x9d5   :  { %6084 = vmatprep.subr.bf16.mxu0 %v6083_v44  ;;  %v4092_v44 = vld [vmem:[%s7279_s7 + $0xd8] sm:$0xff]  ;;  %v6105_v47 = vpack.c.bf16 %v4074_v36, %v4073_v35  ;;  %v6137_v49 = vpack.c.bf16 %v4106_v40, %v4105_v13  ;;  %v4179_v35 = vld [vmem:[%s7279_s7 + $0x390] sm:$0xff] }
 0x9d6   :  { %v6107_v50 = vpack.c.bf16 %v4092_v44, %v4091_v41  ;;  %v4180_v36 = vld [vmem:[%s7279_s7 + $0x398] sm:$0xff]  ;;  %v4131_v44 = vld [vmem:[%s7279_s7 + $0x210] sm:$0xff] }
 0x9d7   :  { %5958 = vmatpush1.bf16.msra.mxu1 %v5957_v52  ;;  %v4075_v52 = vld [vmem:[%s7279_s7 + $0x50] sm:$0xff] }
 0x9d8   :  { %6086 = vmatpush1.bf16.msra.mxu0 %v6085_v53  ;;  %6088 = vmatprep.subr.bf16.mxu1 %v6087_v54  ;;  %v4076_v53 = vld [vmem:[%s7279_s7 + $0x58] sm:$0xff]  ;;  %v4107_v54 = vld [vmem:[%s7279_s7 + $0x150] sm:$0xff] }
 0x9d9   :  { %6120 = vmatprep.subr.bf16.mxu0 %v6119_v57  ;;  %v4094_v57 = vld [vmem:[%s7279_s7 + $0xe8] sm:$0xff]  ;;  %v6109_v60 = vpack.c.bf16 %v4076_v53, %v4075_v52  ;;  %v6141_v61 = vpack.c.bf16 %v4108_v55, %v4107_v54  ;;  %v4163_v52 = vld [vmem:[%s7279_s7 + $0x310] sm:$0xff]  ;;  %v4164_v53 = vld [vmem:[%s7279_s7 + $0x318] sm:$0xff] }
 0x9da   :  { %3901 = vmatmul.mubr.f32.vlgmr.msra.gmra.mrb[16].mxu1 %v6843_v42  ;;  %v6111_v62 = vpack.c.bf16 %v4094_v57, %v4093_v56  ;;  %v4149_v54 = vld [vmem:[%s7279_s7 + $0x2a0] sm:$0xff]  ;;  %v4182_v56 = vld [vmem:[%s7279_s7 + $0x3a8] sm:$0xff]  ;;  %v6157_v57 = vpack.c.bf16 %v4132_v46, %v4131_v44  ;;  %v6189_v58 = vpack.c.bf16 %v4164_v53, %v4163_v52  ;;  %v4160_v52 = vld [vmem:[%s7279_s7 + $0x2f8] sm:$0xff] }
 0x9db   :  { %4043 = vmatmul.mubr.f32.vlgmr.msra.gmra.mrb[20].mxu0 %v6843_v42  ;;  %6090 = vmatpush3.bf16.msra.mxu1 %v6089_v63  ;;  %v6127_v42 = vpack.c.bf16 %v4118_v12, %v4117_v10  ;;  %v4077_v63 = vld [vmem:[%s7279_s7 + $0x60] sm:$0xff]  ;;  %v4142_v44 = vld [vmem:[%s7279_s7 + $0x268] sm:$0xff]  ;;  %v4191_v53 = vld [vmem:[%s7279_s7 + $0x3f0] sm:$0xff] }
 0x9dc   :  { %6122 = vmatpush3.bf16.msra.mxu0 %v6121_v1  ;;  %6092 = vmatprep.subr.bf16.mxu1 %v6091_v18  ;;  %v4078_v1 = vld [vmem:[%s7279_s7 + $0x68] sm:$0xff]  ;;  %v4109_v18 = vld [vmem:[%s7279_s7 + $0x160] sm:$0xff] }
 0x9dd   :  { %6124 = vmatprep.subr.bf16.mxu0 %v6123_v6  ;;  %v4096_v6 = vld [vmem:[%s7279_s7 + $0xf8] sm:$0xff]  ;;  %v6113_v9 = vpack.c.bf16 %v4078_v1, %v4077_v63  ;;  %v6145_v10 = vpack.c.bf16 %v4110_v5, %v4109_v18  ;;  %v4181_v55 = vld [vmem:[%s7279_s7 + $0x3a0] sm:$0xff]  ;;  %v4166_v1 = vld [vmem:[%s7279_s7 + $0x328] sm:$0xff] }
 0x9de   :  { %v6115_v12 = vpack.c.bf16 %v4096_v6, %v4095_v4  ;;  %v4165_v63 = vld [vmem:[%s7279_s7 + $0x320] sm:$0xff]  ;;  %v4151_v18 = vld [vmem:[%s7279_s7 + $0x2b0] sm:$0xff]  ;;  %v4184_v4 = vld [vmem:[%s7279_s7 + $0x3b8] sm:$0xff] }
 0x9df   :  { %6094 = vmatpush3.bf16.msra.mxu1 %v6093_v14  ;;  %v4079_v14 = vld [vmem:[%s7279_s7 + $0x70] sm:$0xff]  ;;  %v6193_v7 = vpack.c.bf16 %v4166_v1, %v4165_v63 }
 0x9e0   :  { %6126 = vmatpush3.bf16.msra.mxu0 %v6125_v11  ;;  %6096 = vmatprep.subr.bf16.mxu1 %v6095_v15  ;;  %v4080_v11 = vld [vmem:[%s7279_s7 + $0x78] sm:$0xff]  ;;  %v4111_v15 = vld [vmem:[%s7279_s7 + $0x170] sm:$0xff] }
 0x9e1   :  { %6128 = vmatprep.subr.bf16.mxu0 %v6127_v42  ;;  %v4146_v42 = vld [vmem:[%s7279_s7 + $0x288] sm:$0xff]  ;;  %v6117_v45 = vpack.c.bf16 %v4080_v11, %v4079_v14  ;;  %v6149_v20 = vpack.c.bf16 %v4112_v17, %v4111_v15  ;;  %v4183_v5 = vld [vmem:[%s7279_s7 + $0x3b0] sm:$0xff]  ;;  %v4168_v11 = vld [vmem:[%s7279_s7 + $0x338] sm:$0xff] }
 0x9e2   :  { %v6151_v23 = vpack.c.bf16 %v4146_v42, %v4145_v32  ;;  %v4167_v14 = vld [vmem:[%s7279_s7 + $0x330] sm:$0xff]  ;;  %v4153_v15 = vld [vmem:[%s7279_s7 + $0x2c0] sm:$0xff]  ;;  %v4186_v32 = vld [vmem:[%s7279_s7 + $0x3c8] sm:$0xff] }
 0x9e3   :  { %6098 = vmatpush3.bf16.msra.mxu1 %v6097_v24  ;;  %v6183_v24 = vpack.c.bf16 %v4178_v48, %v4177_v19  ;;  %v4185_v17 = vld [vmem:[%s7279_s7 + $0x3c0] sm:$0xff]  ;;  %v6197_v19 = vpack.c.bf16 %v4168_v11, %v4167_v14 }
 0x9e4   :  { %6130 = vmatpush3.bf16.msra.mxu0 %v6129_v25  ;;  %6100 = vmatprep.subr.bf16.mxu1 %v6099_v43  ;;  %v4129_v25 = vld [vmem:[%s7279_s7 + $0x200] sm:$0xff]  ;;  %v4130_v43 = vld [vmem:[%s7279_s7 + $0x208] sm:$0xff] }
 0x9e5   :  { %6132 = vmatprep.subr.bf16.mxu0 %v6131_v2  ;;  %v4162_v2 = vld [vmem:[%s7279_s7 + $0x308] sm:$0xff]  ;;  %v6153_v40 = vpack.c.bf16 %v4130_v43, %v4129_v25  ;;  %v4137_v48 = vld [vmem:[%s7279_s7 + $0x240] sm:$0xff]  ;;  %v4155_v43 = vld [vmem:[%s7279_s7 + $0x2d0] sm:$0xff] }
 0x9e6   :  { %v6185_v41 = vpack.c.bf16 %v4162_v2, %v4161_v26  ;;  %v4170_v25 = vld [vmem:[%s7279_s7 + $0x348] sm:$0xff]  ;;  %v4156_v26 = vld [vmem:[%s7279_s7 + $0x2d8] sm:$0xff] }
 0x9e7   :  { %6102 = vmatpush3.bf16.msra.mxu1 %v6101_v33 }
 0x9e8   :  { %6134 = vmatpush3.bf16.msra.mxu0 %v6133_v22  ;;  %6104 = vmatprep.subr.bf16.mxu1 %v6103_v34 }
 0x9e9   :  { %6136 = vmatprep.subr.bf16.mxu0 %v6135_v37 }
 0x9eb   :  { %6106 = vmatpush3.bf16.msra.mxu1 %v6105_v47 }
 0x9ec   :  { %6138 = vmatpush3.bf16.msra.mxu0 %v6137_v49  ;;  %6108 = vmatprep.subr.bf16.mxu1 %v6107_v50  ;;  %v6155_v49 = vpack.c.bf16 %v4148_v51, %v4147_v29  ;;  %v6187_v50 = vpack.c.bf16 %v4180_v36, %v4179_v35  ;;  %v4139_v51 = vld [vmem:[%s7279_s7 + $0x250] sm:$0xff]  ;;  %v4158_v35 = vld [vmem:[%s7279_s7 + $0x2e8] sm:$0xff]  ;;  %v4189_v36 = vld [vmem:[%s7279_s7 + $0x3e0] sm:$0xff] }
 0x9ed   :  { %6140 = vmatprep.subr.bf16.mxu0 %v6139_v38  ;;  %v4150_v38 = vld [vmem:[%s7279_s7 + $0x2a8] sm:$0xff] }
 0x9ef   :  { %6110 = vmatpush3.bf16.msra.mxu1 %v6109_v60  ;;  %v4134_v60 = vld [vmem:[%s7279_s7 + $0x228] sm:$0xff] }
 0x9f0   :  { %6142 = vmatpush3.bf16.msra.mxu0 %v6141_v61  ;;  %6112 = vmatprep.subr.bf16.mxu1 %v6111_v62  ;;  %v6159_v61 = vpack.c.bf16 %v4150_v38, %v4149_v54  ;;  %v6191_v62 = vpack.c.bf16 %v4182_v56, %v4181_v55  ;;  %v6161_v6 = vpack.c.bf16 %v4134_v60, %v4133_v59  ;;  %v4192_v54 = vld [vmem:[%s7279_s7 + $0x3f8] sm:$0xff]  ;;  %v4143_v56 = vld [vmem:[%s7279_s7 + $0x270] sm:$0xff] }
 0x9f1   :  { %6144 = vmatprep.subr.bf16.mxu0 %v6143_v3  ;;  %v4152_v3 = vld [vmem:[%s7279_s7 + $0x2b8] sm:$0xff]  ;;  %v4175_v60 = vld [vmem:[%s7279_s7 + $0x370] sm:$0xff] }
 0x9f2   :  { %v4144_v59 = vld [vmem:[%s7279_s7 + $0x278] sm:$0xff] }
 0x9f3   :  { %6114 = vmatpush3.bf16.msra.mxu1 %v6113_v9  ;;  %v4136_v9 = vld [vmem:[%s7279_s7 + $0x238] sm:$0xff] }
 0x9f4   :  { %6146 = vmatpush3.bf16.msra.mxu0 %v6145_v10  ;;  %6116 = vmatprep.subr.bf16.mxu1 %v6115_v12  ;;  %v6163_v10 = vpack.c.bf16 %v4152_v3, %v4151_v18  ;;  %v6195_v12 = vpack.c.bf16 %v4184_v4, %v4183_v5  ;;  %v6165_v42 = vpack.c.bf16 %v4136_v9, %v4135_v8 }
 0x9f5   :  { %6148 = vmatprep.subr.bf16.mxu0 %v6147_v16  ;;  %v4154_v16 = vld [vmem:[%s7279_s7 + $0x2c8] sm:$0xff] }
 0x9f7   :  { %6118 = vmatpush3.bf16.msra.mxu1 %v6117_v45  ;;  %v4138_v45 = vld [vmem:[%s7279_s7 + $0x248] sm:$0xff] }
 0x9f8   :  { %6150 = vmatpush3.bf16.msra.mxu0 %v6149_v20  ;;  %6152 = vmatprep.subr.bf16.mxu1 %v6151_v23  ;;  %v6167_v20 = vpack.c.bf16 %v4154_v16, %v4153_v15  ;;  %v6199_v23 = vpack.c.bf16 %v4186_v32, %v4185_v17  ;;  %v6169_v2 = vpack.c.bf16 %v4138_v45, %v4137_v48 }
 0x9f9   :  { %6184 = vmatprep.subr.bf16.mxu0 %v6183_v24  ;;  %v4169_v24 = vld [vmem:[%s7279_s7 + $0x340] sm:$0xff] }
 0x9fa   :  { %v6201_v29 = vpack.c.bf16 %v4170_v25, %v4169_v24 }
 0xa2d   :  { %v3618_v27 = vpop.f32.mrb[14].mxu1  ;;  %v3760_v28 = vpop.f32.mrb[18].mxu0 }
 0xa2e   :  { %v4049_v30 = vmul.f32 0.01, %v3618_v27  ;;  %v4051_v31 = vmul.f32 0.01, %v3760_v28  ;;  %v3620_v21 = vpop.f32.mrb[15].mxu1  ;;  %v3762_v33 = vpop.f32.mrb[19].mxu0 }
 0xa2f   :  { %v4050_v22 = vmul.f32 0.01, %v3620_v21  ;;  %v4052_v34 = vmul.f32 0.01, %v3762_v33 }
 0xa30   :  { %v4057_v39 = vmax.f32 %v3618_v27, %v4049_v30  ;;  %v4059_v47 = vmax.f32 %v3760_v28, %v4051_v31  ;;  %v4187_v27 = vld [vmem:[%s7279_s7 + $0x3d0] sm:$0xff]  ;;  %v4188_v28 = vld [vmem:[%s7279_s7 + $0x3d8] sm:$0xff]  ;;  %v6171_v31 = vpack.c.bf16 %v4156_v26, %v4155_v43 }
 0xa31   :  { %v4058_v13 = vmax.f32 %v3620_v21, %v4050_v22  ;;  %v4060_v37 = vmax.f32 %v3762_v33, %v4052_v34  ;;  %v4140_v30 = vld [vmem:[%s7279_s7 + $0x258] sm:$0xff]  ;;  %v6203_v21 = vpack.c.bf16 %v4188_v28, %v4187_v27  ;;  %v4171_v33 = vld [vmem:[%s7279_s7 + $0x350] sm:$0xff]  ;;  %v4157_v34 = vld [vmem:[%s7279_s7 + $0x2e0] sm:$0xff] }
 0xa32   :  { %v4172_v22 = vld [vmem:[%s7279_s7 + $0x358] sm:$0xff]  ;;  %v6175_v46 = vpack.c.bf16 %v4158_v35, %v4157_v34  ;;  %v6289_v27 = vld [vmem:[#allocation2] sm:$0xff] }
 0xa33   :  { %4257 = vmatprep.mubr.f32.mxu1 %v4058_v13  ;;  %4327 = vmatprep.mubr.f32.mxu0 %v4060_v37  ;;  %v4190_v13 = vld [vmem:[%s7279_s7 + $0x3e8] sm:$0xff]  ;;  %v6173_v37 = vpack.c.bf16 %v4140_v30, %v4139_v51 }
 0xa34   :  { %4258 = vmatmul.mubr.f32.vlgmr.msra.gmra.mrb[18].mxu1 %v4057_v39  ;;  %4328 = vmatmul.mubr.f32.vlgmr.msra.gmra.mrb[22].mxu0 %v4059_v47  ;;  %v6207_v39 = vpack.c.bf16 %v4190_v13, %v4189_v36  ;;  %v4173_v47 = vld [vmem:[%s7279_s7 + $0x360] sm:$0xff] }
 0xa35   :  { %6154 = vmatpush3.bf16.msra.mxu1 %v6153_v40  ;;  %6186 = vmatpush3.bf16.msra.mxu0 %v6185_v41  ;;  %v6205_v40 = vpack.c.bf16 %v4172_v22, %v4171_v33  ;;  %v4141_v41 = vld [vmem:[%s7279_s7 + $0x260] sm:$0xff] }
 0xa36   :  { %6156 = vmatprep.subr.bf16.mxu1 %v6155_v49  ;;  %6188 = vmatprep.subr.bf16.mxu0 %v6187_v50  ;;  %v4174_v49 = vld [vmem:[%s7279_s7 + $0x368] sm:$0xff]  ;;  %v4159_v50 = vld [vmem:[%s7279_s7 + $0x2f0] sm:$0xff]  ;;  %v6177_v38 = vpack.c.bf16 %v4142_v44, %v4141_v41 }
 0xa37   :  { %v6209_v55 = vpack.c.bf16 %v4174_v49, %v4173_v47 }
 0xa39   :  { %6158 = vmatpush3.bf16.msra.mxu1 %v6157_v57  ;;  %6190 = vmatpush3.bf16.msra.mxu0 %v6189_v58  ;;  %v6179_v57 = vpack.c.bf16 %v4160_v52, %v4159_v50  ;;  %v6211_v58 = vpack.c.bf16 %v4192_v54, %v4191_v53 }
 0xa3a   :  { %6160 = vmatprep.subr.bf16.mxu1 %v6159_v61  ;;  %6192 = vmatprep.subr.bf16.mxu0 %v6191_v62  ;;  %v4176_v61 = vld [vmem:[%s7279_s7 + $0x378] sm:$0xff]  ;;  %v6181_v62 = vpack.c.bf16 %v4144_v59, %v4143_v56  ;;  %s6516_s7 = smov [#allocation15]  }
 0xa3b   :  { %v6213_v63 = vpack.c.bf16 %v4176_v61, %v4175_v60  ;;  %s4561_s27 = sshll.u32 %s6516_s7, 4  ;;  %s4562_s27 = int_to_ptr.vmem [resolvable:$true] %s4561_s27 }
 0xa3c   :  { %s6444_s28 = scalar_lea.vmem %s4562_s27, 128  ;;  %p6449_p1 = scmp.lt.s32.totalorder %s4562_s27, %s4562_s27 }
 0xa3d   :  { %6162 = vmatpush3.bf16.msra.mxu1 %v6161_v6  ;;  %6194 = vmatpush3.bf16.msra.mxu0 %v6193_v7  ;;  %p6445_p0 = scmp.ne.s32.totalorder %s4562_s27, %s6444_s28  ;;  %p6450_p2 = scmp.lt.s32.totalorder %s6444_s28, %s6444_s28 }
 0xa3e   :  { %6164 = vmatprep.subr.bf16.mxu1 %v6163_v10  ;;  %6196 = vmatprep.subr.bf16.mxu0 %v6195_v12 }
 0xa3f   :  { %p6451_p3 = por %p6450_p2, %p6449_p1 }
 0xa41   :  { %6166 = vmatpush3.bf16.msra.mxu1 %v6165_v42  ;;  %6198 = vmatpush3.bf16.msra.mxu0 %v6197_v19  ;;  %p6452_p4 = pnand %p6451_p3, %p6445_p0 }
 0xa42   :  { %6168 = vmatprep.subr.bf16.mxu1 %v6167_v20  ;;  %6200 = vmatprep.subr.bf16.mxu0 %v6199_v23 }
 0xa45   :  { %6170 = vmatpush3.bf16.msra.mxu1 %v6169_v2  ;;  %6202 = vmatpush3.bf16.msra.mxu0 %v6201_v29 }
 0xa46   :  { %6172 = vmatprep.subr.bf16.mxu1 %v6171_v31  ;;  %6204 = vmatprep.subr.bf16.mxu0 %v6203_v21 }
 0xa49   :  { %6174 = vmatpush3.bf16.msra.mxu1 %v6173_v37  ;;  %6206 = vmatpush3.bf16.msra.mxu0 %v6205_v40 }
 0xa4a   :  { %6176 = vmatprep.subr.bf16.mxu1 %v6175_v46  ;;  %6208 = vmatprep.subr.bf16.mxu0 %v6207_v39 }
 0xa4d   :  { %6178 = vmatpush3.bf16.msra.mxu1 %v6177_v38  ;;  %6210 = vmatpush3.bf16.msra.mxu0 %v6209_v55 }
 0xa4e   :  { %6180 = vmatprep.subr.bf16.mxu1 %v6179_v57  ;;  %6212 = vmatprep.subr.bf16.mxu0 %v6211_v58 }
 0xa51   :  { %6182 = vmatpush3.bf16.msra.mxu1 %v6181_v62  ;;  %6214 = vmatpush3.bf16.msra.mxu0 %v6213_v63 }
 0xa52   :  { %4738 = vmatprep.subr.mxu1 %v6513_v0 }
 0xaad   :  { %v3902_v1 = vpop.f32.mrb[16].mxu1 }
 0xaae   :  { %v4053_v18 = vmul.f32 0.01, %v3902_v1  ;;  %v4044_v3 = vpop.f32.mrb[20].mxu0  ;;  %v3904_v5 = vpop.f32.mrb[17].mxu1 }
 0xaaf   :  { %v4055_v4 = vmul.f32 0.01, %v4044_v3  ;;  %v4054_v6 = vmul.f32 0.01, %v3904_v5  ;;  %v4046_v7 = vpop.f32.mrb[21].mxu0 }
 0xab0   :  { %v4056_v8 = vmul.f32 0.01, %v4046_v7  ;;  %v4061_v10 = vmax.f32 %v3902_v1, %v4053_v18 }
 0xab1   :  { %v4062_v9 = vmax.f32 %v3904_v5, %v4054_v6  ;;  %v4063_v14 = vmax.f32 %v4044_v3, %v4055_v4 }
 0xab2   :  { %v4064_v12 = vmax.f32 %v4046_v7, %v4056_v8 }
 0xab3   :  { %4397 = vmatprep.mubr.f32.mxu1 %v4062_v9 }
 0xab4   :  { %4467 = vmatprep.mubr.f32.mxu0 %v4064_v12  ;;  %4398 = vmatmul.mubr.f32.vlgmr.msra.gmra.mrb[20].mxu1 %v4061_v10 }
 0xab5   :  { %4468 = vmatmul.mubr.f32.vlgmr.msra.gmra.mrb[24].mxu0 %v4063_v14  ;;  %4740 = vmatprep.mubr.msk.f32.mxu1 %vm6514_vm0, %v6513_v0 }
 0xb07   :  { %v4623_v11 = vpop.f32.mrb[18].mxu1  ;;  %v4658_v15 = vpop.f32.mrb[22].mxu0 }
 0xb08   :  { %v4624_v16 = vpop.f32.mrb[19].mxu1  ;;  %v4659_v17 = vpop.f32.mrb[23].mxu0 }
 0xb09   :  { %v4625_v32 = vadd.f32 %v4624_v16, %v4623_v11  ;;  %v4660_v42 = vadd.f32 %v4659_v17, %v4658_v15 }
 0xb0b   :  { %v4330_v19 = vadd.f32 %v4660_v42, %v4625_v32 }
 0xb87   :  { %v4693_v48 = vpop.f32.mrb[20].mxu1 }
 0xb88   :  { %v4728_v45 = vpop.f32.mrb[24].mxu0  ;;  %v4694_v20 = vpop.f32.mrb[21].mxu1 }
 0xb89   :  { %v4695_v23 = vadd.f32 %v4694_v20, %v4693_v48  ;;  %v4729_v24 = vpop.f32.mrb[25].mxu0 }
 0xb8a   :  { %v4730_v25 = vadd.f32 %v4729_v24, %v4728_v45 }
 0xb8b   :  { %v4400_v43 = vadd.f32 %v4695_v23, %v4330_v19 }
 0xb8d   :  { %v4470_v26 = vadd.f32 %v4730_v25, %v4400_v43 }
 0xb8f   :  { %4739 = vmatpush3.msra.mxu1 %v4470_v26 }
 0xb90   :  { %4741 = vmatmul.mubr.msk.f32.vlgmr.msra.gmra.mrb[22].mxu1 %vm190_vm1, %v6289_v27 }
 0xb91   :  { %6455 = shalt.err (!%p6452_p4)
}
 0xb92   :  { %s6456_s11 = scalar_lea.hbm %s7281_s9, 128 }
 0xb93   :  { %p6457_p5 = scmp.ne.s32.totalorder %s7281_s9, %s6456_s11  ;;  %p6460_p6 = scmp.lt.u32.totalorder %s6456_s11, %s7281_s9 }
 0xb95   :  { %p6462_p7 = pnand %p6460_p6, %p6457_p5 }
 0xb97   :  { %6465 = shalt.err (!%p6462_p7)
}
 0xb98   :  { %4564 = dma.vmem_to_hbm [thread:$0]  %s4562_s27, 128, %s7281_s9, [#allocation16]  }
 0xb99   :  { %s6517_s15 = smov [#allocation14]  }
 0xb9a   :  { %s4551_s16 = sshll.u32 %s6517_s15, 4  ;;  %s4552_s16 = int_to_ptr.vmem [resolvable:$true] %s4551_s16 }
 0xb9b   :  { %s6466_s18 = scalar_lea.vmem %s4552_s16, 128  ;;  %p6471_p9 = scmp.lt.s32.totalorder %s4552_s16, %s4552_s16 }
 0xb9c   :  { %p6467_p8 = scmp.ne.s32.totalorder %s4552_s16, %s6466_s18  ;;  %p6472_p10 = scmp.lt.s32.totalorder %s6466_s18, %s6466_s18 }
 0xb9e   :  { %p6473_p11 = por %p6472_p10, %p6471_p9 }
 0xba0   :  { %p6474_p12 = pnand %p6473_p11, %p6467_p8 }
 0xc63   :  { %v4539_v0 = vpop.f32.mrb[22].mxu1 }
 0xc64   :  { %v4543_v28 = vmax.f32 %v4539_v0, 0.0  ;;  %v4742_v2 = vpop.f32.mrb[23].mxu1 }
 0xc66   :  { %4544 = vst.msk [vmem:[#allocation14] sm:$0xff] %vm264_vm2, %v4543_v28 }
 0xc67   :  { %6477 = shalt.err (!%p6474_p12)
}
 0xc68   :  { %s6478_s21 = scalar_lea.hbm %s7280_s8, 128 }
 0xc69   :  { %p6479_p13 = scmp.ne.s32.totalorder %s7280_s8, %s6478_s21  ;;  %p6482_p0 = scmp.lt.u32.totalorder %s6478_s21, %s7280_s8 }
 0xc6b   :  { %p6484_p1 = pnand %p6482_p0, %p6479_p13 }
 0xc6d   :  { %6487 = shalt.err (!%p6484_p1)
}
 0xc6e   :  { %4554 = dma.vmem_to_hbm [thread:$0]  %s4552_s16, 128, %s7280_s8, [#allocation4]  }
 0xc6f   :  { %6496 = dma.done.wait [#allocation4], 128  }
 0xc70   :  { %6497 = vsyncadd [#allocation4], 4294967168 }
 0xc71   :  { %6498 = dma.done.wait [#allocation16], 128  }
 0xc72   :  { %6499 = vsyncadd [#allocation16], 4294967168 }
 0xc73   :  { %4571 = vsyncpa [#allocation3], 1 }
 0xc74   :  { %4572 = vsyncpa [#allocation6], 1 }
 0xc75   :  { %4573 = vsyncpa [#allocation9], 1 }
 0xc76   :  { %4574 = vsyncpa [#allocation12], 1 }
 0xc77   :  { %4575 = vsyncpa [#allocation4], 1 }
 0xc78   :  { %4576 = vsyncpa [#allocation16], 1 }

</bundles_post_ra>
